<compile_context>
chip_gen: v7x
topology: tpu7x:2x2x1
jax: 0.10.0
libtpu: 0.0.40
codegen_flags: <defaults>
</compile_context>

<pallas_src>
import jax
import jax.numpy as jnp
from jax.experimental import pallas as pl
from jax.experimental.pallas import tpu as pltpu


def _upsample_conv_kernel(x_ref, w_ref, b_ref, o_ref):
    # x_ref: (1, H+2, W+2, C)   zero-padded input image (resident across row tiles)
    # w_ref: (4, 2, 2, C, C)    parity-fused 2x2 weights; p = 2*pr + pc,
    #                           tap (a, b) reads base pixel (i+pr+a-1, j+pc+b-1)
    # b_ref: (1, C)             bias (f32)
    # o_ref: (1, 4, TH, W, C)   per-parity output planes for this row tile
    TH = o_ref.shape[2]
    W = o_ref.shape[3]
    C = o_ref.shape[4]

    t = pl.program_id(1)
    row0 = pl.multiple_of(t * TH, TH)
    # TH base-resolution rows plus one halo row on each side: a leading-axis
    # dynamic slice of the resident padded image (pure address offset).
    slab = x_ref[0, pl.ds(row0, TH + 2)]                    # (TH+2, W+2, C)

    # Three column taps (j-1, j, j+1) as static slices of the W-padded slab,
    # flattened so the per-parity row windows below are plain leading-axis
    # slices.  No roll, no edge masks, no lane-dim concats.
    R = (TH + 2) * W
    cols = [slab[:, dc:dc + W, :].reshape(R, C) for dc in range(3)]

    def tap(dr, dc):
        # Rows [dr, dr+TH) of column tap dc as a (TH*W, C) matmul operand.
        return cols[dc][dr * W:(dr + TH) * W]

    bias = b_ref[0].astype(jnp.float32)                     # (C,)

    for pr in range(2):
        for pc in range(2):
            p = 2 * pr + pc
            # Four K=C dots against statically indexed weight planes replace
            # the previous K=4C concat-matmul (same MACs, no concat copies).
            acc = jnp.dot(tap(pr, pc), w_ref[p, 0, 0],
                          preferred_element_type=jnp.float32)
            acc = acc + jnp.dot(tap(pr, pc + 1), w_ref[p, 0, 1],
                                preferred_element_type=jnp.float32)
            acc = acc + jnp.dot(tap(pr + 1, pc), w_ref[p, 1, 0],
                                preferred_element_type=jnp.float32)
            acc = acc + jnp.dot(tap(pr + 1, pc + 1), w_ref[p, 1, 1],
                                preferred_element_type=jnp.float32)
            acc = acc + bias
            o_ref[0, p] = acc.reshape(TH, W, C).astype(o_ref.dtype)


def _parity_weights(w_oihw):
    """(Cout, Cin, 3, 3) conv weights -> (4, 2, 2, Cin, Cout) parity weights (f32).

    Parity p = 2*pr + pc; tap (a, b) multiplies the base-resolution input pixel
    (i + pr + a - 1, j + pc + b - 1) for output pixel (2i + pr, 2j + pc).
    """
    w = jnp.transpose(w_oihw.astype(jnp.float32), (2, 3, 1, 0))   # (kh, kw, ci, co)

    def comb(t0, t1, t2, parity):
        # parity 0: output taps read positions (-1, 0)  -> [k0, k1 + k2]
        # parity 1: output taps read positions ( 0, +1) -> [k0 + k1, k2]
        return [t0, t1 + t2] if parity == 0 else [t0 + t1, t2]

    planes = []
    for pr in (0, 1):
        rowp = comb(w[0], w[1], w[2], pr)                   # 2 x (kw, ci, co)
        for pc in (0, 1):
            taps = []
            for a in (0, 1):
                ra = rowp[a]                                # (kw, ci, co)
                taps.append(jnp.stack(comb(ra[0], ra[1], ra[2], pc), axis=0))
            planes.append(jnp.stack(taps, axis=0))          # (2, 2, ci, co)
    return jnp.stack(planes, axis=0)                        # (4, 2, 2, ci, co)


def _vmem_capacity_bytes():
    # Generation-aware budget (v5e/v6e: 128 MiB, v7x: 64 MiB per TensorCore).
    try:
        return int(pltpu.get_tpu_info().vmem_capacity_bytes)
    except Exception:
        return 64 << 20   # conservative fallback (v7x per-core VMEM)


def _pick_tile_rows(N, H, W, C, in_bytes, out_bytes, vmem_cap):
    """Largest divisor of H whose working set fits VMEM, preferring TH*W that
    is a multiple of the MXU-native 256 (128) tile."""
    # TH-independent residents: double-buffered padded image, single-buffered
    # parity weights + bias, plus headroom for compiler scratch.
    fixed = (2 * (H + 2) * (W + 2) * C * in_bytes
             + 16 * C * C * in_bytes
             + 2 * C * 4
             + (6 << 20))
    budget = max(vmem_cap - fixed, 1 << 20)
    per_row = (2 * 4 * W * C * out_bytes        # double-buffered output tile
               + 3 * W * C * in_bytes           # three column-tap copies
               + (W + 2) * C * in_bytes         # loaded slab
               + 2 * 4 * W * C * 4)             # f32 dot results / accumulator
    th_max = int(max(1, min(H, budget // max(per_row, 1))))
    # Keep >= 2 grid steps when the batch alone doesn't provide them (megacore).
    if N == 1 and th_max >= H and H > 1:
        th_max = max(1, H // 2)
    divs = [d for d in range(1, H + 1) if H % d == 0 and d <= th_max]
    best = max(divs) if divs else 1
    for align in (256, 128):
        cands = [d for d in divs if (d * W) % align == 0 and 2 * d >= best]
        if cands:
            return max(cands)
    return best


def upsample_forward(x_nchw, w_oihw, b, *, tile_rows=None, compute_dtype=None):
    """Nearest-2x upsample + Conv2d(C, C, 3, padding=1).

    x_nchw: (N, C, H, W); w_oihw: (C, C, 3, 3); b: (C,).  Returns (N, C, 2H, 2W).
    compute_dtype: optional MXU dtype (e.g. jnp.bfloat16) for activations and
      fused weights; accumulation/bias stay f32, output keeps x's dtype.
    """
    N, C, H, W = x_nchw.shape
    out_dtype = x_nchw.dtype
    cdtype = jnp.dtype(compute_dtype) if compute_dtype is not None else jnp.dtype(out_dtype)
    in_b = cdtype.itemsize
    out_b = jnp.dtype(out_dtype).itemsize

    # NHWC with one zero row/column of padding on every side: the conv's zero
    # padding expressed at base resolution, so all kernel taps are plain slices.
    x_nhwc = jnp.transpose(x_nchw, (0, 2, 3, 1))
    x_pad = jnp.pad(x_nhwc, ((0, 0), (1, 1), (1, 1), (0, 0))).astype(cdtype)

    # Parity-fused weights, pre-summed in f32 then cast to the compute dtype;
    # bias kept in f32 for the f32 accumulator.
    wp = _parity_weights(w_oihw).astype(cdtype)              # (4, 2, 2, C, C)
    b2 = b.astype(jnp.float32).reshape(1, C)

    vmem_cap = _vmem_capacity_bytes()
    if tile_rows is None:
        tile_rows = _pick_tile_rows(N, H, W, C, in_b, out_b, vmem_cap)
    # Fall back (rather than hard-fail) to the nearest divisor of H.
    TH = int(max(1, min(int(tile_rows), H)))
    while TH > 1 and H % TH:
        TH -= 1
    grid = (N, H // TH)

    # Scoped-VMEM limit: only raised when needed and never past the physical
    # per-core capacity (the old 96 MiB cap exceeded v7x's 64 MiB).
    temps = ((TH + 2) * (W + 2) * C * in_b
             + 3 * (TH + 2) * W * C * in_b
             + 2 * 4 * TH * W * C * 4)
    est = (2 * (H + 2) * (W + 2) * C * in_b
           + 16 * C * C * in_b + 2 * C * 4
           + 2 * 4 * TH * W * C * out_b
           + temps)
    cp_kwargs = dict(dimension_semantics=("parallel", "parallel"))
    if est > (16 << 20):
        cp_kwargs["vmem_limit_bytes"] = int(
            min(max(est + (4 << 20), 32 << 20), max(vmem_cap - (4 << 20), 16 << 20)))

    cost = pl.CostEstimate(
        flops=2 * 16 * N * H * W * C * C,
        transcendentals=0,
        bytes_accessed=(N * (H + 2) * (W + 2) * C * in_b
                        + N * 4 * H * W * C * out_b
                        + 16 * C * C * in_b + 4 * C))

    x_map = lambda n, t: (n, 0, 0, 0)
    w_map = lambda n, t: (0, 0, 0, 0, 0)
    b_map = lambda n, t: (0, 0)
    o_map = lambda n, t: (n, 0, t, 0, 0)

    def call(single_buffer_consts):
        if single_buffer_consts:
            # Constant-index operands: one VMEM buffer (double-buffering buys
            # nothing; at SD channel counts the 16*C^2 weights matter on v7x).
            w_spec = pl.BlockSpec((4, 2, 2, C, C), w_map, pipeline_mode=pl.Buffered(1))
            b_spec = pl.BlockSpec((1, C), b_map, pipeline_mode=pl.Buffered(1))
        else:
            w_spec = pl.BlockSpec((4, 2, 2, C, C), w_map)
            b_spec = pl.BlockSpec((1, C), b_map)
        return pl.pallas_call(
            _upsample_conv_kernel,
            out_shape=jax.ShapeDtypeStruct((N, 4, H, W, C), out_dtype),
            grid_spec=pltpu.PrefetchScalarGridSpec(
                num_scalar_prefetch=0,
                grid=grid,
                in_specs=[
                    # Full padded image, resident across the row-tile axis
                    # (constant block index => one DMA per batch element).
                    pl.BlockSpec((1, H + 2, W + 2, C), x_map),
                    w_spec,
                    b_spec,
                ],
                out_specs=pl.BlockSpec((1, 4, TH, W, C), o_map),
            ),
            compiler_params=pltpu.CompilerParams(**cp_kwargs),
            cost_estimate=cost,
        )(x_pad, wp, b2)

    try:
        out5 = call(True)
    except Exception:
        # Fallback for jax versions without BlockSpec.pipeline_mode/Buffered(1).
        out5 = call(False)

    # Interleave the 4 parity planes into NCHW with one fused transpose (this
    # replaces the NHWC->NCHW transpose the module needs anyway).  If the
    # consumer accepted NHWC, the cheaper (0,3,1,4,2,5) permutation keeping C
    # minor would be preferred.
    o = out5.reshape(N, 2, 2, H, W, C)                 # (N, pr, pc, H, W, C)
    o = jnp.transpose(o, (0, 5, 3, 1, 4, 2))           # (N, C, H, pr, W, pc)
    return o.reshape(N, C, 2 * H, 2 * W)


def _reference(x_nchw, w_oihw, b):
    # Pure-JAX reference: nearest 2x upsample + conv2d(pad=1), NCHW.
    xu = jnp.repeat(jnp.repeat(x_nchw, 2, axis=2), 2, axis=3)
    y = jax.lax.conv_general_dilated(
        xu, w_oihw, window_strides=(1, 1), padding=((1, 1), (1, 1)),
        dimension_numbers=("NCHW", "OIHW", "NCHW"))
    return y + b.reshape(1, -1, 1, 1)


if __name__ == "__main__":
    N, C, H, W = 2, 4, 16, 16
    key = jax.random.PRNGKey(0)
    kx, kw, kb = jax.random.split(key, 3)

    x = jax.random.normal(kx, (N, C, H, W), dtype=jnp.float32)
    # deterministic synthetic Conv2d(channels, channels, 3, padding=1) params
    w = jax.random.normal(kw, (C, C, 3, 3), dtype=jnp.float32) * 0.1
    b = jax.random.normal(kb, (C,), dtype=jnp.float32) * 0.1

    ref = jax.block_until_ready(_reference(x, w, b))

    # Default (auto-picked) tiling.
    out = jax.block_until_ready(upsample_forward(x, w, b))
    assert out.shape == (N, C, 2 * H, 2 * W), out.shape
    assert jnp.allclose(out, ref, atol=1e-4, rtol=1e-4), \
        float(jnp.max(jnp.abs(out - ref)))

    # Explicit row-tiled run to exercise the halo / streaming-output path.
    out_t = jax.block_until_ready(upsample_forward(x, w, b, tile_rows=4))
    assert jnp.allclose(out_t, ref, atol=1e-4, rtol=1e-4), \
        float(jnp.max(jnp.abs(out_t - ref)))

    print("KERNEL_OK")
</pallas_src>

<mosaic_0001>
module attributes {stable_mosaic.version = 11 : i64} {
  func.func @_upsample_conv_kernel(%arg0: i32, %arg1: i32, %arg2: memref<1x18x18x4xf32, #tpu.memory_space<vmem>>, %arg3: memref<4x2x2x4x4xf32, #tpu.memory_space<vmem>>, %arg4: memref<1x4xf32, #tpu.memory_space<vmem>>, %arg5: memref<1x4x16x16x4xf32, #tpu.memory_space<vmem>>) attributes {dimension_semantics = [#tpu.dimension_semantics<parallel>, #tpu.dimension_semantics<parallel>], iteration_bounds = array<i64: 2, 1>, scalar_prefetch = 0 : i64, scratch_operands = 0 : i64, tpu.core_type = #tpu.core_type<tc>, window_params = [{transform_indices = @transform_0, window_bounds = array<i64: 1, 18, 18, 4>}, {pipeline_mode = #tpu.pipeline_mode<synchronous>, transform_indices = @transform_1, window_bounds = array<i64: 4, 2, 2, 4, 4>}, {pipeline_mode = #tpu.pipeline_mode<synchronous>, transform_indices = @transform_2, window_bounds = array<i64: 1, 4>}, {transform_indices = @transform_3, window_bounds = array<i64: 1, 4, 16, 16, 4>}]} {
    %c16_i32 = arith.constant 16 : i32
    %0 = arith.muli %arg1, %c16_i32 : i32
    %1 = tpu.assume_multiple %0, 16 : i32
    %c0 = arith.constant 0 : index
    %2 = arith.index_cast %1 : i32 to index
    %c0_0 = arith.constant 0 : index
    %c0_1 = arith.constant 0 : index
    %3 = vector.load %arg2[%c0, %2, %c0_0, %c0_1] : memref<1x18x18x4xf32, #tpu.memory_space<vmem>>, vector<1x18x18x4xf32>
    %4 = vector.shape_cast %3 : vector<1x18x18x4xf32> to vector<18x18x4xf32>
    %5 = vector.extract_strided_slice %4 {offsets = [0, 0, 0], sizes = [18, 16, 4], strides = [1, 1, 1]} : vector<18x18x4xf32> to vector<18x16x4xf32>
    %6 = vector.shape_cast %5 : vector<18x16x4xf32> to vector<288x4xf32>
    %7 = vector.extract_strided_slice %4 {offsets = [0, 1, 0], sizes = [18, 16, 4], strides = [1, 1, 1]} : vector<18x18x4xf32> to vector<18x16x4xf32>
    %8 = vector.shape_cast %7 : vector<18x16x4xf32> to vector<288x4xf32>
    %9 = vector.extract_strided_slice %4 {offsets = [0, 2, 0], sizes = [18, 16, 4], strides = [1, 1, 1]} : vector<18x18x4xf32> to vector<18x16x4xf32>
    %10 = vector.shape_cast %9 : vector<18x16x4xf32> to vector<288x4xf32>
    %c0_2 = arith.constant 0 : index
    %c0_3 = arith.constant 0 : index
    %11 = vector.load %arg4[%c0_2, %c0_3] : memref<1x4xf32, #tpu.memory_space<vmem>>, vector<1x4xf32>
    %12 = vector.shape_cast %11 : vector<1x4xf32> to vector<4xf32>
    %13 = vector.extract_strided_slice %6 {offsets = [0, 0], sizes = [256, 4], strides = [1, 1]} : vector<288x4xf32> to vector<256x4xf32>
    %c0_4 = arith.constant 0 : index
    %c0_5 = arith.constant 0 : index
    %c0_6 = arith.constant 0 : index
    %c0_7 = arith.constant 0 : index
    %c0_8 = arith.constant 0 : index
    %14 = vector.load %arg3[%c0_4, %c0_5, %c0_6, %c0_7, %c0_8] : memref<4x2x2x4x4xf32, #tpu.memory_space<vmem>>, vector<1x1x1x4x4xf32>
    %15 = vector.shape_cast %14 : vector<1x1x1x4x4xf32> to vector<4x4xf32>
    %cst = arith.constant dense<0.000000e+00> : vector<256x4xf32>
    %16 = tpu.matmul %13, %15, %cst {dimension_numbers = #tpu.dot_dimension_numbers<[1], [0], [0], [1], [0, 0, 1, 1], [], []>} : vector<256x4xf32>, vector<4x4xf32>, vector<256x4xf32> -> vector<256x4xf32>
    %17 = vector.extract_strided_slice %8 {offsets = [0, 0], sizes = [256, 4], strides = [1, 1]} : vector<288x4xf32> to vector<256x4xf32>
    %c0_9 = arith.constant 0 : index
    %c0_10 = arith.constant 0 : index
    %c1 = arith.constant 1 : index
    %c0_11 = arith.constant 0 : index
    %c0_12 = arith.constant 0 : index
    %18 = vector.load %arg3[%c0_9, %c0_10, %c1, %c0_11, %c0_12] : memref<4x2x2x4x4xf32, #tpu.memory_space<vmem>>, vector<1x1x1x4x4xf32>
    %19 = vector.shape_cast %18 : vector<1x1x1x4x4xf32> to vector<4x4xf32>
    %cst_13 = arith.constant dense<0.000000e+00> : vector<256x4xf32>
    %20 = tpu.matmul %17, %19, %cst_13 {dimension_numbers = #tpu.dot_dimension_numbers<[1], [0], [0], [1], [0, 0, 1, 1], [], []>} : vector<256x4xf32>, vector<4x4xf32>, vector<256x4xf32> -> vector<256x4xf32>
    %21 = arith.addf %16, %20 : vector<256x4xf32>
    %22 = vector.extract_strided_slice %6 {offsets = [16, 0], sizes = [256, 4], strides = [1, 1]} : vector<288x4xf32> to vector<256x4xf32>
    %c0_14 = arith.constant 0 : index
    %c1_15 = arith.constant 1 : index
    %c0_16 = arith.constant 0 : index
    %c0_17 = arith.constant 0 : index
    %c0_18 = arith.constant 0 : index
    %23 = vector.load %arg3[%c0_14, %c1_15, %c0_16, %c0_17, %c0_18] : memref<4x2x2x4x4xf32, #tpu.memory_space<vmem>>, vector<1x1x1x4x4xf32>
    %24 = vector.shape_cast %23 : vector<1x1x1x4x4xf32> to vector<4x4xf32>
    %cst_19 = arith.constant dense<0.000000e+00> : vector<256x4xf32>
    %25 = tpu.matmul %22, %24, %cst_19 {dimension_numbers = #tpu.dot_dimension_numbers<[1], [0], [0], [1], [0, 0, 1, 1], [], []>} : vector<256x4xf32>, vector<4x4xf32>, vector<256x4xf32> -> vector<256x4xf32>
    %26 = arith.addf %21, %25 : vector<256x4xf32>
    %27 = vector.extract_strided_slice %8 {offsets = [16, 0], sizes = [256, 4], strides = [1, 1]} : vector<288x4xf32> to vector<256x4xf32>
    %c0_20 = arith.constant 0 : index
    %c1_21 = arith.constant 1 : index
    %c1_22 = arith.constant 1 : index
    %c0_23 = arith.constant 0 : index
    %c0_24 = arith.constant 0 : index
    %28 = vector.load %arg3[%c0_20, %c1_21, %c1_22, %c0_23, %c0_24] : memref<4x2x2x4x4xf32, #tpu.memory_space<vmem>>, vector<1x1x1x4x4xf32>
    %29 = vector.shape_cast %28 : vector<1x1x1x4x4xf32> to vector<4x4xf32>
    %cst_25 = arith.constant dense<0.000000e+00> : vector<256x4xf32>
    %30 = tpu.matmul %27, %29, %cst_25 {dimension_numbers = #tpu.dot_dimension_numbers<[1], [0], [0], [1], [0, 0, 1, 1], [], []>} : vector<256x4xf32>, vector<4x4xf32>, vector<256x4xf32> -> vector<256x4xf32>
    %31 = arith.addf %26, %30 : vector<256x4xf32>
    %32 = vector.shape_cast %12 : vector<4xf32> to vector<1x4xf32>
    %33 = vector.broadcast %32 : vector<1x4xf32> to vector<256x4xf32>
    %34 = arith.addf %31, %33 : vector<256x4xf32>
    %35 = vector.shape_cast %34 : vector<256x4xf32> to vector<16x16x4xf32>
    %c0_26 = arith.constant 0 : index
    %c0_27 = arith.constant 0 : index
    %c0_28 = arith.constant 0 : index
    %c0_29 = arith.constant 0 : index
    %c0_30 = arith.constant 0 : index
    %36 = vector.load %arg5[%c0_26, %c0_27, %c0_28, %c0_29, %c0_30] : memref<1x4x16x16x4xf32, #tpu.memory_space<vmem>>, vector<1x1x16x16x4xf32>
    %37 = vector.shape_cast %36 : vector<1x1x16x16x4xf32> to vector<16x16x4xf32>
    %38 = vector.shape_cast %35 : vector<16x16x4xf32> to vector<1x1x16x16x4xf32>
    tpu.vector_store %arg5[%c0_26, %c0_27, %c0_28, %c0_29, %c0_30], %38 {strides = array<i32>} : memref<1x4x16x16x4xf32, #tpu.memory_space<vmem>>, vector<1x1x16x16x4xf32>,
    %39 = vector.extract_strided_slice %8 {offsets = [0, 0], sizes = [256, 4], strides = [1, 1]} : vector<288x4xf32> to vector<256x4xf32>
    %c1_31 = arith.constant 1 : index
    %c0_32 = arith.constant 0 : index
    %c0_33 = arith.constant 0 : index
    %c0_34 = arith.constant 0 : index
    %c0_35 = arith.constant 0 : index
    %40 = vector.load %arg3[%c1_31, %c0_32, %c0_33, %c0_34, %c0_35] : memref<4x2x2x4x4xf32, #tpu.memory_space<vmem>>, vector<1x1x1x4x4xf32>
    %41 = vector.shape_cast %40 : vector<1x1x1x4x4xf32> to vector<4x4xf32>
    %cst_36 = arith.constant dense<0.000000e+00> : vector<256x4xf32>
    %42 = tpu.matmul %39, %41, %cst_36 {dimension_numbers = #tpu.dot_dimension_numbers<[1], [0], [0], [1], [0, 0, 1, 1], [], []>} : vector<256x4xf32>, vector<4x4xf32>, vector<256x4xf32> -> vector<256x4xf32>
    %43 = vector.extract_strided_slice %10 {offsets = [0, 0], sizes = [256, 4], strides = [1, 1]} : vector<288x4xf32> to vector<256x4xf32>
    %c1_37 = arith.constant 1 : index
    %c0_38 = arith.constant 0 : index
    %c1_39 = arith.constant 1 : index
    %c0_40 = arith.constant 0 : index
    %c0_41 = arith.constant 0 : index
    %44 = vector.load %arg3[%c1_37, %c0_38, %c1_39, %c0_40, %c0_41] : memref<4x2x2x4x4xf32, #tpu.memory_space<vmem>>, vector<1x1x1x4x4xf32>
    %45 = vector.shape_cast %44 : vector<1x1x1x4x4xf32> to vector<4x4xf32>
    %cst_42 = arith.constant dense<0.000000e+00> : vector<256x4xf32>
    %46 = tpu.matmul %43, %45, %cst_42 {dimension_numbers = #tpu.dot_dimension_numbers<[1], [0], [0], [1], [0, 0, 1, 1], [], []>} : vector<256x4xf32>, vector<4x4xf32>, vector<256x4xf32> -> vector<256x4xf32>
    %47 = arith.addf %42, %46 : vector<256x4xf32>
    %48 = vector.extract_strided_slice %8 {offsets = [16, 0], sizes = [256, 4], strides = [1, 1]} : vector<288x4xf32> to vector<256x4xf32>
    %c1_43 = arith.constant 1 : index
    %c1_44 = arith.constant 1 : index
    %c0_45 = arith.constant 0 : index
    %c0_46 = arith.constant 0 : index
    %c0_47 = arith.constant 0 : index
    %49 = vector.load %arg3[%c1_43, %c1_44, %c0_45, %c0_46, %c0_47] : memref<4x2x2x4x4xf32, #tpu.memory_space<vmem>>, vector<1x1x1x4x4xf32>
    %50 = vector.shape_cast %49 : vector<1x1x1x4x4xf32> to vector<4x4xf32>
    %cst_48 = arith.constant dense<0.000000e+00> : vector<256x4xf32>
    %51 = tpu.matmul %48, %50, %cst_48 {dimension_numbers = #tpu.dot_dimension_numbers<[1], [0], [0], [1], [0, 0, 1, 1], [], []>} : vector<256x4xf32>, vector<4x4xf32>, vector<256x4xf32> -> vector<256x4xf32>
    %52 = arith.addf %47, %51 : vector<256x4xf32>
    %53 = vector.extract_strided_slice %10 {offsets = [16, 0], sizes = [256, 4], strides = [1, 1]} : vector<288x4xf32> to vector<256x4xf32>
    %c1_49 = arith.constant 1 : index
    %c1_50 = arith.constant 1 : index
    %c1_51 = arith.constant 1 : index
    %c0_52 = arith.constant 0 : index
    %c0_53 = arith.constant 0 : index
    %54 = vector.load %arg3[%c1_49, %c1_50, %c1_51, %c0_52, %c0_53] : memref<4x2x2x4x4xf32, #tpu.memory_space<vmem>>, vector<1x1x1x4x4xf32>
    %55 = vector.shape_cast %54 : vector<1x1x1x4x4xf32> to vector<4x4xf32>
    %cst_54 = arith.constant dense<0.000000e+00> : vector<256x4xf32>
    %56 = tpu.matmul %53, %55, %cst_54 {dimension_numbers = #tpu.dot_dimension_numbers<[1], [0], [0], [1], [0, 0, 1, 1], [], []>} : vector<256x4xf32>, vector<4x4xf32>, vector<256x4xf32> -> vector<256x4xf32>
    %57 = arith.addf %52, %56 : vector<256x4xf32>
    %58 = vector.shape_cast %12 : vector<4xf32> to vector<1x4xf32>
    %59 = vector.broadcast %58 : vector<1x4xf32> to vector<256x4xf32>
    %60 = arith.addf %57, %59 : vector<256x4xf32>
    %61 = vector.shape_cast %60 : vector<256x4xf32> to vector<16x16x4xf32>
    %c0_55 = arith.constant 0 : index
    %c1_56 = arith.constant 1 : index
    %c0_57 = arith.constant 0 : index
    %c0_58 = arith.constant 0 : index
    %c0_59 = arith.constant 0 : index
    %62 = vector.load %arg5[%c0_55, %c1_56, %c0_57, %c0_58, %c0_59] : memref<1x4x16x16x4xf32, #tpu.memory_space<vmem>>, vector<1x1x16x16x4xf32>
    %63 = vector.shape_cast %62 : vector<1x1x16x16x4xf32> to vector<16x16x4xf32>
    %64 = vector.shape_cast %61 : vector<16x16x4xf32> to vector<1x1x16x16x4xf32>
    tpu.vector_store %arg5[%c0_55, %c1_56, %c0_57, %c0_58, %c0_59], %64 {strides = array<i32>} : memref<1x4x16x16x4xf32, #tpu.memory_space<vmem>>, vector<1x1x16x16x4xf32>,
    %65 = vector.extract_strided_slice %6 {offsets = [16, 0], sizes = [256, 4], strides = [1, 1]} : vector<288x4xf32> to vector<256x4xf32>
    %c2 = arith.constant 2 : index
    %c0_60 = arith.constant 0 : index
    %c0_61 = arith.constant 0 : index
    %c0_62 = arith.constant 0 : index
    %c0_63 = arith.constant 0 : index
    %66 = vector.load %arg3[%c2, %c0_60, %c0_61, %c0_62, %c0_63] : memref<4x2x2x4x4xf32, #tpu.memory_space<vmem>>, vector<1x1x1x4x4xf32>
    %67 = vector.shape_cast %66 : vector<1x1x1x4x4xf32> to vector<4x4xf32>
    %cst_64 = arith.constant dense<0.000000e+00> : vector<256x4xf32>
    %68 = tpu.matmul %65, %67, %cst_64 {dimension_numbers = #tpu.dot_dimension_numbers<[1], [0], [0], [1], [0, 0, 1, 1], [], []>} : vector<256x4xf32>, vector<4x4xf32>, vector<256x4xf32> -> vector<256x4xf32>
    %69 = vector.extract_strided_slice %8 {offsets = [16, 0], sizes = [256, 4], strides = [1, 1]} : vector<288x4xf32> to vector<256x4xf32>
    %c2_65 = arith.constant 2 : index
    %c0_66 = arith.constant 0 : index
    %c1_67 = arith.constant 1 : index
    %c0_68 = arith.constant 0 : index
    %c0_69 = arith.constant 0 : index
    %70 = vector.load %arg3[%c2_65, %c0_66, %c1_67, %c0_68, %c0_69] : memref<4x2x2x4x4xf32, #tpu.memory_space<vmem>>, vector<1x1x1x4x4xf32>
    %71 = vector.shape_cast %70 : vector<1x1x1x4x4xf32> to vector<4x4xf32>
    %cst_70 = arith.constant dense<0.000000e+00> : vector<256x4xf32>
    %72 = tpu.matmul %69, %71, %cst_70 {dimension_numbers = #tpu.dot_dimension_numbers<[1], [0], [0], [1], [0, 0, 1, 1], [], []>} : vector<256x4xf32>, vector<4x4xf32>, vector<256x4xf32> -> vector<256x4xf32>
    %73 = arith.addf %68, %72 : vector<256x4xf32>
    %74 = vector.extract_strided_slice %6 {offsets = [32, 0], sizes = [256, 4], strides = [1, 1]} : vector<288x4xf32> to vector<256x4xf32>
    %c2_71 = arith.constant 2 : index
    %c1_72 = arith.constant 1 : index
    %c0_73 = arith.constant 0 : index
    %c0_74 = arith.constant 0 : index
    %c0_75 = arith.constant 0 : index
    %75 = vector.load %arg3[%c2_71, %c1_72, %c0_73, %c0_74, %c0_75] : memref<4x2x2x4x4xf32, #tpu.memory_space<vmem>>, vector<1x1x1x4x4xf32>
    %76 = vector.shape_cast %75 : vector<1x1x1x4x4xf32> to vector<4x4xf32>
    %cst_76 = arith.constant dense<0.000000e+00> : vector<256x4xf32>
    %77 = tpu.matmul %74, %76, %cst_76 {dimension_numbers = #tpu.dot_dimension_numbers<[1], [0], [0], [1], [0, 0, 1, 1], [], []>} : vector<256x4xf32>, vector<4x4xf32>, vector<256x4xf32> -> vector<256x4xf32>
    %78 = arith.addf %73, %77 : vector<256x4xf32>
    %79 = vector.extract_strided_slice %8 {offsets = [32, 0], sizes = [256, 4], strides = [1, 1]} : vector<288x4xf32> to vector<256x4xf32>
    %c2_77 = arith.constant 2 : index
    %c1_78 = arith.constant 1 : index
    %c1_79 = arith.constant 1 : index
    %c0_80 = arith.constant 0 : index
    %c0_81 = arith.constant 0 : index
    %80 = vector.load %arg3[%c2_77, %c1_78, %c1_79, %c0_80, %c0_81] : memref<4x2x2x4x4xf32, #tpu.memory_space<vmem>>, vector<1x1x1x4x4xf32>
    %81 = vector.shape_cast %80 : vector<1x1x1x4x4xf32> to vector<4x4xf32>
    %cst_82 = arith.constant dense<0.000000e+00> : vector<256x4xf32>
    %82 = tpu.matmul %79, %81, %cst_82 {dimension_numbers = #tpu.dot_dimension_numbers<[1], [0], [0], [1], [0, 0, 1, 1], [], []>} : vector<256x4xf32>, vector<4x4xf32>, vector<256x4xf32> -> vector<256x4xf32>
    %83 = arith.addf %78, %82 : vector<256x4xf32>
    %84 = vector.shape_cast %12 : vector<4xf32> to vector<1x4xf32>
    %85 = vector.broadcast %84 : vector<1x4xf32> to vector<256x4xf32>
    %86 = arith.addf %83, %85 : vector<256x4xf32>
    %87 = vector.shape_cast %86 : vector<256x4xf32> to vector<16x16x4xf32>
    %c0_83 = arith.constant 0 : index
    %c2_84 = arith.constant 2 : index
    %c0_85 = arith.constant 0 : index
    %c0_86 = arith.constant 0 : index
    %c0_87 = arith.constant 0 : index
    %88 = vector.load %arg5[%c0_83, %c2_84, %c0_85, %c0_86, %c0_87] : memref<1x4x16x16x4xf32, #tpu.memory_space<vmem>>, vector<1x1x16x16x4xf32>
    %89 = vector.shape_cast %88 : vector<1x1x16x16x4xf32> to vector<16x16x4xf32>
    %90 = vector.shape_cast %87 : vector<16x16x4xf32> to vector<1x1x16x16x4xf32>
    tpu.vector_store %arg5[%c0_83, %c2_84, %c0_85, %c0_86, %c0_87], %90 {strides = array<i32>} : memref<1x4x16x16x4xf32, #tpu.memory_space<vmem>>, vector<1x1x16x16x4xf32>,
    %91 = vector.extract_strided_slice %8 {offsets = [16, 0], sizes = [256, 4], strides = [1, 1]} : vector<288x4xf32> to vector<256x4xf32>
    %c3 = arith.constant 3 : index
    %c0_88 = arith.constant 0 : index
    %c0_89 = arith.constant 0 : index
    %c0_90 = arith.constant 0 : index
    %c0_91 = arith.constant 0 : index
    %92 = vector.load %arg3[%c3, %c0_88, %c0_89, %c0_90, %c0_91] : memref<4x2x2x4x4xf32, #tpu.memory_space<vmem>>, vector<1x1x1x4x4xf32>
    %93 = vector.shape_cast %92 : vector<1x1x1x4x4xf32> to vector<4x4xf32>
    %cst_92 = arith.constant dense<0.000000e+00> : vector<256x4xf32>
    %94 = tpu.matmul %91, %93, %cst_92 {dimension_numbers = #tpu.dot_dimension_numbers<[1], [0], [0], [1], [0, 0, 1, 1], [], []>} : vector<256x4xf32>, vector<4x4xf32>, vector<256x4xf32> -> vector<256x4xf32>
    %95 = vector.extract_strided_slice %10 {offsets = [16, 0], sizes = [256, 4], strides = [1, 1]} : vector<288x4xf32> to vector<256x4xf32>
    %c3_93 = arith.constant 3 : index
    %c0_94 = arith.constant 0 : index
    %c1_95 = arith.constant 1 : index
    %c0_96 = arith.constant 0 : index
    %c0_97 = arith.constant 0 : index
    %96 = vector.load %arg3[%c3_93, %c0_94, %c1_95, %c0_96, %c0_97] : memref<4x2x2x4x4xf32, #tpu.memory_space<vmem>>, vector<1x1x1x4x4xf32>
    %97 = vector.shape_cast %96 : vector<1x1x1x4x4xf32> to vector<4x4xf32>
    %cst_98 = arith.constant dense<0.000000e+00> : vector<256x4xf32>
    %98 = tpu.matmul %95, %97, %cst_98 {dimension_numbers = #tpu.dot_dimension_numbers<[1], [0], [0], [1], [0, 0, 1, 1], [], []>} : vector<256x4xf32>, vector<4x4xf32>, vector<256x4xf32> -> vector<256x4xf32>
    %99 = arith.addf %94, %98 : vector<256x4xf32>
    %100 = vector.extract_strided_slice %8 {offsets = [32, 0], sizes = [256, 4], strides = [1, 1]} : vector<288x4xf32> to vector<256x4xf32>
    %c3_99 = arith.constant 3 : index
    %c1_100 = arith.constant 1 : index
    %c0_101 = arith.constant 0 : index
    %c0_102 = arith.constant 0 : index
    %c0_103 = arith.constant 0 : index
    %101 = vector.load %arg3[%c3_99, %c1_100, %c0_101, %c0_102, %c0_103] : memref<4x2x2x4x4xf32, #tpu.memory_space<vmem>>, vector<1x1x1x4x4xf32>
    %102 = vector.shape_cast %101 : vector<1x1x1x4x4xf32> to vector<4x4xf32>
    %cst_104 = arith.constant dense<0.000000e+00> : vector<256x4xf32>
    %103 = tpu.matmul %100, %102, %cst_104 {dimension_numbers = #tpu.dot_dimension_numbers<[1], [0], [0], [1], [0, 0, 1, 1], [], []>} : vector<256x4xf32>, vector<4x4xf32>, vector<256x4xf32> -> vector<256x4xf32>
    %104 = arith.addf %99, %103 : vector<256x4xf32>
    %105 = vector.extract_strided_slice %10 {offsets = [32, 0], sizes = [256, 4], strides = [1, 1]} : vector<288x4xf32> to vector<256x4xf32>
    %c3_105 = arith.constant 3 : index
    %c1_106 = arith.constant 1 : index
    %c1_107 = arith.constant 1 : index
    %c0_108 = arith.constant 0 : index
    %c0_109 = arith.constant 0 : index
    %106 = vector.load %arg3[%c3_105, %c1_106, %c1_107, %c0_108, %c0_109] : memref<4x2x2x4x4xf32, #tpu.memory_space<vmem>>, vector<1x1x1x4x4xf32>
    %107 = vector.shape_cast %106 : vector<1x1x1x4x4xf32> to vector<4x4xf32>
    %cst_110 = arith.constant dense<0.000000e+00> : vector<256x4xf32>
    %108 = tpu.matmul %105, %107, %cst_110 {dimension_numbers = #tpu.dot_dimension_numbers<[1], [0], [0], [1], [0, 0, 1, 1], [], []>} : vector<256x4xf32>, vector<4x4xf32>, vector<256x4xf32> -> vector<256x4xf32>
    %109 = arith.addf %104, %108 : vector<256x4xf32>
    %110 = vector.shape_cast %12 : vector<4xf32> to vector<1x4xf32>
    %111 = vector.broadcast %110 : vector<1x4xf32> to vector<256x4xf32>
    %112 = arith.addf %109, %111 : vector<256x4xf32>
    %113 = vector.shape_cast %112 : vector<256x4xf32> to vector<16x16x4xf32>
    %c0_111 = arith.constant 0 : index
    %c3_112 = arith.constant 3 : index
    %c0_113 = arith.constant 0 : index
    %c0_114 = arith.constant 0 : index
    %c0_115 = arith.constant 0 : index
    %114 = vector.load %arg5[%c0_111, %c3_112, %c0_113, %c0_114, %c0_115] : memref<1x4x16x16x4xf32, #tpu.memory_space<vmem>>, vector<1x1x16x16x4xf32>
    %115 = vector.shape_cast %114 : vector<1x1x16x16x4xf32> to vector<16x16x4xf32>
    %116 = vector.shape_cast %113 : vector<16x16x4xf32> to vector<1x1x16x16x4xf32>
    tpu.vector_store %arg5[%c0_111, %c3_112, %c0_113, %c0_114, %c0_115], %116 {strides = array<i32>} : memref<1x4x16x16x4xf32, #tpu.memory_space<vmem>>, vector<1x1x16x16x4xf32>,
    return
  }
  func.func @transform_0(%arg0: i32, %arg1: i32) -> (i32, i32, i32, i32) {
    %c0_i32 = arith.constant 0 : i32
    %c0_i32_0 = arith.constant 0 : i32
    %c0_i32_1 = arith.constant 0 : i32
    %c0_i32_2 = arith.constant 0 : i32
    return %arg0, %c0_i32, %c0_i32_0, %c0_i32_1 : i32, i32, i32, i32
  }
  func.func @transform_1(%arg0: i32, %arg1: i32) -> (i32, i32, i32, i32, i32) {
    %c0_i32 = arith.constant 0 : i32
    %c0_i32_0 = arith.constant 0 : i32
    %c0_i32_1 = arith.constant 0 : i32
    %c0_i32_2 = arith.constant 0 : i32
    %c0_i32_3 = arith.constant 0 : i32
    %c0_i32_4 = arith.constant 0 : i32
    return %c0_i32, %c0_i32_0, %c0_i32_1, %c0_i32_2, %c0_i32_3 : i32, i32, i32, i32, i32
  }
  func.func @transform_2(%arg0: i32, %arg1: i32) -> (i32, i32) {
    %c0_i32 = arith.constant 0 : i32
    %c0_i32_0 = arith.constant 0 : i32
    %c0_i32_1 = arith.constant 0 : i32
    return %c0_i32, %c0_i32_0 : i32, i32
  }
  func.func @transform_3(%arg0: i32, %arg1: i32) -> (i32, i32, i32, i32, i32) {
    %c0_i32 = arith.constant 0 : i32
    %c0_i32_0 = arith.constant 0 : i32
    %c0_i32_1 = arith.constant 0 : i32
    %c0_i32_2 = arith.constant 0 : i32
    return %arg0, %c0_i32, %arg1, %c0_i32_0, %c0_i32_1 : i32, i32, i32, i32, i32
  }
}

module attributes {stable_mosaic.version = 11 : i64} {
  func.func @_upsample_conv_kernel(%arg0: i32, %arg1: i32, %arg2: memref<1x18x18x4xf32, #tpu.memory_space<vmem>>, %arg3: memref<4x2x2x4x4xf32, #tpu.memory_space<vmem>>, %arg4: memref<1x4xf32, #tpu.memory_space<vmem>>, %arg5: memref<1x4x16x16x4xf32, #tpu.memory_space<vmem>>) attributes {dimension_semantics = [#tpu.dimension_semantics<parallel>, #tpu.dimension_semantics<parallel>], iteration_bounds = array<i64: 2, 1>, scalar_prefetch = 0 : i64, scratch_operands = 0 : i64, tpu.core_type = #tpu.core_type<tc>, window_params = [{transform_indices = @transform_0, window_bounds = array<i64: 1, 18, 18, 4>}, {pipeline_mode = #tpu.pipeline_mode<synchronous>, transform_indices = @transform_1, window_bounds = array<i64: 4, 2, 2, 4, 4>}, {pipeline_mode = #tpu.pipeline_mode<synchronous>, transform_indices = @transform_2, window_bounds = array<i64: 1, 4>}, {transform_indices = @transform_3, window_bounds = array<i64: 1, 4, 16, 16, 4>}]} {
    %c16_i32 = arith.constant 16 : i32
    %0 = arith.muli %arg1, %c16_i32 : i32
    %1 = tpu.assume_multiple %0, 16 : i32
    %c0 = arith.constant 0 : index
    %2 = arith.index_cast %1 : i32 to index
    %c0_0 = arith.constant 0 : index
    %c0_1 = arith.constant 0 : index
    %3 = vector.load %arg2[%c0, %2, %c0_0, %c0_1] : memref<1x18x18x4xf32, #tpu.memory_space<vmem>>, vector<1x18x18x4xf32>
    %4 = vector.shape_cast %3 : vector<1x18x18x4xf32> to vector<18x18x4xf32>
    %5 = vector.extract_strided_slice %4 {offsets = [0, 0, 0], sizes = [18, 16, 4], strides = [1, 1, 1]} : vector<18x18x4xf32> to vector<18x16x4xf32>
    %6 = vector.shape_cast %5 : vector<18x16x4xf32> to vector<288x4xf32>
    %7 = vector.extract_strided_slice %4 {offsets = [0, 1, 0], sizes = [18, 16, 4], strides = [1, 1, 1]} : vector<18x18x4xf32> to vector<18x16x4xf32>
    %8 = vector.shape_cast %7 : vector<18x16x4xf32> to vector<288x4xf32>
    %9 = vector.extract_strided_slice %4 {offsets = [0, 2, 0], sizes = [18, 16, 4], strides = [1, 1, 1]} : vector<18x18x4xf32> to vector<18x16x4xf32>
    %10 = vector.shape_cast %9 : vector<18x16x4xf32> to vector<288x4xf32>
    %c0_2 = arith.constant 0 : index
    %c0_3 = arith.constant 0 : index
    %11 = vector.load %arg4[%c0_2, %c0_3] : memref<1x4xf32, #tpu.memory_space<vmem>>, vector<1x4xf32>
    %12 = vector.shape_cast %11 : vector<1x4xf32> to vector<4xf32>
    %13 = vector.extract_strided_slice %6 {offsets = [0, 0], sizes = [256, 4], strides = [1, 1]} : vector<288x4xf32> to vector<256x4xf32>
    %c0_4 = arith.constant 0 : index
    %c0_5 = arith.constant 0 : index
    %c0_6 = arith.constant 0 : index
    %c0_7 = arith.constant 0 : index
    %c0_8 = arith.constant 0 : index
    %14 = vector.load %arg3[%c0_4, %c0_5, %c0_6, %c0_7, %c0_8] : memref<4x2x2x4x4xf32, #tpu.memory_space<vmem>>, vector<1x1x1x4x4xf32>
    %15 = vector.shape_cast %14 : vector<1x1x1x4x4xf32> to vector<4x4xf32>
    %cst = arith.constant dense<0.000000e+00> : vector<256x4xf32>
    %16 = tpu.matmul %13, %15, %cst {dimension_numbers = #tpu.dot_dimension_numbers<[1], [0], [0], [1], [0, 0, 1, 1], [], []>} : vector<256x4xf32>, vector<4x4xf32>, vector<256x4xf32> -> vector<256x4xf32>
    %17 = vector.extract_strided_slice %8 {offsets = [0, 0], sizes = [256, 4], strides = [1, 1]} : vector<288x4xf32> to vector<256x4xf32>
    %c0_9 = arith.constant 0 : index
    %c0_10 = arith.constant 0 : index
    %c1 = arith.constant 1 : index
    %c0_11 = arith.constant 0 : index
    %c0_12 = arith.constant 0 : index
    %18 = vector.load %arg3[%c0_9, %c0_10, %c1, %c0_11, %c0_12] : memref<4x2x2x4x4xf32, #tpu.memory_space<vmem>>, vector<1x1x1x4x4xf32>
    %19 = vector.shape_cast %18 : vector<1x1x1x4x4xf32> to vector<4x4xf32>
    %cst_13 = arith.constant dense<0.000000e+00> : vector<256x4xf32>
    %20 = tpu.matmul %17, %19, %cst_13 {dimension_numbers = #tpu.dot_dimension_numbers<[1], [0], [0], [1], [0, 0, 1, 1], [], []>} : vector<256x4xf32>, vector<4x4xf32>, vector<256x4xf32> -> vector<256x4xf32>
    %21 = arith.addf %16, %20 : vector<256x4xf32>
    %22 = vector.extract_strided_slice %6 {offsets = [16, 0], sizes = [256, 4], strides = [1, 1]} : vector<288x4xf32> to vector<256x4xf32>
    %c0_14 = arith.constant 0 : index
    %c1_15 = arith.constant 1 : index
    %c0_16 = arith.constant 0 : index
    %c0_17 = arith.constant 0 : index
    %c0_18 = arith.constant 0 : index
    %23 = vector.load %arg3[%c0_14, %c1_15, %c0_16, %c0_17, %c0_18] : memref<4x2x2x4x4xf32, #tpu.memory_space<vmem>>, vector<1x1x1x4x4xf32>
    %24 = vector.shape_cast %23 : vector<1x1x1x4x4xf32> to vector<4x4xf32>
    %cst_19 = arith.constant dense<0.000000e+00> : vector<256x4xf32>
    %25 = tpu.matmul %22, %24, %cst_19 {dimension_numbers = #tpu.dot_dimension_numbers<[1], [0], [0], [1], [0, 0, 1, 1], [], []>} : vector<256x4xf32>, vector<4x4xf32>, vector<256x4xf32> -> vector<256x4xf32>
    %26 = arith.addf %21, %25 : vector<256x4xf32>
    %27 = vector.extract_strided_slice %8 {offsets = [16, 0], sizes = [256, 4], strides = [1, 1]} : vector<288x4xf32> to vector<256x4xf32>
    %c0_20 = arith.constant 0 : index
    %c1_21 = arith.constant 1 : index
    %c1_22 = arith.constant 1 : index
    %c0_23 = arith.constant 0 : index
    %c0_24 = arith.constant 0 : index
    %28 = vector.load %arg3[%c0_20, %c1_21, %c1_22, %c0_23, %c0_24] : memref<4x2x2x4x4xf32, #tpu.memory_space<vmem>>, vector<1x1x1x4x4xf32>
    %29 = vector.shape_cast %28 : vector<1x1x1x4x4xf32> to vector<4x4xf32>
    %cst_25 = arith.constant dense<0.000000e+00> : vector<256x4xf32>
    %30 = tpu.matmul %27, %29, %cst_25 {dimension_numbers = #tpu.dot_dimension_numbers<[1], [0], [0], [1], [0, 0, 1, 1], [], []>} : vector<256x4xf32>, vector<4x4xf32>, vector<256x4xf32> -> vector<256x4xf32>
    %31 = arith.addf %26, %30 : vector<256x4xf32>
    %32 = vector.shape_cast %12 : vector<4xf32> to vector<1x4xf32>
    %33 = vector.broadcast %32 : vector<1x4xf32> to vector<256x4xf32>
    %34 = arith.addf %31, %33 : vector<256x4xf32>
    %35 = vector.shape_cast %34 : vector<256x4xf32> to vector<16x16x4xf32>
    %c0_26 = arith.constant 0 : index
    %c0_27 = arith.constant 0 : index
    %c0_28 = arith.constant 0 : index
    %c0_29 = arith.constant 0 : index
    %c0_30 = arith.constant 0 : index
    %36 = vector.load %arg5[%c0_26, %c0_27, %c0_28, %c0_29, %c0_30] : memref<1x4x16x16x4xf32, #tpu.memory_space<vmem>>, vector<1x1x16x16x4xf32>
    %37 = vector.shape_cast %36 : vector<1x1x16x16x4xf32> to vector<16x16x4xf32>
    %38 = vector.shape_cast %35 : vector<16x16x4xf32> to vector<1x1x16x16x4xf32>
    tpu.vector_store %arg5[%c0_26, %c0_27, %c0_28, %c0_29, %c0_30], %38 {strides = array<i32>} : memref<1x4x16x16x4xf32, #tpu.memory_space<vmem>>, vector<1x1x16x16x4xf32>,
    %39 = vector.extract_strided_slice %8 {offsets = [0, 0], sizes = [256, 4], strides = [1, 1]} : vector<288x4xf32> to vector<256x4xf32>
    %c1_31 = arith.constant 1 : index
    %c0_32 = arith.constant 0 : index
    %c0_33 = arith.constant 0 : index
    %c0_34 = arith.constant 0 : index
    %c0_35 = arith.constant 0 : index
    %40 = vector.load %arg3[%c1_31, %c0_32, %c0_33, %c0_34, %c0_35] : memref<4x2x2x4x4xf32, #tpu.memory_space<vmem>>, vector<1x1x1x4x4xf32>
    %41 = vector.shape_cast %40 : vector<1x1x1x4x4xf32> to vector<4x4xf32>
    %cst_36 = arith.constant dense<0.000000e+00> : vector<256x4xf32>
    %42 = tpu.matmul %39, %41, %cst_36 {dimension_numbers = #tpu.dot_dimension_numbers<[1], [0], [0], [1], [0, 0, 1, 1], [], []>} : vector<256x4xf32>, vector<4x4xf32>, vector<256x4xf32> -> vector<256x4xf32>
    %43 = vector.extract_strided_slice %10 {offsets = [0, 0], sizes = [256, 4], strides = [1, 1]} : vector<288x4xf32> to vector<256x4xf32>
    %c1_37 = arith.constant 1 : index
    %c0_38 = arith.constant 0 : index
    %c1_39 = arith.constant 1 : index
    %c0_40 = arith.constant 0 : index
    %c0_41 = arith.constant 0 : index
    %44 = vector.load %arg3[%c1_37, %c0_38, %c1_39, %c0_40, %c0_41] : memref<4x2x2x4x4xf32, #tpu.memory_space<vmem>>, vector<1x1x1x4x4xf32>
    %45 = vector.shape_cast %44 : vector<1x1x1x4x4xf32> to vector<4x4xf32>
    %cst_42 = arith.constant dense<0.000000e+00> : vector<256x4xf32>
    %46 = tpu.matmul %43, %45, %cst_42 {dimension_numbers = #tpu.dot_dimension_numbers<[1], [0], [0], [1], [0, 0, 1, 1], [], []>} : vector<256x4xf32>, vector<4x4xf32>, vector<256x4xf32> -> vector<256x4xf32>
    %47 = arith.addf %42, %46 : vector<256x4xf32>
    %48 = vector.extract_strided_slice %8 {offsets = [16, 0], sizes = [256, 4], strides = [1, 1]} : vector<288x4xf32> to vector<256x4xf32>
    %c1_43 = arith.constant 1 : index
    %c1_44 = arith.constant 1 : index
    %c0_45 = arith.constant 0 : index
    %c0_46 = arith.constant 0 : index
    %c0_47 = arith.constant 0 : index
    %49 = vector.load %arg3[%c1_43, %c1_44, %c0_45, %c0_46, %c0_47] : memref<4x2x2x4x4xf32, #tpu.memory_space<vmem>>, vector<1x1x1x4x4xf32>
    %50 = vector.shape_cast %49 : vector<1x1x1x4x4xf32> to vector<4x4xf32>
    %cst_48 = arith.constant dense<0.000000e+00> : vector<256x4xf32>
    %51 = tpu.matmul %48, %50, %cst_48 {dimension_numbers = #tpu.dot_dimension_numbers<[1], [0], [0], [1], [0, 0, 1, 1], [], []>} : vector<256x4xf32>, vector<4x4xf32>, vector<256x4xf32> -> vector<256x4xf32>
    %52 = arith.addf %47, %51 : vector<256x4xf32>
    %53 = vector.extract_strided_slice %10 {offsets = [16, 0], sizes = [256, 4], strides = [1, 1]} : vector<288x4xf32> to vector<256x4xf32>
    %c1_49 = arith.constant 1 : index
    %c1_50 = arith.constant 1 : index
    %c1_51 = arith.constant 1 : index
    %c0_52 = arith.constant 0 : index
    %c0_53 = arith.constant 0 : index
    %54 = vector.load %arg3[%c1_49, %c1_50, %c1_51, %c0_52, %c0_53] : memref<4x2x2x4x4xf32, #tpu.memory_space<vmem>>, vector<1x1x1x4x4xf32>
    %55 = vector.shape_cast %54 : vector<1x1x1x4x4xf32> to vector<4x4xf32>
    %cst_54 = arith.constant dense<0.000000e+00> : vector<256x4xf32>
    %56 = tpu.matmul %53, %55, %cst_54 {dimension_numbers = #tpu.dot_dimension_numbers<[1], [0], [0], [1], [0, 0, 1, 1], [], []>} : vector<256x4xf32>, vector<4x4xf32>, vector<256x4xf32> -> vector<256x4xf32>
    %57 = arith.addf %52, %56 : vector<256x4xf32>
    %58 = vector.shape_cast %12 : vector<4xf32> to vector<1x4xf32>
    %59 = vector.broadcast %58 : vector<1x4xf32> to vector<256x4xf32>
    %60 = arith.addf %57, %59 : vector<256x4xf32>
    %61 = vector.shape_cast %60 : vector<256x4xf32> to vector<16x16x4xf32>
    %c0_55 = arith.constant 0 : index
    %c1_56 = arith.constant 1 : index
    %c0_57 = arith.constant 0 : index
    %c0_58 = arith.constant 0 : index
    %c0_59 = arith.constant 0 : index
    %62 = vector.load %arg5[%c0_55, %c1_56, %c0_57, %c0_58, %c0_59] : memref<1x4x16x16x4xf32, #tpu.memory_space<vmem>>, vector<1x1x16x16x4xf32>
    %63 = vector.shape_cast %62 : vector<1x1x16x16x4xf32> to vector<16x16x4xf32>
    %64 = vector.shape_cast %61 : vector<16x16x4xf32> to vector<1x1x16x16x4xf32>
    tpu.vector_store %arg5[%c0_55, %c1_56, %c0_57, %c0_58, %c0_59], %64 {strides = array<i32>} : memref<1x4x16x16x4xf32, #tpu.memory_space<vmem>>, vector<1x1x16x16x4xf32>,
    %65 = vector.extract_strided_slice %6 {offsets = [16, 0], sizes = [256, 4], strides = [1, 1]} : vector<288x4xf32> to vector<256x4xf32>
    %c2 = arith.constant 2 : index
    %c0_60 = arith.constant 0 : index
    %c0_61 = arith.constant 0 : index
    %c0_62 = arith.constant 0 : index
    %c0_63 = arith.constant 0 : index
    %66 = vector.load %arg3[%c2, %c0_60, %c0_61, %c0_62, %c0_63] : memref<4x2x2x4x4xf32, #tpu.memory_space<vmem>>, vector<1x1x1x4x4xf32>
    %67 = vector.shape_cast %66 : vector<1x1x1x4x4xf32> to vector<4x4xf32>
    %cst_64 = arith.constant dense<0.000000e+00> : vector<256x4xf32>
    %68 = tpu.matmul %65, %67, %cst_64 {dimension_numbers = #tpu.dot_dimension_numbers<[1], [0], [0], [1], [0, 0, 1, 1], [], []>} : vector<256x4xf32>, vector<4x4xf32>, vector<256x4xf32> -> vector<256x4xf32>
    %69 = vector.extract_strided_slice %8 {offsets = [16, 0], sizes = [256, 4], strides = [1, 1]} : vector<288x4xf32> to vector<256x4xf32>
    %c2_65 = arith.constant 2 : index
    %c0_66 = arith.constant 0 : index
    %c1_67 = arith.constant 1 : index
    %c0_68 = arith.constant 0 : index
    %c0_69 = arith.constant 0 : index
    %70 = vector.load %arg3[%c2_65, %c0_66, %c1_67, %c0_68, %c0_69] : memref<4x2x2x4x4xf32, #tpu.memory_space<vmem>>, vector<1x1x1x4x4xf32>
    %71 = vector.shape_cast %70 : vector<1x1x1x4x4xf32> to vector<4x4xf32>
    %cst_70 = arith.constant dense<0.000000e+00> : vector<256x4xf32>
    %72 = tpu.matmul %69, %71, %cst_70 {dimension_numbers = #tpu.dot_dimension_numbers<[1], [0], [0], [1], [0, 0, 1, 1], [], []>} : vector<256x4xf32>, vector<4x4xf32>, vector<256x4xf32> -> vector<256x4xf32>
    %73 = arith.addf %68, %72 : vector<256x4xf32>
    %74 = vector.extract_strided_slice %6 {offsets = [32, 0], sizes = [256, 4], strides = [1, 1]} : vector<288x4xf32> to vector<256x4xf32>
    %c2_71 = arith.constant 2 : index
    %c1_72 = arith.constant 1 : index
    %c0_73 = arith.constant 0 : index
    %c0_74 = arith.constant 0 : index
    %c0_75 = arith.constant 0 : index
    %75 = vector.load %arg3[%c2_71, %c1_72, %c0_73, %c0_74, %c0_75] : memref<4x2x2x4x4xf32, #tpu.memory_space<vmem>>, vector<1x1x1x4x4xf32>
    %76 = vector.shape_cast %75 : vector<1x1x1x4x4xf32> to vector<4x4xf32>
    %cst_76 = arith.constant dense<0.000000e+00> : vector<256x4xf32>
    %77 = tpu.matmul %74, %76, %cst_76 {dimension_numbers = #tpu.dot_dimension_numbers<[1], [0], [0], [1], [0, 0, 1, 1], [], []>} : vector<256x4xf32>, vector<4x4xf32>, vector<256x4xf32> -> vector<256x4xf32>
    %78 = arith.addf %73, %77 : vector<256x4xf32>
    %79 = vector.extract_strided_slice %8 {offsets = [32, 0], sizes = [256, 4], strides = [1, 1]} : vector<288x4xf32> to vector<256x4xf32>
    %c2_77 = arith.constant 2 : index
    %c1_78 = arith.constant 1 : index
    %c1_79 = arith.constant 1 : index
    %c0_80 = arith.constant 0 : index
    %c0_81 = arith.constant 0 : index
    %80 = vector.load %arg3[%c2_77, %c1_78, %c1_79, %c0_80, %c0_81] : memref<4x2x2x4x4xf32, #tpu.memory_space<vmem>>, vector<1x1x1x4x4xf32>
    %81 = vector.shape_cast %80 : vector<1x1x1x4x4xf32> to vector<4x4xf32>
    %cst_82 = arith.constant dense<0.000000e+00> : vector<256x4xf32>
    %82 = tpu.matmul %79, %81, %cst_82 {dimension_numbers = #tpu.dot_dimension_numbers<[1], [0], [0], [1], [0, 0, 1, 1], [], []>} : vector<256x4xf32>, vector<4x4xf32>, vector<256x4xf32> -> vector<256x4xf32>
    %83 = arith.addf %78, %82 : vector<256x4xf32>
    %84 = vector.shape_cast %12 : vector<4xf32> to vector<1x4xf32>
    %85 = vector.broadcast %84 : vector<1x4xf32> to vector<256x4xf32>
    %86 = arith.addf %83, %85 : vector<256x4xf32>
    %87 = vector.shape_cast %86 : vector<256x4xf32> to vector<16x16x4xf32>
    %c0_83 = arith.constant 0 : index
    %c2_84 = arith.constant 2 : index
    %c0_85 = arith.constant 0 : index
    %c0_86 = arith.constant 0 : index
    %c0_87 = arith.constant 0 : index
    %88 = vector.load %arg5[%c0_83, %c2_84, %c0_85, %c0_86, %c0_87] : memref<1x4x16x16x4xf32, #tpu.memory_space<vmem>>, vector<1x1x16x16x4xf32>
    %89 = vector.shape_cast %88 : vector<1x1x16x16x4xf32> to vector<16x16x4xf32>
    %90 = vector.shape_cast %87 : vector<16x16x4xf32> to vector<1x1x16x16x4xf32>
    tpu.vector_store %arg5[%c0_83, %c2_84, %c0_85, %c0_86, %c0_87], %90 {strides = array<i32>} : memref<1x4x16x16x4xf32, #tpu.memory_space<vmem>>, vector<1x1x16x16x4xf32>,
    %91 = vector.extract_strided_slice %8 {offsets = [16, 0], sizes = [256, 4], strides = [1, 1]} : vector<288x4xf32> to vector<256x4xf32>
    %c3 = arith.constant 3 : index
    %c0_88 = arith.constant 0 : index
    %c0_89 = arith.constant 0 : index
    %c0_90 = arith.constant 0 : index
    %c0_91 = arith.constant 0 : index
    %92 = vector.load %arg3[%c3, %c0_88, %c0_89, %c0_90, %c0_91] : memref<4x2x2x4x4xf32, #tpu.memory_space<vmem>>, vector<1x1x1x4x4xf32>
    %93 = vector.shape_cast %92 : vector<1x1x1x4x4xf32> to vector<4x4xf32>
    %cst_92 = arith.constant dense<0.000000e+00> : vector<256x4xf32>
    %94 = tpu.matmul %91, %93, %cst_92 {dimension_numbers = #tpu.dot_dimension_numbers<[1], [0], [0], [1], [0, 0, 1, 1], [], []>} : vector<256x4xf32>, vector<4x4xf32>, vector<256x4xf32> -> vector<256x4xf32>
    %95 = vector.extract_strided_slice %10 {offsets = [16, 0], sizes = [256, 4], strides = [1, 1]} : vector<288x4xf32> to vector<256x4xf32>
    %c3_93 = arith.constant 3 : index
    %c0_94 = arith.constant 0 : index
    %c1_95 = arith.constant 1 : index
    %c0_96 = arith.constant 0 : index
    %c0_97 = arith.constant 0 : index
    %96 = vector.load %arg3[%c3_93, %c0_94, %c1_95, %c0_96, %c0_97] : memref<4x2x2x4x4xf32, #tpu.memory_space<vmem>>, vector<1x1x1x4x4xf32>
    %97 = vector.shape_cast %96 : vector<1x1x1x4x4xf32> to vector<4x4xf32>
    %cst_98 = arith.constant dense<0.000000e+00> : vector<256x4xf32>
    %98 = tpu.matmul %95, %97, %cst_98 {dimension_numbers = #tpu.dot_dimension_numbers<[1], [0], [0], [1], [0, 0, 1, 1], [], []>} : vector<256x4xf32>, vector<4x4xf32>, vector<256x4xf32> -> vector<256x4xf32>
    %99 = arith.addf %94, %98 : vector<256x4xf32>
    %100 = vector.extract_strided_slice %8 {offsets = [32, 0], sizes = [256, 4], strides = [1, 1]} : vector<288x4xf32> to vector<256x4xf32>
    %c3_99 = arith.constant 3 : index
    %c1_100 = arith.constant 1 : index
    %c0_101 = arith.constant 0 : index
    %c0_102 = arith.constant 0 : index
    %c0_103 = arith.constant 0 : index
    %101 = vector.load %arg3[%c3_99, %c1_100, %c0_101, %c0_102, %c0_103] : memref<4x2x2x4x4xf32, #tpu.memory_space<vmem>>, vector<1x1x1x4x4xf32>
    %102 = vector.shape_cast %101 : vector<1x1x1x4x4xf32> to vector<4x4xf32>
    %cst_104 = arith.constant dense<0.000000e+00> : vector<256x4xf32>
    %103 = tpu.matmul %100, %102, %cst_104 {dimension_numbers = #tpu.dot_dimension_numbers<[1], [0], [0], [1], [0, 0, 1, 1], [], []>} : vector<256x4xf32>, vector<4x4xf32>, vector<256x4xf32> -> vector<256x4xf32>
    %104 = arith.addf %99, %103 : vector<256x4xf32>
    %105 = vector.extract_strided_slice %10 {offsets = [32, 0], sizes = [256, 4], strides = [1, 1]} : vector<288x4xf32> to vector<256x4xf32>
    %c3_105 = arith.constant 3 : index
    %c1_106 = arith.constant 1 : index
    %c1_107 = arith.constant 1 : index
    %c0_108 = arith.constant 0 : index
    %c0_109 = arith.constant 0 : index
    %106 = vector.load %arg3[%c3_105, %c1_106, %c1_107, %c0_108, %c0_109] : memref<4x2x2x4x4xf32, #tpu.memory_space<vmem>>, vector<1x1x1x4x4xf32>
    %107 = vector.shape_cast %106 : vector<1x1x1x4x4xf32> to vector<4x4xf32>
    %cst_110 = arith.constant dense<0.000000e+00> : vector<256x4xf32>
    %108 = tpu.matmul %105, %107, %cst_110 {dimension_numbers = #tpu.dot_dimension_numbers<[1], [0], [0], [1], [0, 0, 1, 1], [], []>} : vector<256x4xf32>, vector<4x4xf32>, vector<256x4xf32> -> vector<256x4xf32>
    %109 = arith.addf %104, %108 : vector<256x4xf32>
    %110 = vector.shape_cast %12 : vector<4xf32> to vector<1x4xf32>
    %111 = vector.broadcast %110 : vector<1x4xf32> to vector<256x4xf32>
    %112 = arith.addf %109, %111 : vector<256x4xf32>
    %113 = vector.shape_cast %112 : vector<256x4xf32> to vector<16x16x4xf32>
    %c0_111 = arith.constant 0 : index
    %c3_112 = arith.constant 3 : index
    %c0_113 = arith.constant 0 : index
    %c0_114 = arith.constant 0 : index
    %c0_115 = arith.constant 0 : index
    %114 = vector.load %arg5[%c0_111, %c3_112, %c0_113, %c0_114, %c0_115] : memref<1x4x16x16x4xf32, #tpu.memory_space<vmem>>, vector<1x1x16x16x4xf32>
    %115 = vector.shape_cast %114 : vector<1x1x16x16x4xf32> to vector<16x16x4xf32>
    %116 = vector.shape_cast %113 : vector<16x16x4xf32> to vector<1x1x16x16x4xf32>
    tpu.vector_store %arg5[%c0_111, %c3_112, %c0_113, %c0_114, %c0_115], %116 {strides = array<i32>} : memref<1x4x16x16x4xf32, #tpu.memory_space<vmem>>, vector<1x1x16x16x4xf32>,
    return
  }
  func.func @transform_0(%arg0: i32, %arg1: i32) -> (i32, i32, i32, i32) {
    %c0_i32 = arith.constant 0 : i32
    %c0_i32_0 = arith.constant 0 : i32
    %c0_i32_1 = arith.constant 0 : i32
    %c0_i32_2 = arith.constant 0 : i32
    return %arg0, %c0_i32, %c0_i32_0, %c0_i32_1 : i32, i32, i32, i32
  }
  func.func @transform_1(%arg0: i32, %arg1: i32) -> (i32, i32, i32, i32, i32) {
    %c0_i32 = arith.constant 0 : i32
    %c0_i32_0 = arith.constant 0 : i32
    %c0_i32_1 = arith.constant 0 : i32
    %c0_i32_2 = arith.constant 0 : i32
    %c0_i32_3 = arith.constant 0 : i32
    %c0_i32_4 = arith.constant 0 : i32
    return %c0_i32, %c0_i32_0, %c0_i32_1, %c0_i32_2, %c0_i32_3 : i32, i32, i32, i32, i32
  }
  func.func @transform_2(%arg0: i32, %arg1: i32) -> (i32, i32) {
    %c0_i32 = arith.constant 0 : i32
    %c0_i32_0 = arith.constant 0 : i32
    %c0_i32_1 = arith.constant 0 : i32
    return %c0_i32, %c0_i32_0 : i32, i32
  }
  func.func @transform_3(%arg0: i32, %arg1: i32) -> (i32, i32, i32, i32, i32) {
    %c0_i32 = arith.constant 0 : i32
    %c0_i32_0 = arith.constant 0 : i32
    %c0_i32_1 = arith.constant 0 : i32
    %c0_i32_2 = arith.constant 0 : i32
    return %arg0, %c0_i32, %arg1, %c0_i32_0, %c0_i32_1 : i32, i32, i32, i32, i32
  }
}

</mosaic_0001>

<bundles_post_ra>
// kernel: tpu_custom_call.1
= control target key start
LH: loop header
LB: loop body
LE: loop exit
PB: predicated region body
PF: predicated region fallthrough
CT: control target
= control target key end

     0   :  { %s7459_s12 = smov 0   ;;  %s7461_s13 = smov 0   ;;  %s9481_s0 = inlined_call_operand.vmem [shape: f32[2,18,18,4], index: 0, kind: input, shape index: {}]   ;;  %s9482_s1 = inlined_call_operand.vmem [shape: f32[4,2,2,4,4], index: 1, kind: input, shape index: {}]   ;;  %s9483_s2 = inlined_call_operand.vmem [shape: f32[1,4], index: 2, kind: input, shape index: {}]   ;;  %s9484_s3 = inlined_call_operand.vmem [shape: f32[2,4,16,16,4], index: 3, kind: output, shape index: {}]  }
   0x1   :  { %s7463_s14 = smov 0  }
   0x2 LB: > { %s25_s15 = sadd.s32 1, %s7433_s13  ;;  %p5001_p0 = scmp.ge.s32.totalorder %s7437_s14, 1  ;;  %s7437_s14 = sphi %s7463_s14, %s13_s14   ;;  %s7433_s13 = sphi %s7461_s13, %s9769_s13   ;;  %s7429_s12 = sphi %s7459_s12, %s9768_s12  }
   0x3   : > { %p27_p1 = scmp.ge.s32.totalorder %s25_s15, 2  ;;  %p151_p2 = scmp.lt.s32.totalorder %s7437_s14, 3 }
   0x5   : > { %s9771_s15 = smov (%p27_p1, %s25_s15), 0  ;;  %p152_p3 = pnand %p5001_p0, %p151_p2 }
   0x7   : > { %155 = sbr.rel (%p152_p3) target bundleno = 749 (0x2ed), region = 32 }
   0xe   : > { %v5005_v0 = vld [vmem:[%s9482_s1 + $0x4] sm:$0xf]  ;;  %vm558_vm0 = vcmask 1043456   ;;  %v5142_v1 = vld [vmem:[%s9482_s1 + $0x14] sm:$0xf]  ;;  %p180_p4 = scmp.lt.s32.totalorder %s7429_s12, 1 }
   0xf   : > { %6176 = vmatprep.subr.msk.mxu0 %vm558_vm0, %v5005_v0  ;;  %6376 = vmatprep.subr.msk.mxu1 %vm558_vm0, %v5142_v1  ;;  %v490_v2 = vld [vmem:[%s9482_s1] sm:$0xf]  ;;  %v5141_v3 = vld [vmem:[%s9482_s1 + $0x10] sm:$0xf]  ;;  %vm307_vm1 = vcmask 1046528   ;;  %vm493_vm2 = vcmask 31744  }
  0x10   : > { %6177 = vmatpush3.msk.msra.mxu0 %vm558_vm0, %v5005_v0  ;;  %6377 = vmatpush3.msk.msra.mxu1 %vm558_vm0, %v5142_v1  ;;  %s9773_s12 = smov (!%p180_p4, %s7429_s12), 1  ;;  %vm398_vm3 = vcmask 1045504   ;;  %v7552_v30 = vld [vmem:[%s9482_s1 + $0x8] sm:$0xf]  ;;  %v7568_v36 = vld [vmem:[%s9482_s1 + $0x18] sm:$0xf] }
  0x11   : > { %6226 = vmatprep.subr.msk.mxu0 %vm558_vm0, %v490_v2  ;;  %6426 = vmatprep.subr.msk.mxu1 %vm558_vm0, %v5141_v3  ;;  %s7360_s24 = smul.u32 432, %s9773_s12  ;;  %s5647_s30 = sshll.u32 %s9773_s12, 10 }
  0x12   : > { %s8865_s7 = scalar_lea.vmem %s9484_s3, %s5647_s30 }
  0x13   : > { %s7501_s27 = scalar_lea.vmem %s9481_s0, %s7360_s24 }
  0x14   : > { %v7504_v4 = vld [vmem:[%s7501_s27] sm:$0xff]  ;;  %v7507_v5 = vld [vmem:[%s7501_s27 + $0x8] sm:$0xff]  ;;  %v201_v6 = vld [vmem:[%s7501_s27 + $0x10] sm:$0x3] }
  0x15   : > { %v308_v7 = vrot.slane %v7504_v4, 1  ;;  %v309_v8 = vrot.slane %v7507_v5, 1  ;;  %v399_v9 = vrot.slane %v7504_v4, 2  ;;  %v400_v10 = vrot.slane %v7507_v5, 2  ;;  %v7515_v11 = vld [vmem:[%s7501_s27 + $0x18] sm:$0xff]  ;;  %v7518_v12 = vld [vmem:[%s7501_s27 + $0x20] sm:$0xff] }
  0x16   : > { %v311_v13 = vrot.slane %v201_v6, 1  ;;  %v402_v14 = vrot.slane %v201_v6, 2  ;;  %v313_v15 = vrot.slane %v7515_v11, 1  ;;  %v314_v16 = vrot.slane %v7518_v12, 1  ;;  %v204_v17 = vld [vmem:[%s7501_s27 + $0x28] sm:$0x3] }
  0x17   : > { %v7524_v18 = vsel %vm307_vm1, %v308_v7, %v309_v8  ;;  %v401_v19 = vsel %vm398_vm3, %v399_v9, %v400_v10  ;;  %v404_v20 = vrot.slane %v7515_v11, 2  ;;  %v405_v21 = vrot.slane %v7518_v12, 2  ;;  %v7530_v22 = vld [vmem:[%s7501_s27 + $0x30] sm:$0xff]  ;;  %v7533_v23 = vld [vmem:[%s7501_s27 + $0x38] sm:$0xff]  ;;  %v207_v24 = vld [vmem:[%s7501_s27 + $0x40] sm:$0x3] }
  0x18   : > { %6178 = vmatprep.mubr.msk.f32.mxu0 %vm493_vm2, %v7524_v18  ;;  %6378 = vmatprep.mubr.msk.f32.mxu1 %vm493_vm2, %v401_v19  ;;  %v7540_v25 = vsel %vm307_vm1, %v309_v8, %v311_v13  ;;  %v403_v26 = vsel %vm398_vm3, %v400_v10, %v402_v14  ;;  %v7544_v27 = vsel %vm307_vm1, %v313_v15, %v314_v16  ;;  %v316_v28 = vrot.slane %v204_v17, 1  ;;  %v7547_v29 = vld [vmem:[%s7501_s27 + $0x48] sm:$0xff]  ;;  %v7563_v35 = vld [vmem:[%s7501_s27 + $0x50] sm:$0xff]  ;;  %v210_v41 = vld [vmem:[%s7501_s27 + $0x58] sm:$0x3] }
  0x19   : > { %6179 = vmatmul.mubr.msk.f32.vlgmr.msra.gmra.mrb[0].mxu0 %vm493_vm2, %v7540_v25  ;;  %6379 = vmatmul.mubr.msk.f32.vlgmr.msra.gmra.mrb[0].mxu1 %vm493_vm2, %v403_v26  ;;  %v7558_v31 = vsel %vm398_vm3, %v404_v20, %v405_v21  ;;  %v407_v32 = vrot.slane %v204_v17, 2  ;;  %v318_v33 = vrot.slane %v7530_v22, 1  ;;  %v319_v34 = vrot.slane %v7533_v23, 1  ;;  %v7590_v46 = vld [vmem:[%s7501_s27 + $0x60] sm:$0xff]  ;;  %v7593_v47 = vld [vmem:[%s7501_s27 + $0x68] sm:$0xff]  ;;  %v7631_v63 = vld [vmem:[%s7501_s27 + $0x78] sm:$0xff] }
  0x1a   : > { %9617 = vst [vmem:[#allocation2_spill] sm:$0xff] %v7558_v31  ;;  %6227 = vmatpush3.msk.msra.mxu0 %vm558_vm0, %v490_v2  ;;  %6427 = vmatpush3.msk.msra.mxu1 %vm558_vm0, %v5141_v3  ;;  %v7573_v37 = vsel %vm307_vm1, %v314_v16, %v316_v28  ;;  %v409_v38 = vrot.slane %v7530_v22, 2  ;;  %v410_v39 = vrot.slane %v7533_v23, 2  ;;  %v321_v40 = vrot.slane %v207_v24, 1  ;;  %v213_v62 = vld [vmem:[%s7501_s27 + $0x70] sm:$0x3] }
  0x1b   : > { %6181 = vmatprep.mubr.msk.f32.mxu0 %vm493_vm2, %v7544_v27  ;;  %6381 = vmatprep.mubr.msk.f32.mxu1 %vm493_vm2, %v7558_v31  ;;  %v7583_v42 = vsel %vm398_vm3, %v405_v21, %v407_v32  ;;  %v7586_v43 = vsel %vm307_vm1, %v318_v33, %v319_v34  ;;  %v412_v44 = vrot.slane %v207_v24, 2  ;;  %v323_v45 = vrot.slane %v7547_v29, 1  ;;  %v7634_v0 = vld [vmem:[%s7501_s27 + $0x80] sm:$0xff]  ;;  %v216_v9 = vld [vmem:[%s7501_s27 + $0x88] sm:$0x3]  ;;  %v7662_v16 = vld [vmem:[%s7501_s27 + $0x90] sm:$0xff] }
  0x1c   : > { %9618 = vst [vmem:[#allocation3_spill] sm:$0xff] %v7583_v42  ;;  %v7596_v48 = vsel %vm398_vm3, %v409_v38, %v410_v39  ;;  %v324_v49 = vrot.slane %v7563_v35, 1  ;;  %v414_v50 = vrot.slane %v7547_v29, 2  ;;  %6276 = vmatprep.subr.msk.mxu0 %vm558_vm0, %v7552_v30  ;;  %6476 = vmatprep.subr.msk.mxu1 %vm558_vm0, %v7568_v36  ;;  %v415_v51 = vrot.slane %v7563_v35, 2  ;;  %9624 = vst [vmem:[#allocation9_spill] sm:$0xff] %v7662_v16  ;;  %v7665_v17 = vld [vmem:[%s7501_s27 + $0x98] sm:$0xff] }
  0x1d   : > { %9619 = vst [vmem:[#allocation4_spill] sm:$0xff] %v7596_v48  ;;  %6182 = vmatmul.mubr.msk.f32.gmra.mrb[2].mxu0 %vm493_vm2, %v7573_v37  ;;  %6382 = vmatmul.mubr.msk.f32.gmra.mrb[2].mxu1 %vm493_vm2, %v7583_v42  ;;  %v326_v52 = vrot.slane %v210_v41, 1  ;;  %v417_v53 = vrot.slane %v210_v41, 2  ;;  %v7614_v54 = vsel %vm307_vm1, %v319_v34, %v321_v40  ;;  %v7617_v55 = vsel %vm398_vm3, %v410_v39, %v412_v44  ;;  %v219_v39 = vld [vmem:[%s7501_s27 + $0xa0] sm:$0x3]  ;;  %v7693_v40 = vld [vmem:[%s7501_s27 + $0xa8] sm:$0xff] }
  0x1e   : > { %6184 = vmatprep.mubr.msk.f32.mxu0 %vm493_vm2, %v7586_v43  ;;  %6384 = vmatprep.mubr.msk.f32.mxu1 %vm493_vm2, %v7596_v48  ;;  %9620 = vst [vmem:[#allocation5_spill] sm:$0xff] %v7617_v55  ;;  %v328_v56 = vrot.slane %v7590_v46, 1  ;;  %v329_v57 = vrot.slane %v7593_v47, 1  ;;  %v7622_v58 = vsel %vm307_vm1, %v323_v45, %v324_v49  ;;  %v7625_v59 = vsel %vm398_vm3, %v414_v50, %v415_v51  ;;  %v7696_v41 = vld [vmem:[%s7501_s27 + $0xb0] sm:$0xff]  ;;  %v7848_v42 = vld [vmem:[%s7501_s27 + $0x120] sm:$0xff] }
  0x1f   : > { %9621 = vst [vmem:[#allocation6_spill] sm:$0xff] %v7625_v59  ;;  %v419_v60 = vrot.slane %v7590_v46, 2  ;;  %v420_v61 = vrot.slane %v7593_v47, 2  ;;  %v7641_v1 = vsel %vm307_vm1, %v324_v49, %v326_v52  ;;  %v7644_v2 = vsel %vm398_vm3, %v415_v51, %v417_v53  ;;  %9625 = vst [vmem:[#allocation10_spill] sm:$0xff] %v7665_v17  ;;  %v222_v53 = vld [vmem:[%s7501_s27 + $0xb8] sm:$0x3] }
  0x20   : > { %9622 = vst [vmem:[#allocation7_spill] sm:$0xff] %v7644_v2  ;;  %v7651_v3 = vsel %vm307_vm1, %v328_v56, %v329_v57  ;;  %v331_v6 = vrot.slane %v213_v62, 1  ;;  %v422_v7 = vrot.slane %v213_v62, 2  ;;  %v333_v8 = vrot.slane %v7631_v63, 1  ;;  %9628 = vst [vmem:[#allocation13_spill] sm:$0xff] %v7693_v40  ;;  %v7724_v62 = vld [vmem:[%s7501_s27 + $0xc0] sm:$0xff] }
  0x21   : > { %6185 = vmatmul.mubr.msk.f32.gmra.mrb[4].mxu0 %vm493_vm2, %v7614_v54  ;;  %6385 = vmatmul.mubr.msk.f32.gmra.mrb[4].mxu1 %vm493_vm2, %v7617_v55  ;;  %v7656_v10 = vsel %vm398_vm3, %v419_v60, %v420_v61  ;;  %v334_v13 = vrot.slane %v7634_v0, 1  ;;  %v424_v14 = vrot.slane %v7631_v63, 2  ;;  %v425_v15 = vrot.slane %v7634_v0, 2  ;;  %9629 = vst [vmem:[#allocation14_spill] sm:$0xff] %v7696_v41  ;;  %9632 = vst [vmem:[#allocation17_spill] sm:$0xff] %v7724_v62 }
  0x22   : > { %6187 = vmatprep.mubr.msk.f32.mxu0 %vm493_vm2, %v7622_v58  ;;  %6387 = vmatprep.mubr.msk.f32.mxu1 %vm493_vm2, %v7625_v59  ;;  %9623 = vst [vmem:[#allocation8_spill] sm:$0xff] %v7656_v10  ;;  %v336_v19 = vrot.slane %v216_v9, 1  ;;  %v427_v20 = vrot.slane %v216_v9, 2  ;;  %v7676_v21 = vsel %vm307_vm1, %v329_v57, %v331_v6  ;;  %v7679_v24 = vsel %vm398_vm3, %v420_v61, %v422_v7  ;;  %v7727_v6 = vld [vmem:[%s7501_s27 + $0xc8] sm:$0xff] }
  0x23   : > { %9626 = vst [vmem:[#allocation11_spill] sm:$0xff] %v7679_v24  ;;  %v338_v26 = vrot.slane %v7662_v16, 1  ;;  %v339_v28 = vrot.slane %v7665_v17, 1  ;;  %v7684_v32 = vsel %vm307_vm1, %v333_v8, %v334_v13  ;;  %v7687_v33 = vsel %vm398_vm3, %v424_v14, %v425_v15  ;;  %9633 = vst [vmem:[#allocation18_spill] sm:$0xff] %v7727_v6 }
  0x24   : > { %9627 = vst [vmem:[#allocation12_spill] sm:$0xff] %v7687_v33  ;;  %v429_v34 = vrot.slane %v7662_v16, 2  ;;  %v430_v38 = vrot.slane %v7665_v17, 2  ;;  %v7703_v44 = vsel %vm307_vm1, %v334_v13, %v336_v19  ;;  %v7706_v45 = vsel %vm398_vm3, %v425_v15, %v427_v20  ;;  %9649 = vst [vmem:[#allocation34_spill] sm:$0xff] %v7848_v42 }
  0x25   : > { %6188 = vmatmul.mubr.msk.f32.gmra.mrb[6].mxu0 %vm493_vm2, %v7641_v1  ;;  %6388 = vmatmul.mubr.msk.f32.gmra.mrb[6].mxu1 %vm493_vm2, %v7644_v2  ;;  %9630 = vst [vmem:[#allocation15_spill] sm:$0xff] %v7706_v45  ;;  %v7713_v49 = vsel %vm307_vm1, %v338_v26, %v339_v28  ;;  %v341_v50 = vrot.slane %v219_v39, 1  ;;  %v432_v51 = vrot.slane %v219_v39, 2  ;;  %v343_v52 = vrot.slane %v7693_v40, 1  ;;  %v7755_v39 = vld [vmem:[%s7501_s27 + $0xd8] sm:$0xff] }
  0x26   : > { %6190 = vmatprep.mubr.msk.f32.mxu0 %vm493_vm2, %v7651_v3  ;;  %6390 = vmatprep.mubr.msk.f32.mxu1 %vm493_vm2, %v7656_v10  ;;  %v7718_v56 = vsel %vm398_vm3, %v429_v34, %v430_v38  ;;  %v344_v57 = vrot.slane %v7696_v41, 1  ;;  %v434_v60 = vrot.slane %v7693_v40, 2  ;;  %v435_v61 = vrot.slane %v7696_v41, 2  ;;  %9636 = vst [vmem:[#allocation21_spill] sm:$0xff] %v7755_v39 }
  0x27   : > { %9631 = vst [vmem:[#allocation16_spill] sm:$0xff] %v7718_v56  ;;  %v346_v7 = vrot.slane %v222_v53, 1  ;;  %v437_v8 = vrot.slane %v222_v53, 2  ;;  %v7738_v9 = vsel %vm307_vm1, %v339_v28, %v341_v50  ;;  %v7741_v13 = vsel %vm398_vm3, %v430_v38, %v432_v51  ;;  %v225_v28 = vld [vmem:[%s7501_s27 + $0xd0] sm:$0x3]  ;;  %v7758_v38 = vld [vmem:[%s7501_s27 + $0xe0] sm:$0xff] }
  0x28   : > { %9634 = vst [vmem:[#allocation19_spill] sm:$0xff] %v7741_v13  ;;  %v348_v14 = vrot.slane %v7724_v62, 1  ;;  %v349_v15 = vrot.slane %v7727_v6, 1  ;;  %v7746_v19 = vsel %vm307_vm1, %v343_v52, %v344_v57  ;;  %v7749_v20 = vsel %vm398_vm3, %v434_v60, %v435_v61  ;;  %9637 = vst [vmem:[#allocation22_spill] sm:$0xff] %v7758_v38 }
  0x29   : > { %6191 = vmatmul.mubr.msk.f32.gmra.mrb[8].mxu0 %vm493_vm2, %v7676_v21  ;;  %6391 = vmatmul.mubr.msk.f32.gmra.mrb[8].mxu1 %vm493_vm2, %v7679_v24  ;;  %9635 = vst [vmem:[#allocation20_spill] sm:$0xff] %v7749_v20  ;;  %v439_v26 = vrot.slane %v7724_v62, 2  ;;  %v440_v34 = vrot.slane %v7727_v6, 2  ;;  %v7765_v50 = vsel %vm307_vm1, %v344_v57, %v346_v7  ;;  %v7768_v51 = vsel %vm398_vm3, %v435_v61, %v437_v8 }
  0x2a   : > { %6193 = vmatprep.mubr.msk.f32.mxu0 %vm493_vm2, %v7684_v32  ;;  %6393 = vmatprep.mubr.msk.f32.mxu1 %vm493_vm2, %v7687_v33  ;;  %9638 = vst [vmem:[#allocation23_spill] sm:$0xff] %v7768_v51  ;;  %v7775_v52 = vsel %vm307_vm1, %v348_v14, %v349_v15  ;;  %v351_v53 = vrot.slane %v225_v28, 1  ;;  %v442_v60 = vrot.slane %v225_v28, 2  ;;  %v354_v61 = vrot.slane %v7758_v38, 1 }
  0x2b   : > { %v7780_v57 = vsel %vm398_vm3, %v439_v26, %v440_v34  ;;  %v444_v7 = vrot.slane %v7755_v39, 2  ;;  %v445_v8 = vrot.slane %v7758_v38, 2 }
  0x2c   : > { %9639 = vst [vmem:[#allocation24_spill] sm:$0xff] %v7780_v57  ;;  %v7800_v28 = vsel %vm307_vm1, %v349_v15, %v351_v53  ;;  %v7803_v33 = vsel %vm398_vm3, %v440_v34, %v442_v60  ;;  %v231_v15 = vld [vmem:[%s7501_s27 + $0x100] sm:$0x3]  ;;  %v7817_v53 = vld [vmem:[%s7501_s27 + $0x108] sm:$0xff]  ;;  %v7820_v34 = vld [vmem:[%s7501_s27 + $0x110] sm:$0xff] }
  0x2d   : > { %6194 = vmatmul.mubr.msk.f32.gmra.mrb[10].mxu0 %vm493_vm2, %v7703_v44  ;;  %6394 = vmatmul.mubr.msk.f32.gmra.mrb[10].mxu1 %vm493_vm2, %v7706_v45  ;;  %v7786_v45 = vld [vmem:[%s7501_s27 + $0xf0] sm:$0xff]  ;;  %9642 = vst [vmem:[#allocation27_spill] sm:$0xff] %v7803_v33  ;;  %9644 = vst [vmem:[#allocation29_spill] sm:$0xff] %v7817_v53  ;;  %v361_v59 = vrot.slane %v231_v15, 1  ;;  %v452_v55 = vrot.slane %v231_v15, 2  ;;  %v363_v48 = vrot.slane %v7817_v53, 1 }
  0x2e   : > { %6196 = vmatprep.mubr.msk.f32.mxu0 %vm493_vm2, %v7713_v49  ;;  %6396 = vmatprep.mubr.msk.f32.mxu1 %vm493_vm2, %v7718_v56  ;;  %v353_v56 = vrot.slane %v7755_v39, 1  ;;  %9640 = vst [vmem:[#allocation25_spill] sm:$0xff] %v7786_v45  ;;  %v358_v24 = vrot.slane %v7786_v45, 1  ;;  %v449_v2 = vrot.slane %v7786_v45, 2  ;;  %9645 = vst [vmem:[#allocation30_spill] sm:$0xff] %v7820_v34 }
  0x31   : > { %6197 = vmatmul.mubr.msk.f32.gmra.mrb[12].mxu0 %vm493_vm2, %v7738_v9  ;;  %6397 = vmatmul.mubr.msk.f32.gmra.mrb[12].mxu1 %vm493_vm2, %v7741_v13  ;;  %v228_v13 = vld [vmem:[%s7501_s27 + $0xe8] sm:$0x3] }
  0x32   : > { %6199 = vmatprep.mubr.msk.f32.mxu0 %vm493_vm2, %v7746_v19  ;;  %6399 = vmatprep.mubr.msk.f32.mxu1 %vm493_vm2, %v7749_v20  ;;  %v7789_v20 = vld [vmem:[%s7501_s27 + $0xf8] sm:$0xff]  ;;  %v356_v14 = vrot.slane %v228_v13, 1  ;;  %v447_v26 = vrot.slane %v228_v13, 2  ;;  %v7811_v13 = vsel %vm398_vm3, %v444_v7, %v445_v8 }
  0x33   : > { %9641 = vst [vmem:[#allocation26_spill] sm:$0xff] %v7789_v20  ;;  %v359_v10 = vrot.slane %v7789_v20, 1  ;;  %9643 = vst [vmem:[#allocation28_spill] sm:$0xff] %v7811_v13 }
  0x34   : > { %v7830_v60 = vsel %vm398_vm3, %v445_v8, %v447_v26  ;;  %v364_v8 = vrot.slane %v7820_v34, 1  ;;  %v455_v26 = vrot.slane %v7820_v34, 2  ;;  %v368_v34 = vrot.slane %v7848_v42, 1 }
  0x35   : > { %6200 = vmatmul.mubr.msk.f32.gmra.mrb[14].mxu0 %vm493_vm2, %v7765_v50  ;;  %6400 = vmatmul.mubr.msk.f32.gmra.mrb[14].mxu1 %vm493_vm2, %v7768_v51  ;;  %v7808_v51 = vsel %vm307_vm1, %v353_v56, %v354_v61  ;;  %v7827_v56 = vsel %vm307_vm1, %v354_v61, %v356_v14  ;;  %9646 = vst [vmem:[#allocation31_spill] sm:$0xff] %v7830_v60  ;;  %v454_v14 = vrot.slane %v7817_v53, 2 }
  0x36   : > { %6202 = vmatprep.mubr.msk.f32.mxu0 %vm493_vm2, %v7775_v52  ;;  %6402 = vmatprep.mubr.msk.f32.mxu1 %vm493_vm2, %v7780_v57  ;;  %v450_v57 = vrot.slane %v7789_v20, 2  ;;  %v7837_v7 = vsel %vm307_vm1, %v358_v24, %v359_v10  ;;  %v7862_v15 = vsel %vm307_vm1, %v359_v10, %v361_v59  ;;  %v459_v20 = vrot.slane %v7848_v42, 2  ;;  %v237_v59 = vld [vmem:[%s7501_s27 + $0x130] sm:$0x3]  ;;  %v7879_v10 = vld [vmem:[%s7501_s27 + $0x138] sm:$0xff] }
  0x37   : > { %9647 = vst [vmem:[#allocation32_spill] sm:$0xff] %v7837_v7  ;;  %9651 = vst [vmem:[#allocation36_spill] sm:$0xff] %v7862_v15  ;;  %v462_v42 = vrot.slane %v237_v59, 2 }
  0x38   : > { %v7842_v61 = vsel %vm398_vm3, %v449_v2, %v450_v57  ;;  %v7865_v31 = vsel %vm398_vm3, %v450_v57, %v452_v55  ;;  %9655 = vst [vmem:[#allocation40_spill] sm:$0xff] %v7879_v10  ;;  %v7882_v55 = vld [vmem:[%s7501_s27 + $0x140] sm:$0xff] }
  0x39   : > { %6203 = vmatmul.mubr.msk.f32.gmra.mrb[16].mxu0 %vm493_vm2, %v7800_v28  ;;  %6403 = vmatmul.mubr.msk.f32.gmra.mrb[16].mxu1 %vm493_vm2, %v7803_v33  ;;  %v234_v33 = vld [vmem:[%s7501_s27 + $0x118] sm:$0x3]  ;;  %9648 = vst [vmem:[#allocation33_spill] sm:$0xff] %v7842_v61  ;;  %9652 = vst [vmem:[#allocation37_spill] sm:$0xff] %v7865_v31 }
  0x3a   : > { %6205 = vmatprep.mubr.msk.f32.mxu0 %vm493_vm2, %v7808_v51  ;;  %6405 = vmatprep.mubr.msk.f32.mxu1 %vm493_vm2, %v7811_v13  ;;  %v7851_v13 = vld [vmem:[%s7501_s27 + $0x128] sm:$0xff]  ;;  %v366_v2 = vrot.slane %v234_v33, 1  ;;  %v457_v24 = vrot.slane %v234_v33, 2  ;;  %v7873_v33 = vsel %vm398_vm3, %v454_v14, %v455_v26  ;;  %9656 = vst [vmem:[#allocation41_spill] sm:$0xff] %v7882_v55 }
  0x3b   : > { %9650 = vst [vmem:[#allocation35_spill] sm:$0xff] %v7851_v13  ;;  %v369_v53 = vrot.slane %v7851_v13, 1  ;;  %9654 = vst [vmem:[#allocation39_spill] sm:$0xff] %v7873_v33 }
  0x3c   : > { %v7892_v57 = vsel %vm398_vm3, %v455_v26, %v457_v24  ;;  %v374_v26 = vrot.slane %v7882_v55, 1  ;;  %v465_v24 = vrot.slane %v7882_v55, 2 }
  0x3d   : > { %6206 = vmatmul.mubr.msk.f32.gmra.mrb[18].mxu0 %vm493_vm2, %v7827_v56  ;;  %6406 = vmatmul.mubr.msk.f32.gmra.mrb[18].mxu1 %vm493_vm2, %v7830_v60  ;;  %v7870_v60 = vsel %vm307_vm1, %v363_v48, %v364_v8  ;;  %v7889_v48 = vsel %vm307_vm1, %v364_v8, %v366_v2  ;;  %9658 = vst [vmem:[#allocation43_spill] sm:$0xff] %v7892_v57  ;;  %v464_v2 = vrot.slane %v7879_v10, 2 }
  0x3e   : > { %6208 = vmatprep.mubr.msk.f32.mxu0 %vm493_vm2, %v7837_v7  ;;  %6408 = vmatprep.mubr.msk.f32.mxu1 %vm493_vm2, %v7842_v61  ;;  %9653 = vst [vmem:[#allocation38_spill] sm:$0xff] %v7870_v60  ;;  %v460_v61 = vrot.slane %v7851_v13, 2  ;;  %9657 = vst [vmem:[#allocation42_spill] sm:$0xff] %v7889_v48  ;;  %v7899_v14 = vsel %vm307_vm1, %v368_v34, %v369_v53  ;;  %v371_v13 = vrot.slane %v237_v59, 1  ;;  %v243_v7 = vld [vmem:[%s7501_s27 + $0x160] sm:$0x3] }
  0x3f   : > { %9659 = vst [vmem:[#allocation44_spill] sm:$0xff] %v7899_v14 }
  0x40   : > { %v7904_v8 = vsel %vm398_vm3, %v459_v20, %v460_v61  ;;  %v7924_v59 = vsel %vm307_vm1, %v369_v53, %v371_v13  ;;  %v7927_v55 = vsel %vm398_vm3, %v460_v61, %v462_v42  ;;  %v7941_v13 = vld [vmem:[%s7501_s27 + $0x168] sm:$0xff]  ;;  %v7944_v42 = vld [vmem:[%s7501_s27 + $0x170] sm:$0xff] }
  0x41   : > { %6209 = vmatmul.mubr.msk.f32.gmra.mrb[20].mxu0 %vm493_vm2, %v7862_v15  ;;  %6409 = vmatmul.mubr.msk.f32.gmra.mrb[20].mxu1 %vm493_vm2, %v7865_v31  ;;  %v373_v15 = vrot.slane %v7879_v10, 1  ;;  %v240_v31 = vld [vmem:[%s7501_s27 + $0x148] sm:$0x3]  ;;  %9660 = vst [vmem:[#allocation45_spill] sm:$0xff] %v7904_v8  ;;  %9663 = vst [vmem:[#allocation48_spill] sm:$0xff] %v7924_v59 }
  0x42   : > { %6211 = vmatprep.mubr.msk.f32.mxu0 %vm493_vm2, %v7870_v60  ;;  %6411 = vmatprep.mubr.msk.f32.mxu1 %vm493_vm2, %v7873_v33  ;;  %v7910_v60 = vld [vmem:[%s7501_s27 + $0x150] sm:$0xff]  ;;  %v7913_v33 = vld [vmem:[%s7501_s27 + $0x158] sm:$0xff]  ;;  %v376_v20 = vrot.slane %v240_v31, 1  ;;  %v467_v34 = vrot.slane %v240_v31, 2  ;;  %9664 = vst [vmem:[#allocation49_spill] sm:$0xff] %v7927_v55  ;;  %v7935_v31 = vsel %vm398_vm3, %v464_v2, %v465_v24  ;;  %9666 = vst [vmem:[#allocation51_spill] sm:$0xff] %v7941_v13 }
  0x43   : > { %9661 = vst [vmem:[#allocation46_spill] sm:$0xff] %v7910_v60  ;;  %9662 = vst [vmem:[#allocation47_spill] sm:$0xff] %v7913_v33  ;;  %v378_v10 = vrot.slane %v7910_v60, 1  ;;  %v381_v2 = vrot.slane %v243_v7, 1 }
  0x44   : > { %9665 = vst [vmem:[#allocation50_spill] sm:$0xff] %v7935_v31  ;;  %9667 = vst [vmem:[#allocation52_spill] sm:$0xff] %v7944_v42  ;;  %v7951_v53 = vsel %vm307_vm1, %v374_v26, %v376_v20  ;;  %v7954_v61 = vsel %vm398_vm3, %v465_v24, %v467_v34  ;;  %v474_v24 = vrot.slane %v7941_v13, 2  ;;  %v475_v20 = vrot.slane %v7944_v42, 2  ;;  %v246_v34 = vld [vmem:[%s7501_s27 + $0x178] sm:$0x3] }
  0x45   : > { %6212 = vmatmul.mubr.msk.f32.gmra.mrb[22].mxu0 %vm493_vm2, %v7889_v48  ;;  %6412 = vmatmul.mubr.msk.f32.gmra.mrb[22].mxu1 %vm493_vm2, %v7892_v57  ;;  %v379_v48 = vrot.slane %v7913_v33, 1  ;;  %v7932_v57 = vsel %vm307_vm1, %v373_v15, %v374_v26  ;;  %9668 = vst [vmem:[#allocation53_spill] sm:$0xff] %v7954_v61  ;;  %v384_v26 = vrot.slane %v7944_v42, 1 }
  0x46   : > { %6214 = vmatprep.mubr.msk.f32.mxu0 %vm493_vm2, %v7899_v14  ;;  %6414 = vmatprep.mubr.msk.f32.mxu1 %vm493_vm2, %v7904_v8  ;;  %v469_v14 = vrot.slane %v7910_v60, 2  ;;  %v470_v8 = vrot.slane %v7913_v33, 2  ;;  %v472_v33 = vrot.slane %v243_v7, 2  ;;  %v383_v60 = vrot.slane %v7941_v13, 1 }
  0x47   : > { %v7961_v15 = vsel %vm307_vm1, %v378_v10, %v379_v48  ;;  %v7980_v7 = vsel %vm307_vm1, %v379_v48, %v381_v2  ;;  %v7989_v13 = vsel %vm398_vm3, %v474_v24, %v475_v20  ;;  %v8020_v48 = vld [vmem:[%s9482_s1 + $0xc] sm:$0xf]  ;;  %v9681_v2 = vld [vmem:[#allocation34_spill] sm:$0xff] }
  0x48   : > { %9669 = vst [vmem:[#allocation54_spill] sm:$0xff] %v7961_v15  ;;  %v7983_v10 = vsel %vm398_vm3, %v470_v8, %v472_v33  ;;  %v7986_v42 = vsel %vm307_vm1, %v383_v60, %v384_v26  ;;  %9672 = vst [vmem:[#allocation57_spill] sm:$0xff] %v7989_v13  ;;  %v9683_v24 = vld [vmem:[#allocation35_spill] sm:$0xff] }
  0x49   : > { %6215 = vmatmul.mubr.msk.f32.gmra.mrb[24].mxu0 %vm493_vm2, %v7924_v59  ;;  %6415 = vmatmul.mubr.msk.f32.gmra.mrb[24].mxu1 %vm493_vm2, %v7927_v55  ;;  %v7965_v55 = vsel %vm398_vm3, %v469_v14, %v470_v8  ;;  %9671 = vst [vmem:[#allocation56_spill] sm:$0xff] %v7983_v10  ;;  %v386_v14 = vrot.slane %v246_v34, 1  ;;  %v8025_v8 = vld [vmem:[%s9482_s1 + $0x1c] sm:$0xf] }
  0x4a   : > { %6217 = vmatprep.mubr.msk.f32.mxu0 %vm493_vm2, %v7932_v57  ;;  %6417 = vmatprep.mubr.msk.f32.mxu1 %vm493_vm2, %v7935_v31  ;;  %9670 = vst [vmem:[#allocation55_spill] sm:$0xff] %v7965_v55  ;;  %v477_v31 = vrot.slane %v246_v34, 2  ;;  %v9685_v34 = vld [vmem:[#allocation41_spill] sm:$0xff] }
  0x4b   : > { %v8000_v33 = vsel %vm307_vm1, %v384_v26, %v386_v14  ;;  %v9682_v26 = vld [vmem:[#allocation44_spill] sm:$0xff]  ;;  %v9686_v14 = vld [vmem:[#allocation46_spill] sm:$0xff] }
  0x4c   : > { %v8003_v60 = vsel %vm398_vm3, %v475_v20, %v477_v31  ;;  %v9680_v31 = vld [vmem:[#allocation42_spill] sm:$0xff]  ;;  %v9684_v20 = vld [vmem:[#allocation40_spill] sm:$0xff] }
  0x4d   : > { %6218 = vmatmul.mubr.msk.f32.gmra.mrb[26].mxu0 %vm493_vm2, %v7951_v53  ;;  %6418 = vmatmul.mubr.msk.f32.gmra.mrb[26].mxu1 %vm493_vm2, %v7954_v61  ;;  %9673 = vst [vmem:[#allocation58_spill] sm:$0xff] %v8003_v60  ;;  %v8171_v61 = vld [vmem:[%s9482_s1 + $0x34] sm:$0xf] }
  0x4e   : > { %6220 = vmatprep.mubr.msk.f32.mxu0 %vm493_vm2, %v7961_v15  ;;  %6420 = vmatprep.mubr.msk.f32.mxu1 %vm493_vm2, %v7965_v55  ;;  %v8166_v55 = vld [vmem:[%s9482_s1 + $0x24] sm:$0xf] }
  0x51   : > { %6221 = vmatmul.mubr.msk.f32.gmra.mrb[28].mxu0 %vm493_vm2, %v7980_v7  ;;  %6421 = vmatmul.mubr.msk.f32.gmra.mrb[28].mxu1 %vm493_vm2, %v7983_v10  ;;  %v9689_v10 = vld [vmem:[#allocation52_spill] sm:$0xff] }
  0x52   : > { %6223 = vmatprep.mubr.msk.f32.mxu0 %vm493_vm2, %v7986_v42  ;;  %6423 = vmatprep.mubr.msk.f32.mxu1 %vm493_vm2, %v7989_v13  ;;  %v9688_v13 = vld [vmem:[#allocation51_spill] sm:$0xff] }
  0x55   : > { %6224 = vmatmul.mubr.msk.f32.gmra.mrb[30].mxu0 %vm493_vm2, %v8000_v33  ;;  %6424 = vmatmul.mubr.msk.f32.gmra.mrb[30].mxu1 %vm493_vm2, %v8003_v60  ;;  %v9687_v60 = vld [vmem:[#allocation47_spill] sm:$0xff] }
  0x56   : > { %6228 = vmatprep.mubr.msk.f32.mxu0 %vm493_vm2, %v7504_v4  ;;  %6428 = vmatprep.mubr.msk.f32.mxu1 %vm493_vm2, %v7524_v18  ;;  %v9674_v4 = vld [vmem:[#allocation32_spill] sm:$0xff] }
  0x57   : > { %v9676_v18 = vld [vmem:[#allocation36_spill] sm:$0xff] }
  0x59   : > { %6229 = vmatmul.mubr.msk.f32.vlgmr.msra.gmra.mrb[0].mxu0 %vm493_vm2, %v7507_v5  ;;  %6429 = vmatmul.mubr.msk.f32.vlgmr.msra.gmra.mrb[0].mxu1 %vm493_vm2, %v7540_v25  ;;  %v9675_v5 = vld [vmem:[#allocation26_spill] sm:$0xff]  ;;  %v9677_v25 = vld [vmem:[#allocation29_spill] sm:$0xff] }
  0x5a   : > { %6277 = vmatpush3.msk.msra.mxu0 %vm558_vm0, %v7552_v30  ;;  %6477 = vmatpush3.msk.msra.mxu1 %vm558_vm0, %v7568_v36  ;;  %v9678_v30 = vld [vmem:[#allocation38_spill] sm:$0xff] }
  0x5b   : > { %6231 = vmatprep.mubr.msk.f32.mxu0 %vm493_vm2, %v7515_v11  ;;  %6431 = vmatprep.mubr.msk.f32.mxu1 %vm493_vm2, %v7544_v27  ;;  %v9679_v36 = vld [vmem:[#allocation30_spill] sm:$0xff] }
  0x5c   : > { %6326 = vmatprep.subr.msk.mxu0 %vm558_vm0, %v8020_v48  ;;  %6526 = vmatprep.subr.msk.mxu1 %vm558_vm0, %v8025_v8 }
  0x5d   : > { %6232 = vmatmul.mubr.msk.f32.gmra.mrb[2].mxu0 %vm493_vm2, %v7518_v12  ;;  %6432 = vmatmul.mubr.msk.f32.gmra.mrb[2].mxu1 %vm493_vm2, %v7573_v37 }
  0x5e   : > { %6234 = vmatprep.mubr.msk.f32.mxu0 %vm493_vm2, %v7530_v22  ;;  %6434 = vmatprep.mubr.msk.f32.mxu1 %vm493_vm2, %v7586_v43 }
  0x61   : > { %6235 = vmatmul.mubr.msk.f32.gmra.mrb[4].mxu0 %vm493_vm2, %v7533_v23  ;;  %6435 = vmatmul.mubr.msk.f32.gmra.mrb[4].mxu1 %vm493_vm2, %v7614_v54 }
  0x62   : > { %6237 = vmatprep.mubr.msk.f32.mxu0 %vm493_vm2, %v7547_v29  ;;  %6437 = vmatprep.mubr.msk.f32.mxu1 %vm493_vm2, %v7622_v58 }
  0x65   : > { %6238 = vmatmul.mubr.msk.f32.gmra.mrb[6].mxu0 %vm493_vm2, %v7563_v35  ;;  %6438 = vmatmul.mubr.msk.f32.gmra.mrb[6].mxu1 %vm493_vm2, %v7641_v1 }
  0x66   : > { %6240 = vmatprep.mubr.msk.f32.mxu0 %vm493_vm2, %v7590_v46  ;;  %6440 = vmatprep.mubr.msk.f32.mxu1 %vm493_vm2, %v7651_v3 }
  0x69   : > { %6241 = vmatmul.mubr.msk.f32.gmra.mrb[8].mxu0 %vm493_vm2, %v7593_v47  ;;  %6441 = vmatmul.mubr.msk.f32.gmra.mrb[8].mxu1 %vm493_vm2, %v7676_v21 }
  0x6a   : > { %6243 = vmatprep.mubr.msk.f32.mxu0 %vm493_vm2, %v7631_v63  ;;  %6443 = vmatprep.mubr.msk.f32.mxu1 %vm493_vm2, %v7684_v32 }
  0x6d   : > { %6244 = vmatmul.mubr.msk.f32.gmra.mrb[10].mxu0 %vm493_vm2, %v7634_v0  ;;  %6444 = vmatmul.mubr.msk.f32.gmra.mrb[10].mxu1 %vm493_vm2, %v7703_v44 }
  0x6e   : > { %6246 = vmatprep.mubr.msk.f32.mxu0 %vm493_vm2, %v7662_v16  ;;  %6446 = vmatprep.mubr.msk.f32.mxu1 %vm493_vm2, %v7713_v49 }
  0x71   : > { %6247 = vmatmul.mubr.msk.f32.gmra.mrb[12].mxu0 %vm493_vm2, %v7665_v17  ;;  %6447 = vmatmul.mubr.msk.f32.gmra.mrb[12].mxu1 %vm493_vm2, %v7738_v9 }
  0x72   : > { %6249 = vmatprep.mubr.msk.f32.mxu0 %vm493_vm2, %v7693_v40  ;;  %6449 = vmatprep.mubr.msk.f32.mxu1 %vm493_vm2, %v7746_v19 }
  0x75   : > { %6250 = vmatmul.mubr.msk.f32.gmra.mrb[14].mxu0 %vm493_vm2, %v7696_v41  ;;  %6450 = vmatmul.mubr.msk.f32.gmra.mrb[14].mxu1 %vm493_vm2, %v7765_v50 }
  0x76   : > { %6252 = vmatprep.mubr.msk.f32.mxu0 %vm493_vm2, %v7724_v62  ;;  %6452 = vmatprep.mubr.msk.f32.mxu1 %vm493_vm2, %v7775_v52 }
  0x79   : > { %6253 = vmatmul.mubr.msk.f32.gmra.mrb[16].mxu0 %vm493_vm2, %v7727_v6  ;;  %6453 = vmatmul.mubr.msk.f32.gmra.mrb[16].mxu1 %vm493_vm2, %v7800_v28 }
  0x7a   : > { %6255 = vmatprep.mubr.msk.f32.mxu0 %vm493_vm2, %v7755_v39  ;;  %6455 = vmatprep.mubr.msk.f32.mxu1 %vm493_vm2, %v7808_v51 }
  0x7d   : > { %6256 = vmatmul.mubr.msk.f32.gmra.mrb[18].mxu0 %vm493_vm2, %v7758_v38  ;;  %6456 = vmatmul.mubr.msk.f32.gmra.mrb[18].mxu1 %vm493_vm2, %v7827_v56 }
  0x7e   : > { %6258 = vmatprep.mubr.msk.f32.mxu0 %vm493_vm2, %v7786_v45  ;;  %6458 = vmatprep.mubr.msk.f32.mxu1 %vm493_vm2, %v9674_v4 }
  0x81   : > { %6259 = vmatmul.mubr.msk.f32.gmra.mrb[20].mxu0 %vm493_vm2, %v9675_v5  ;;  %6459 = vmatmul.mubr.msk.f32.gmra.mrb[20].mxu1 %vm493_vm2, %v9676_v18 }
  0x82   : > { %6261 = vmatprep.mubr.msk.f32.mxu0 %vm493_vm2, %v9677_v25  ;;  %6461 = vmatprep.mubr.msk.f32.mxu1 %vm493_vm2, %v9678_v30 }
  0x85   : > { %6262 = vmatmul.mubr.msk.f32.gmra.mrb[22].mxu0 %vm493_vm2, %v9679_v36  ;;  %6462 = vmatmul.mubr.msk.f32.gmra.mrb[22].mxu1 %vm493_vm2, %v9680_v31 }
  0x86   : > { %6264 = vmatprep.mubr.msk.f32.mxu0 %vm493_vm2, %v9681_v2  ;;  %6464 = vmatprep.mubr.msk.f32.mxu1 %vm493_vm2, %v9682_v26 }
  0x89   : > { %6265 = vmatmul.mubr.msk.f32.gmra.mrb[24].mxu0 %vm493_vm2, %v9683_v24  ;;  %6465 = vmatmul.mubr.msk.f32.gmra.mrb[24].mxu1 %vm493_vm2, %v7924_v59 }
  0x8a   : > { %6267 = vmatprep.mubr.msk.f32.mxu0 %vm493_vm2, %v9684_v20  ;;  %6467 = vmatprep.mubr.msk.f32.mxu1 %vm493_vm2, %v7932_v57 }
  0x8d   : > { %6268 = vmatmul.mubr.msk.f32.gmra.mrb[26].mxu0 %vm493_vm2, %v9685_v34  ;;  %6468 = vmatmul.mubr.msk.f32.gmra.mrb[26].mxu1 %vm493_vm2, %v7951_v53 }
  0x8e   : > { %6270 = vmatprep.mubr.msk.f32.mxu0 %vm493_vm2, %v9686_v14  ;;  %6470 = vmatprep.mubr.msk.f32.mxu1 %vm493_vm2, %v7961_v15 }
  0x91   : > { %6271 = vmatmul.mubr.msk.f32.gmra.mrb[28].mxu0 %vm493_vm2, %v9687_v60  ;;  %6471 = vmatmul.mubr.msk.f32.gmra.mrb[28].mxu1 %vm493_vm2, %v7980_v7 }
  0x92   : > { %6273 = vmatprep.mubr.msk.f32.mxu0 %vm493_vm2, %v9688_v13  ;;  %6473 = vmatprep.mubr.msk.f32.mxu1 %vm493_vm2, %v7986_v42 }
  0x95   : > { %6274 = vmatmul.mubr.msk.f32.gmra.mrb[30].mxu0 %vm493_vm2, %v9689_v10  ;;  %6474 = vmatmul.mubr.msk.f32.gmra.mrb[30].mxu1 %vm493_vm2, %v8000_v33 }
  0x96   : > { %6278 = vmatprep.mubr.msk.f32.mxu0 %vm493_vm2, %v7515_v11  ;;  %6478 = vmatprep.mubr.msk.f32.mxu1 %vm493_vm2, %v7544_v27  ;;  %v8274_v11 = vld [vmem:[%s7501_s27 + $0x180] sm:$0xff] }
  0x97   : > { %9690 = vst [vmem:[#allocation32_spill] sm:$0xff] %v8274_v11 }
  0x99   : > { %6279 = vmatmul.mubr.msk.f32.vlgmr.msra.gmra.mrb[0].mxu0 %vm493_vm2, %v7518_v12  ;;  %6479 = vmatmul.mubr.msk.f32.vlgmr.msra.gmra.mrb[0].mxu1 %vm493_vm2, %v7573_v37  ;;  %v8277_v12 = vld [vmem:[%s7501_s27 + $0x188] sm:$0xff] }
  0x9a   : > { %6327 = vmatpush3.msk.msra.mxu0 %vm558_vm0, %v8020_v48  ;;  %6527 = vmatpush3.msk.msra.mxu1 %vm558_vm0, %v8025_v8  ;;  %9691 = vst [vmem:[#allocation36_spill] sm:$0xff] %v8277_v12  ;;  %v8330_v48 = vld [vmem:[%s9482_s1 + $0x20] sm:$0xf]  ;;  %v8335_v8 = vld [vmem:[%s9482_s1 + $0x30] sm:$0xf] }
  0x9b   : > { %6281 = vmatprep.mubr.msk.f32.mxu0 %vm493_vm2, %v7530_v22  ;;  %6481 = vmatprep.mubr.msk.f32.mxu1 %vm493_vm2, %v7586_v43  ;;  %v388_v22 = vrot.slane %v8274_v11, 1 }
  0x9c   : > { %6576 = vmatprep.subr.msk.mxu0 %vm558_vm0, %v8166_v55  ;;  %6776 = vmatprep.subr.msk.mxu1 %vm558_vm0, %v8171_v61 }
  0x9d   : > { %6282 = vmatmul.mubr.msk.f32.gmra.mrb[2].mxu0 %vm493_vm2, %v7533_v23  ;;  %6482 = vmatmul.mubr.msk.f32.gmra.mrb[2].mxu1 %vm493_vm2, %v7614_v54  ;;  %v389_v23 = vrot.slane %v8277_v12, 1 }
  0x9e   : > { %6284 = vmatprep.mubr.msk.f32.mxu0 %vm493_vm2, %v7547_v29  ;;  %6484 = vmatprep.mubr.msk.f32.mxu1 %vm493_vm2, %v7622_v58  ;;  %v8290_v29 = vld [vmem:[%s7501_s27 + $0x190] sm:$0x3] }
  0xa1   : > { %6285 = vmatmul.mubr.msk.f32.gmra.mrb[4].mxu0 %vm493_vm2, %v7563_v35  ;;  %6485 = vmatmul.mubr.msk.f32.gmra.mrb[4].mxu1 %vm493_vm2, %v7641_v1  ;;  %v391_v35 = vrot.slane %v8290_v29, 1 }
  0xa2   : > { %6287 = vmatprep.mubr.msk.f32.mxu0 %vm493_vm2, %v7590_v46  ;;  %6487 = vmatprep.mubr.msk.f32.mxu1 %vm493_vm2, %v7651_v3  ;;  %v8302_v46 = vsel %vm307_vm1, %v388_v22, %v389_v23  ;;  %v9694_v22 = vld [vmem:[#allocation4_spill] sm:$0xff] }
  0xa5   : > { %6288 = vmatmul.mubr.msk.f32.gmra.mrb[6].mxu0 %vm493_vm2, %v7593_v47  ;;  %6488 = vmatmul.mubr.msk.f32.gmra.mrb[6].mxu1 %vm493_vm2, %v7676_v21  ;;  %v8313_v47 = vsel %vm307_vm1, %v389_v23, %v391_v35  ;;  %v9695_v23 = vld [vmem:[#allocation5_spill] sm:$0xff]  ;;  %v9698_v35 = vld [vmem:[#allocation8_spill] sm:$0xff] }
  0xa6   : > { %6290 = vmatprep.mubr.msk.f32.mxu0 %vm493_vm2, %v7631_v63  ;;  %6490 = vmatprep.mubr.msk.f32.mxu1 %vm493_vm2, %v7684_v32  ;;  %v9692_v63 = vld [vmem:[#allocation2_spill] sm:$0xff] }
  0xa9   : > { %6291 = vmatmul.mubr.msk.f32.gmra.mrb[8].mxu0 %vm493_vm2, %v7634_v0  ;;  %6491 = vmatmul.mubr.msk.f32.gmra.mrb[8].mxu1 %vm493_vm2, %v7703_v44  ;;  %v9693_v0 = vld [vmem:[#allocation3_spill] sm:$0xff] }
  0xaa   : > { %6293 = vmatprep.mubr.msk.f32.mxu0 %vm493_vm2, %v7662_v16  ;;  %6493 = vmatprep.mubr.msk.f32.mxu1 %vm493_vm2, %v7713_v49  ;;  %v9718_v16 = vld [vmem:[#allocation55_spill] sm:$0xff] }
  0xad   : > { %6294 = vmatmul.mubr.msk.f32.gmra.mrb[10].mxu0 %vm493_vm2, %v7665_v17  ;;  %6494 = vmatmul.mubr.msk.f32.gmra.mrb[10].mxu1 %vm493_vm2, %v7738_v9  ;;  %v9717_v17 = vld [vmem:[#allocation53_spill] sm:$0xff] }
  0xae   : > { %6296 = vmatprep.mubr.msk.f32.mxu0 %vm493_vm2, %v7693_v40  ;;  %6496 = vmatprep.mubr.msk.f32.mxu1 %vm493_vm2, %v7746_v19  ;;  %v9716_v40 = vld [vmem:[#allocation50_spill] sm:$0xff] }
  0xb1   : > { %6297 = vmatmul.mubr.msk.f32.gmra.mrb[12].mxu0 %vm493_vm2, %v7696_v41  ;;  %6497 = vmatmul.mubr.msk.f32.gmra.mrb[12].mxu1 %vm493_vm2, %v7765_v50  ;;  %v9715_v41 = vld [vmem:[#allocation49_spill] sm:$0xff] }
  0xb2   : > { %6299 = vmatprep.mubr.msk.f32.mxu0 %vm493_vm2, %v7724_v62  ;;  %6499 = vmatprep.mubr.msk.f32.mxu1 %vm493_vm2, %v7775_v52  ;;  %v9714_v62 = vld [vmem:[#allocation45_spill] sm:$0xff] }
  0xb5   : > { %6300 = vmatmul.mubr.msk.f32.gmra.mrb[14].mxu0 %vm493_vm2, %v7727_v6  ;;  %6500 = vmatmul.mubr.msk.f32.gmra.mrb[14].mxu1 %vm493_vm2, %v7800_v28  ;;  %v9713_v6 = vld [vmem:[#allocation43_spill] sm:$0xff] }
  0xb6   : > { %6302 = vmatprep.mubr.msk.f32.mxu0 %vm493_vm2, %v7755_v39  ;;  %6502 = vmatprep.mubr.msk.f32.mxu1 %vm493_vm2, %v7808_v51  ;;  %v9712_v39 = vld [vmem:[#allocation39_spill] sm:$0xff] }
  0xb9   : > { %6303 = vmatmul.mubr.msk.f32.gmra.mrb[16].mxu0 %vm493_vm2, %v7758_v38  ;;  %6503 = vmatmul.mubr.msk.f32.gmra.mrb[16].mxu1 %vm493_vm2, %v7827_v56  ;;  %v9711_v38 = vld [vmem:[#allocation37_spill] sm:$0xff] }
  0xba   : > { %6305 = vmatprep.mubr.msk.f32.mxu0 %vm493_vm2, %v7786_v45  ;;  %6505 = vmatprep.mubr.msk.f32.mxu1 %vm493_vm2, %v9674_v4  ;;  %v9710_v45 = vld [vmem:[#allocation33_spill] sm:$0xff] }
  0xbd   : > { %6306 = vmatmul.mubr.msk.f32.gmra.mrb[18].mxu0 %vm493_vm2, %v9675_v5  ;;  %6506 = vmatmul.mubr.msk.f32.gmra.mrb[18].mxu1 %vm493_vm2, %v9676_v18  ;;  %v9709_v5 = vld [vmem:[#allocation31_spill] sm:$0xff] }
  0xbe   : > { %6308 = vmatprep.mubr.msk.f32.mxu0 %vm493_vm2, %v9677_v25  ;;  %6508 = vmatprep.mubr.msk.f32.mxu1 %vm493_vm2, %v9678_v30  ;;  %v9708_v25 = vld [vmem:[#allocation28_spill] sm:$0xff] }
  0xc1   : > { %6309 = vmatmul.mubr.msk.f32.gmra.mrb[20].mxu0 %vm493_vm2, %v9679_v36  ;;  %6509 = vmatmul.mubr.msk.f32.gmra.mrb[20].mxu1 %vm493_vm2, %v9680_v31  ;;  %v9707_v36 = vld [vmem:[#allocation27_spill] sm:$0xff] }
  0xc2   : > { %6311 = vmatprep.mubr.msk.f32.mxu0 %vm493_vm2, %v9681_v2  ;;  %6511 = vmatprep.mubr.msk.f32.mxu1 %vm493_vm2, %v9682_v26  ;;  %v9706_v2 = vld [vmem:[#allocation24_spill] sm:$0xff] }
  0xc5   : > { %6312 = vmatmul.mubr.msk.f32.gmra.mrb[22].mxu0 %vm493_vm2, %v9683_v24  ;;  %6512 = vmatmul.mubr.msk.f32.gmra.mrb[22].mxu1 %vm493_vm2, %v7924_v59  ;;  %v9705_v24 = vld [vmem:[#allocation23_spill] sm:$0xff] }
  0xc6   : > { %6314 = vmatprep.mubr.msk.f32.mxu0 %vm493_vm2, %v9684_v20  ;;  %6514 = vmatprep.mubr.msk.f32.mxu1 %vm493_vm2, %v7932_v57  ;;  %v9704_v20 = vld [vmem:[#allocation20_spill] sm:$0xff] }
  0xc9   : > { %6315 = vmatmul.mubr.msk.f32.gmra.mrb[24].mxu0 %vm493_vm2, %v9685_v34  ;;  %6515 = vmatmul.mubr.msk.f32.gmra.mrb[24].mxu1 %vm493_vm2, %v7951_v53  ;;  %v9703_v34 = vld [vmem:[#allocation19_spill] sm:$0xff] }
  0xca   : > { %6317 = vmatprep.mubr.msk.f32.mxu0 %vm493_vm2, %v9686_v14  ;;  %6517 = vmatprep.mubr.msk.f32.mxu1 %vm493_vm2, %v7961_v15  ;;  %v9702_v14 = vld [vmem:[#allocation16_spill] sm:$0xff] }
  0xcd   : > { %6318 = vmatmul.mubr.msk.f32.gmra.mrb[26].mxu0 %vm493_vm2, %v9687_v60  ;;  %6518 = vmatmul.mubr.msk.f32.gmra.mrb[26].mxu1 %vm493_vm2, %v7980_v7  ;;  %v9701_v60 = vld [vmem:[#allocation15_spill] sm:$0xff] }
  0xce   : > { %6320 = vmatprep.mubr.msk.f32.mxu0 %vm493_vm2, %v9688_v13  ;;  %6520 = vmatprep.mubr.msk.f32.mxu1 %vm493_vm2, %v7986_v42  ;;  %v9700_v13 = vld [vmem:[#allocation12_spill] sm:$0xff] }
  0xd1   : > { %6321 = vmatmul.mubr.msk.f32.gmra.mrb[28].mxu0 %vm493_vm2, %v9689_v10  ;;  %6521 = vmatmul.mubr.msk.f32.gmra.mrb[28].mxu1 %vm493_vm2, %v8000_v33  ;;  %v9699_v10 = vld [vmem:[#allocation11_spill] sm:$0xff] }
  0xd2   : > { %6323 = vmatprep.mubr.msk.f32.mxu0 %vm493_vm2, %v8274_v11  ;;  %6523 = vmatprep.mubr.msk.f32.mxu1 %vm493_vm2, %v8302_v46 }
  0xd5   : > { %6324 = vmatmul.mubr.msk.f32.gmra.mrb[30].mxu0 %vm493_vm2, %v8277_v12  ;;  %6524 = vmatmul.mubr.msk.f32.gmra.mrb[30].mxu1 %vm493_vm2, %v8313_v47 }
  0xd6   : > { %6328 = vmatprep.mubr.msk.f32.mxu0 %vm493_vm2, %v7544_v27  ;;  %6528 = vmatprep.mubr.msk.f32.mxu1 %vm493_vm2, %v9692_v63 }
  0xd9   : > { %6329 = vmatmul.mubr.msk.f32.vlgmr.msra.gmra.mrb[0].mxu0 %vm493_vm2, %v7573_v37  ;;  %6529 = vmatmul.mubr.msk.f32.vlgmr.msra.gmra.mrb[0].mxu1 %vm493_vm2, %v9693_v0 }
  0xda   : > { %6577 = vmatpush3.msk.msra.mxu0 %vm558_vm0, %v8166_v55  ;;  %6777 = vmatpush3.msk.msra.mxu1 %vm558_vm0, %v8171_v61  ;;  %v9696_v55 = vld [vmem:[#allocation6_spill] sm:$0xff]  ;;  %v9697_v61 = vld [vmem:[#allocation7_spill] sm:$0xff] }
  0xdb   : > { %6331 = vmatprep.mubr.msk.f32.mxu0 %vm493_vm2, %v7586_v43  ;;  %6531 = vmatprep.mubr.msk.f32.mxu1 %vm493_vm2, %v9694_v22 }
  0xdc   : > { %6626 = vmatprep.subr.msk.mxu0 %vm558_vm0, %v8330_v48  ;;  %6826 = vmatprep.subr.msk.mxu1 %vm558_vm0, %v8335_v8 }
  0xdd   : > { %6332 = vmatmul.mubr.msk.f32.gmra.mrb[2].mxu0 %vm493_vm2, %v7614_v54  ;;  %6532 = vmatmul.mubr.msk.f32.gmra.mrb[2].mxu1 %vm493_vm2, %v9695_v23 }
  0xde   : > { %6334 = vmatprep.mubr.msk.f32.mxu0 %vm493_vm2, %v7622_v58  ;;  %6534 = vmatprep.mubr.msk.f32.mxu1 %vm493_vm2, %v9696_v55 }
  0xe1   : > { %6335 = vmatmul.mubr.msk.f32.gmra.mrb[4].mxu0 %vm493_vm2, %v7641_v1  ;;  %6535 = vmatmul.mubr.msk.f32.gmra.mrb[4].mxu1 %vm493_vm2, %v9697_v61 }
  0xe2   : > { %6337 = vmatprep.mubr.msk.f32.mxu0 %vm493_vm2, %v7651_v3  ;;  %6537 = vmatprep.mubr.msk.f32.mxu1 %vm493_vm2, %v9698_v35 }
  0xe5   : > { %6338 = vmatmul.mubr.msk.f32.gmra.mrb[6].mxu0 %vm493_vm2, %v7676_v21  ;;  %6538 = vmatmul.mubr.msk.f32.gmra.mrb[6].mxu1 %vm493_vm2, %v9699_v10 }
  0xe6   : > { %6340 = vmatprep.mubr.msk.f32.mxu0 %vm493_vm2, %v7684_v32  ;;  %6540 = vmatprep.mubr.msk.f32.mxu1 %vm493_vm2, %v9700_v13 }
  0xe9   : > { %6341 = vmatmul.mubr.msk.f32.gmra.mrb[8].mxu0 %vm493_vm2, %v7703_v44  ;;  %6541 = vmatmul.mubr.msk.f32.gmra.mrb[8].mxu1 %vm493_vm2, %v9701_v60 }
  0xea   : > { %6343 = vmatprep.mubr.msk.f32.mxu0 %vm493_vm2, %v7713_v49  ;;  %6543 = vmatprep.mubr.msk.f32.mxu1 %vm493_vm2, %v9702_v14 }
  0xed   : > { %6344 = vmatmul.mubr.msk.f32.gmra.mrb[10].mxu0 %vm493_vm2, %v7738_v9  ;;  %6544 = vmatmul.mubr.msk.f32.gmra.mrb[10].mxu1 %vm493_vm2, %v9703_v34 }
  0xee   : > { %6346 = vmatprep.mubr.msk.f32.mxu0 %vm493_vm2, %v7746_v19  ;;  %6546 = vmatprep.mubr.msk.f32.mxu1 %vm493_vm2, %v9704_v20 }
  0xf1   : > { %6347 = vmatmul.mubr.msk.f32.gmra.mrb[12].mxu0 %vm493_vm2, %v7765_v50  ;;  %6547 = vmatmul.mubr.msk.f32.gmra.mrb[12].mxu1 %vm493_vm2, %v9705_v24 }
  0xf2   : > { %6349 = vmatprep.mubr.msk.f32.mxu0 %vm493_vm2, %v7775_v52  ;;  %6549 = vmatprep.mubr.msk.f32.mxu1 %vm493_vm2, %v9706_v2 }
  0xf5   : > { %6350 = vmatmul.mubr.msk.f32.gmra.mrb[14].mxu0 %vm493_vm2, %v7800_v28  ;;  %6550 = vmatmul.mubr.msk.f32.gmra.mrb[14].mxu1 %vm493_vm2, %v9707_v36 }
  0xf6   : > { %6352 = vmatprep.mubr.msk.f32.mxu0 %vm493_vm2, %v7808_v51  ;;  %6552 = vmatprep.mubr.msk.f32.mxu1 %vm493_vm2, %v9708_v25 }
  0xf9   : > { %6353 = vmatmul.mubr.msk.f32.gmra.mrb[16].mxu0 %vm493_vm2, %v7827_v56  ;;  %6553 = vmatmul.mubr.msk.f32.gmra.mrb[16].mxu1 %vm493_vm2, %v9709_v5 }
  0xfa   : > { %6355 = vmatprep.mubr.msk.f32.mxu0 %vm493_vm2, %v9674_v4  ;;  %6555 = vmatprep.mubr.msk.f32.mxu1 %vm493_vm2, %v9710_v45 }
  0xfd   : > { %6356 = vmatmul.mubr.msk.f32.gmra.mrb[18].mxu0 %vm493_vm2, %v9676_v18  ;;  %6556 = vmatmul.mubr.msk.f32.gmra.mrb[18].mxu1 %vm493_vm2, %v9711_v38 }
  0xfe   : > { %6358 = vmatprep.mubr.msk.f32.mxu0 %vm493_vm2, %v9678_v30  ;;  %6558 = vmatprep.mubr.msk.f32.mxu1 %vm493_vm2, %v9712_v39 }
 0x101   : > { %6359 = vmatmul.mubr.msk.f32.gmra.mrb[20].mxu0 %vm493_vm2, %v9680_v31  ;;  %6559 = vmatmul.mubr.msk.f32.gmra.mrb[20].mxu1 %vm493_vm2, %v9713_v6 }
 0x102   : > { %6361 = vmatprep.mubr.msk.f32.mxu0 %vm493_vm2, %v9682_v26  ;;  %6561 = vmatprep.mubr.msk.f32.mxu1 %vm493_vm2, %v9714_v62 }
 0x105   : > { %6362 = vmatmul.mubr.msk.f32.gmra.mrb[22].mxu0 %vm493_vm2, %v7924_v59  ;;  %6562 = vmatmul.mubr.msk.f32.gmra.mrb[22].mxu1 %vm493_vm2, %v9715_v41  ;;  %v479_v41 = vrot.slane %v8274_v11, 2  ;;  %v480_v59 = vrot.slane %v8277_v12, 2  ;;  %v9722_v12 = vld [vmem:[#allocation58_spill] sm:$0xff] }
 0x106   : > { %6364 = vmatprep.mubr.msk.f32.mxu0 %vm493_vm2, %v7932_v57  ;;  %6564 = vmatprep.mubr.msk.f32.mxu1 %vm493_vm2, %v9716_v40  ;;  %v9719_v40 = vld [vmem:[#allocation56_spill] sm:$0xff] }
 0x109   : > { %6365 = vmatmul.mubr.msk.f32.gmra.mrb[24].mxu0 %vm493_vm2, %v7951_v53  ;;  %6565 = vmatmul.mubr.msk.f32.gmra.mrb[24].mxu1 %vm493_vm2, %v9717_v17  ;;  %v9720_v17 = vld [vmem:[#allocation57_spill] sm:$0xff] }
 0x10a   : > { %6367 = vmatprep.mubr.msk.f32.mxu0 %vm493_vm2, %v7961_v15  ;;  %6567 = vmatprep.mubr.msk.f32.mxu1 %vm493_vm2, %v9718_v16  ;;  %v482_v15 = vrot.slane %v8290_v29, 2  ;;  %v8457_v16 = vsel %vm398_vm3, %v479_v41, %v480_v59  ;;  %v8485_v41 = vld [vmem:[%s9482_s1 + $0x28] sm:$0xf]  ;;  %v9725_v29 = vld [vmem:[#allocation49_spill] sm:$0xff] }
 0x10b   : > { %9721 = vst [vmem:[#allocation38_spill] sm:$0xff] %v8457_v16 }
 0x10c   : > { %v8468_v11 = vsel %vm398_vm3, %v480_v59, %v482_v15  ;;  %v8490_v59 = vld [vmem:[%s9482_s1 + $0x38] sm:$0xf]  ;;  %v9724_v15 = vld [vmem:[#allocation48_spill] sm:$0xff] }
 0x10d   : > { %6368 = vmatmul.mubr.msk.f32.gmra.mrb[26].mxu0 %vm493_vm2, %v7980_v7  ;;  %6568 = vmatmul.mubr.msk.f32.gmra.mrb[26].mxu1 %vm493_vm2, %v9719_v40  ;;  %9723 = vst [vmem:[#allocation42_spill] sm:$0xff] %v8468_v11 }
 0x10e   : > { %6370 = vmatprep.mubr.msk.f32.mxu0 %vm493_vm2, %v7986_v42  ;;  %6570 = vmatprep.mubr.msk.f32.mxu1 %vm493_vm2, %v9720_v17 }
 0x111   : > { %6371 = vmatmul.mubr.msk.f32.gmra.mrb[28].mxu0 %vm493_vm2, %v8000_v33  ;;  %6571 = vmatmul.mubr.msk.f32.gmra.mrb[28].mxu1 %vm493_vm2, %v9722_v12 }
 0x112   : > { %6373 = vmatprep.mubr.msk.f32.mxu0 %vm493_vm2, %v8302_v46  ;;  %6573 = vmatprep.mubr.msk.f32.mxu1 %vm493_vm2, %v8457_v16 }
 0x115   : > { %6374 = vmatmul.mubr.msk.f32.gmra.mrb[30].mxu0 %vm493_vm2, %v8313_v47  ;;  %6574 = vmatmul.mubr.msk.f32.gmra.mrb[30].mxu1 %vm493_vm2, %v8468_v11 }
 0x116   : > { %6578 = vmatprep.mubr.msk.f32.mxu0 %vm493_vm2, %v7544_v27  ;;  %6778 = vmatprep.mubr.msk.f32.mxu1 %vm493_vm2, %v9692_v63  ;;  %v9726_v63 = vld [vmem:[#allocation50_spill] sm:$0xff] }
 0x119   : > { %6579 = vmatmul.mubr.msk.f32.vlgmr.msra.gmra.mrb[32].mxu0 %vm493_vm2, %v7573_v37  ;;  %6779 = vmatmul.mubr.msk.f32.vlgmr.msra.gmra.mrb[32].mxu1 %vm493_vm2, %v9693_v0  ;;  %v9727_v0 = vld [vmem:[#allocation53_spill] sm:$0xff] }
 0x11a   : > { %6627 = vmatpush3.msk.msra.mxu0 %vm558_vm0, %v8330_v48  ;;  %6827 = vmatpush3.msk.msra.mxu1 %vm558_vm0, %v8335_v8  ;;  %v9728_v48 = vld [vmem:[#allocation54_spill] sm:$0xff]  ;;  %v9729_v8 = vld [vmem:[#allocation55_spill] sm:$0xff] }
 0x11b   : > { %6581 = vmatprep.mubr.msk.f32.mxu0 %vm493_vm2, %v7586_v43  ;;  %6781 = vmatprep.mubr.msk.f32.mxu1 %vm493_vm2, %v9694_v22 }
 0x11c   : > { %6676 = vmatprep.subr.msk.mxu0 %vm558_vm0, %v8485_v41  ;;  %6876 = vmatprep.subr.msk.mxu1 %vm558_vm0, %v8490_v59 }
 0x11d   : > { %6582 = vmatmul.mubr.msk.f32.gmra.mrb[34].mxu0 %vm493_vm2, %v7614_v54  ;;  %6782 = vmatmul.mubr.msk.f32.gmra.mrb[34].mxu1 %vm493_vm2, %v9695_v23 }
 0x11e   : > { %6584 = vmatprep.mubr.msk.f32.mxu0 %vm493_vm2, %v7622_v58  ;;  %6784 = vmatprep.mubr.msk.f32.mxu1 %vm493_vm2, %v9696_v55 }
 0x121   : > { %6585 = vmatmul.mubr.msk.f32.gmra.mrb[36].mxu0 %vm493_vm2, %v7641_v1  ;;  %6785 = vmatmul.mubr.msk.f32.gmra.mrb[36].mxu1 %vm493_vm2, %v9697_v61 }
 0x122   : > { %6587 = vmatprep.mubr.msk.f32.mxu0 %vm493_vm2, %v7651_v3  ;;  %6787 = vmatprep.mubr.msk.f32.mxu1 %vm493_vm2, %v9698_v35 }
 0x125   : > { %6588 = vmatmul.mubr.msk.f32.gmra.mrb[38].mxu0 %vm493_vm2, %v7676_v21  ;;  %6788 = vmatmul.mubr.msk.f32.gmra.mrb[38].mxu1 %vm493_vm2, %v9699_v10 }
 0x126   : > { %6590 = vmatprep.mubr.msk.f32.mxu0 %vm493_vm2, %v7684_v32  ;;  %6790 = vmatprep.mubr.msk.f32.mxu1 %vm493_vm2, %v9700_v13 }
 0x129   : > { %6591 = vmatmul.mubr.msk.f32.gmra.mrb[40].mxu0 %vm493_vm2, %v7703_v44  ;;  %6791 = vmatmul.mubr.msk.f32.gmra.mrb[40].mxu1 %vm493_vm2, %v9701_v60 }
 0x12a   : > { %6593 = vmatprep.mubr.msk.f32.mxu0 %vm493_vm2, %v7713_v49  ;;  %6793 = vmatprep.mubr.msk.f32.mxu1 %vm493_vm2, %v9702_v14 }
 0x12d   : > { %6594 = vmatmul.mubr.msk.f32.gmra.mrb[42].mxu0 %vm493_vm2, %v7738_v9  ;;  %6794 = vmatmul.mubr.msk.f32.gmra.mrb[42].mxu1 %vm493_vm2, %v9703_v34 }
 0x12e   : > { %6596 = vmatprep.mubr.msk.f32.mxu0 %vm493_vm2, %v7746_v19  ;;  %6796 = vmatprep.mubr.msk.f32.mxu1 %vm493_vm2, %v9704_v20 }
 0x131   : > { %6597 = vmatmul.mubr.msk.f32.gmra.mrb[44].mxu0 %vm493_vm2, %v7765_v50  ;;  %6797 = vmatmul.mubr.msk.f32.gmra.mrb[44].mxu1 %vm493_vm2, %v9705_v24 }
 0x132   : > { %6599 = vmatprep.mubr.msk.f32.mxu0 %vm493_vm2, %v7775_v52  ;;  %6799 = vmatprep.mubr.msk.f32.mxu1 %vm493_vm2, %v9706_v2 }
 0x135   : > { %6600 = vmatmul.mubr.msk.f32.gmra.mrb[46].mxu0 %vm493_vm2, %v7800_v28  ;;  %6800 = vmatmul.mubr.msk.f32.gmra.mrb[46].mxu1 %vm493_vm2, %v9707_v36 }
 0x136   : > { %6602 = vmatprep.mubr.msk.f32.mxu0 %vm493_vm2, %v7808_v51  ;;  %6802 = vmatprep.mubr.msk.f32.mxu1 %vm493_vm2, %v9708_v25  ;;  %v9751_v25 = vld [vmem:[#allocation36_spill] sm:$0xff] }
 0x139   : > { %6603 = vmatmul.mubr.msk.f32.gmra.mrb[48].mxu0 %vm493_vm2, %v7827_v56  ;;  %6803 = vmatmul.mubr.msk.f32.gmra.mrb[48].mxu1 %vm493_vm2, %v9709_v5 }
 0x13a   : > { %6605 = vmatprep.mubr.msk.f32.mxu0 %vm493_vm2, %v9674_v4  ;;  %6805 = vmatprep.mubr.msk.f32.mxu1 %vm493_vm2, %v9710_v45 }
 0x13d   : > { %6606 = vmatmul.mubr.msk.f32.gmra.mrb[50].mxu0 %vm493_vm2, %v9676_v18  ;;  %6806 = vmatmul.mubr.msk.f32.gmra.mrb[50].mxu1 %vm493_vm2, %v9711_v38 }
 0x13e   : > { %6608 = vmatprep.mubr.msk.f32.mxu0 %vm493_vm2, %v9678_v30  ;;  %6808 = vmatprep.mubr.msk.f32.mxu1 %vm493_vm2, %v9712_v39  ;;  %v9749_v39 = vld [vmem:[#allocation52_spill] sm:$0xff] }
 0x141   : > { %6609 = vmatmul.mubr.msk.f32.gmra.mrb[52].mxu0 %vm493_vm2, %v9680_v31  ;;  %6809 = vmatmul.mubr.msk.f32.gmra.mrb[52].mxu1 %vm493_vm2, %v9713_v6 }
 0x142   : > { %6611 = vmatprep.mubr.msk.f32.mxu0 %vm493_vm2, %v9682_v26  ;;  %6811 = vmatprep.mubr.msk.f32.mxu1 %vm493_vm2, %v9714_v62  ;;  %v9733_v62 = vld [vmem:[#allocation14_spill] sm:$0xff] }
 0x145   : > { %6612 = vmatmul.mubr.msk.f32.gmra.mrb[54].mxu0 %vm493_vm2, %v9724_v15  ;;  %6812 = vmatmul.mubr.msk.f32.gmra.mrb[54].mxu1 %vm493_vm2, %v9725_v29  ;;  %v9732_v29 = vld [vmem:[#allocation13_spill] sm:$0xff] }
 0x146   : > { %6614 = vmatprep.mubr.msk.f32.mxu0 %vm493_vm2, %v7932_v57  ;;  %6814 = vmatprep.mubr.msk.f32.mxu1 %vm493_vm2, %v9726_v63  ;;  %v9731_v63 = vld [vmem:[#allocation10_spill] sm:$0xff] }
 0x149   : > { %6615 = vmatmul.mubr.msk.f32.gmra.mrb[56].mxu0 %vm493_vm2, %v7951_v53  ;;  %6815 = vmatmul.mubr.msk.f32.gmra.mrb[56].mxu1 %vm493_vm2, %v9727_v0  ;;  %v9730_v0 = vld [vmem:[#allocation9_spill] sm:$0xff] }
 0x14a   : > { %6617 = vmatprep.mubr.msk.f32.mxu0 %vm493_vm2, %v9728_v48  ;;  %6817 = vmatprep.mubr.msk.f32.mxu1 %vm493_vm2, %v9729_v8  ;;  %v8696_v8 = vld [vmem:[%s7501_s27 + $0x80] sm:$0xff] }
 0x14d   : > { %6618 = vmatmul.mubr.msk.f32.gmra.mrb[58].mxu0 %vm493_vm2, %v7980_v7  ;;  %6818 = vmatmul.mubr.msk.f32.gmra.mrb[58].mxu1 %vm493_vm2, %v9719_v40  ;;  %v8689_v40 = vld [vmem:[%s7501_s27 + $0x78] sm:$0xff] }
 0x14e   : > { %6620 = vmatprep.mubr.msk.f32.mxu0 %vm493_vm2, %v7986_v42  ;;  %6820 = vmatprep.mubr.msk.f32.mxu1 %vm493_vm2, %v9720_v17  ;;  %v7385_v17 = vld [vmem:[%s7501_s27 + $0x18] sm:$0xff] }
 0x151   : > { %6621 = vmatmul.mubr.msk.f32.gmra.mrb[60].mxu0 %vm493_vm2, %v8000_v33  ;;  %6821 = vmatmul.mubr.msk.f32.gmra.mrb[60].mxu1 %vm493_vm2, %v9722_v12  ;;  %v7386_v12 = vld [vmem:[%s7501_s27 + $0x20] sm:$0xff] }
 0x152   : > { %6623 = vmatprep.mubr.msk.f32.mxu0 %vm493_vm2, %v8302_v46  ;;  %6823 = vmatprep.mubr.msk.f32.mxu1 %vm493_vm2, %v8457_v16  ;;  %v8631_v16 = vld [vmem:[%s9482_s1 + $0x2c] sm:$0xf] }
 0x155   : > { %6624 = vmatmul.mubr.msk.f32.gmra.mrb[62].mxu0 %vm493_vm2, %v8313_v47  ;;  %6824 = vmatmul.mubr.msk.f32.gmra.mrb[62].mxu1 %vm493_vm2, %v8468_v11  ;;  %v8682_v11 = vld [vmem:[%s7501_s27 + $0x68] sm:$0xff] }
 0x156   : > { %6628 = vmatprep.mubr.msk.f32.mxu0 %vm493_vm2, %v7385_v17  ;;  %6828 = vmatprep.mubr.msk.f32.mxu1 %vm493_vm2, %v7544_v27  ;;  %v8636_v17 = vld [vmem:[%s9482_s1 + $0x3c] sm:$0xf]  ;;  %v8643_v27 = vld [vmem:[%s7501_s27 + $0x30] sm:$0xff] }
 0x159   : > { %6629 = vmatmul.mubr.msk.f32.vlgmr.msra.gmra.mrb[32].mxu0 %vm493_vm2, %v7386_v12  ;;  %6829 = vmatmul.mubr.msk.f32.vlgmr.msra.gmra.mrb[32].mxu1 %vm493_vm2, %v7573_v37  ;;  %v8654_v37 = vld [vmem:[%s7501_s27 + $0x38] sm:$0xff]  ;;  %v8661_v12 = vld [vmem:[%s7501_s27 + $0x48] sm:$0xff] }
 0x15a   : > { %6677 = vmatpush3.msk.msra.mxu0 %vm558_vm0, %v8485_v41  ;;  %6877 = vmatpush3.msk.msra.mxu1 %vm558_vm0, %v8490_v59  ;;  %v8668_v41 = vld [vmem:[%s7501_s27 + $0x50] sm:$0xff]  ;;  %v8675_v59 = vld [vmem:[%s7501_s27 + $0x60] sm:$0xff] }
 0x15b   : > { %6631 = vmatprep.mubr.msk.f32.mxu0 %vm493_vm2, %v8643_v27  ;;  %6831 = vmatprep.mubr.msk.f32.mxu1 %vm493_vm2, %v7586_v43 }
 0x15c   : > { %6726 = vmatprep.subr.msk.mxu0 %vm558_vm0, %v8631_v16  ;;  %6926 = vmatprep.subr.msk.mxu1 %vm558_vm0, %v8636_v17 }
 0x15d   : > { %6632 = vmatmul.mubr.msk.f32.gmra.mrb[34].mxu0 %vm493_vm2, %v8654_v37  ;;  %6832 = vmatmul.mubr.msk.f32.gmra.mrb[34].mxu1 %vm493_vm2, %v7614_v54 }
 0x15e   : > { %6634 = vmatprep.mubr.msk.f32.mxu0 %vm493_vm2, %v8661_v12  ;;  %6834 = vmatprep.mubr.msk.f32.mxu1 %vm493_vm2, %v7622_v58 }
 0x161   : > { %6635 = vmatmul.mubr.msk.f32.gmra.mrb[36].mxu0 %vm493_vm2, %v8668_v41  ;;  %6835 = vmatmul.mubr.msk.f32.gmra.mrb[36].mxu1 %vm493_vm2, %v7641_v1 }
 0x162   : > { %6637 = vmatprep.mubr.msk.f32.mxu0 %vm493_vm2, %v8675_v59  ;;  %6837 = vmatprep.mubr.msk.f32.mxu1 %vm493_vm2, %v7651_v3 }
 0x165   : > { %6638 = vmatmul.mubr.msk.f32.gmra.mrb[38].mxu0 %vm493_vm2, %v8682_v11  ;;  %6838 = vmatmul.mubr.msk.f32.gmra.mrb[38].mxu1 %vm493_vm2, %v7676_v21 }
 0x166   : > { %6640 = vmatprep.mubr.msk.f32.mxu0 %vm493_vm2, %v8689_v40  ;;  %6840 = vmatprep.mubr.msk.f32.mxu1 %vm493_vm2, %v7684_v32 }
 0x169   : > { %6641 = vmatmul.mubr.msk.f32.gmra.mrb[40].mxu0 %vm493_vm2, %v8696_v8  ;;  %6841 = vmatmul.mubr.msk.f32.gmra.mrb[40].mxu1 %vm493_vm2, %v7703_v44 }
 0x16a   : > { %6643 = vmatprep.mubr.msk.f32.mxu0 %vm493_vm2, %v9730_v0  ;;  %6843 = vmatprep.mubr.msk.f32.mxu1 %vm493_vm2, %v7713_v49  ;;  %v9734_v0 = vld [vmem:[#allocation17_spill] sm:$0xff] }
 0x16d   : > { %6644 = vmatmul.mubr.msk.f32.gmra.mrb[42].mxu0 %vm493_vm2, %v9731_v63  ;;  %6844 = vmatmul.mubr.msk.f32.gmra.mrb[42].mxu1 %vm493_vm2, %v7738_v9  ;;  %v9735_v63 = vld [vmem:[#allocation18_spill] sm:$0xff] }
 0x16e   : > { %6646 = vmatprep.mubr.msk.f32.mxu0 %vm493_vm2, %v9732_v29  ;;  %6846 = vmatprep.mubr.msk.f32.mxu1 %vm493_vm2, %v7746_v19  ;;  %v9736_v29 = vld [vmem:[#allocation21_spill] sm:$0xff] }
 0x171   : > { %6647 = vmatmul.mubr.msk.f32.gmra.mrb[44].mxu0 %vm493_vm2, %v9733_v62  ;;  %6847 = vmatmul.mubr.msk.f32.gmra.mrb[44].mxu1 %vm493_vm2, %v7765_v50  ;;  %v9737_v62 = vld [vmem:[#allocation22_spill] sm:$0xff] }
 0x172   : > { %6649 = vmatprep.mubr.msk.f32.mxu0 %vm493_vm2, %v9734_v0  ;;  %6849 = vmatprep.mubr.msk.f32.mxu1 %vm493_vm2, %v7775_v52  ;;  %v9738_v0 = vld [vmem:[#allocation25_spill] sm:$0xff] }
 0x175   : > { %6650 = vmatmul.mubr.msk.f32.gmra.mrb[46].mxu0 %vm493_vm2, %v9735_v63  ;;  %6850 = vmatmul.mubr.msk.f32.gmra.mrb[46].mxu1 %vm493_vm2, %v7800_v28  ;;  %v9739_v63 = vld [vmem:[#allocation26_spill] sm:$0xff] }
 0x176   : > { %6652 = vmatprep.mubr.msk.f32.mxu0 %vm493_vm2, %v9736_v29  ;;  %6852 = vmatprep.mubr.msk.f32.mxu1 %vm493_vm2, %v7808_v51  ;;  %v9740_v29 = vld [vmem:[#allocation29_spill] sm:$0xff] }
 0x179   : > { %6653 = vmatmul.mubr.msk.f32.gmra.mrb[48].mxu0 %vm493_vm2, %v9737_v62  ;;  %6853 = vmatmul.mubr.msk.f32.gmra.mrb[48].mxu1 %vm493_vm2, %v7827_v56  ;;  %v9741_v62 = vld [vmem:[#allocation30_spill] sm:$0xff] }
 0x17a   : > { %6655 = vmatprep.mubr.msk.f32.mxu0 %vm493_vm2, %v9738_v0  ;;  %6855 = vmatprep.mubr.msk.f32.mxu1 %vm493_vm2, %v9674_v4  ;;  %v9742_v0 = vld [vmem:[#allocation34_spill] sm:$0xff] }
 0x17d   : > { %6656 = vmatmul.mubr.msk.f32.gmra.mrb[50].mxu0 %vm493_vm2, %v9739_v63  ;;  %6856 = vmatmul.mubr.msk.f32.gmra.mrb[50].mxu1 %vm493_vm2, %v9676_v18  ;;  %v9743_v63 = vld [vmem:[#allocation35_spill] sm:$0xff] }
 0x17e   : > { %6658 = vmatprep.mubr.msk.f32.mxu0 %vm493_vm2, %v9740_v29  ;;  %6858 = vmatprep.mubr.msk.f32.mxu1 %vm493_vm2, %v9678_v30  ;;  %v9744_v29 = vld [vmem:[#allocation40_spill] sm:$0xff] }
 0x181   : > { %6659 = vmatmul.mubr.msk.f32.gmra.mrb[52].mxu0 %vm493_vm2, %v9741_v62  ;;  %6859 = vmatmul.mubr.msk.f32.gmra.mrb[52].mxu1 %vm493_vm2, %v9680_v31  ;;  %v9745_v62 = vld [vmem:[#allocation41_spill] sm:$0xff] }
 0x182   : > { %6661 = vmatprep.mubr.msk.f32.mxu0 %vm493_vm2, %v9742_v0  ;;  %6861 = vmatprep.mubr.msk.f32.mxu1 %vm493_vm2, %v9682_v26  ;;  %v9746_v0 = vld [vmem:[#allocation46_spill] sm:$0xff] }
 0x185   : > { %6662 = vmatmul.mubr.msk.f32.gmra.mrb[54].mxu0 %vm493_vm2, %v9743_v63  ;;  %6862 = vmatmul.mubr.msk.f32.gmra.mrb[54].mxu1 %vm493_vm2, %v9724_v15  ;;  %v9747_v63 = vld [vmem:[#allocation47_spill] sm:$0xff] }
 0x186   : > { %6664 = vmatprep.mubr.msk.f32.mxu0 %vm493_vm2, %v9744_v29  ;;  %6864 = vmatprep.mubr.msk.f32.mxu1 %vm493_vm2, %v7932_v57  ;;  %v9748_v29 = vld [vmem:[#allocation51_spill] sm:$0xff] }
 0x189   : > { %6665 = vmatmul.mubr.msk.f32.gmra.mrb[56].mxu0 %vm493_vm2, %v9745_v62  ;;  %6865 = vmatmul.mubr.msk.f32.gmra.mrb[56].mxu1 %vm493_vm2, %v7951_v53  ;;  %v8779_v62 = vld [vmem:[%s7501_s27 + $0x198] sm:$0xff] }
 0x18a   : > { %6667 = vmatprep.mubr.msk.f32.mxu0 %vm493_vm2, %v9746_v0  ;;  %6867 = vmatprep.mubr.msk.f32.mxu1 %vm493_vm2, %v9728_v48  ;;  %v484_v6 = vrot.slane %v8779_v62, 2  ;;  %v8783_v0 = vld [vmem:[%s7501_s27 + $0x1a0] sm:$0xff] }
 0x18b   : > { %v485_v38 = vrot.slane %v8783_v0, 2 }
 0x18d   : > { %6668 = vmatmul.mubr.msk.f32.gmra.mrb[58].mxu0 %vm493_vm2, %v9747_v63  ;;  %6868 = vmatmul.mubr.msk.f32.gmra.mrb[58].mxu1 %vm493_vm2, %v7980_v7  ;;  %v8790_v63 = vld [vmem:[%s7501_s27 + $0x1a8] sm:$0x3]  ;;  %v8799_v5 = vsel %vm398_vm3, %v484_v6, %v485_v38 }
 0x18e   : > { %6670 = vmatprep.mubr.msk.f32.mxu0 %vm493_vm2, %v9748_v29  ;;  %6870 = vmatprep.mubr.msk.f32.mxu1 %vm493_vm2, %v7986_v42  ;;  %v9750_v29 = vld [vmem:[#allocation32_spill] sm:$0xff]  ;;  %v487_v45 = vrot.slane %v8790_v63, 2  ;;  %v7397_v6 = vld [vmem:[%s7501_s27 + $0xa8] sm:$0xff] }
 0x191   : > { %6671 = vmatmul.mubr.msk.f32.gmra.mrb[60].mxu0 %vm493_vm2, %v9749_v39  ;;  %6871 = vmatmul.mubr.msk.f32.gmra.mrb[60].mxu1 %vm493_vm2, %v8000_v33  ;;  %v8802_v39 = vsel %vm398_vm3, %v485_v38, %v487_v45  ;;  %v7396_v45 = vld [vmem:[%s7501_s27 + $0x98] sm:$0xff] }
 0x192   : > { %6673 = vmatprep.mubr.msk.f32.mxu0 %vm493_vm2, %v9750_v29  ;;  %6873 = vmatprep.mubr.msk.f32.mxu1 %vm493_vm2, %v8302_v46 }
 0x195   : > { %6674 = vmatmul.mubr.msk.f32.gmra.mrb[62].mxu0 %vm493_vm2, %v9751_v25  ;;  %6874 = vmatmul.mubr.msk.f32.gmra.mrb[62].mxu1 %vm493_vm2, %v8313_v47 }
 0x196   : > { %6678 = vmatprep.mubr.msk.f32.mxu0 %vm493_vm2, %v8643_v27  ;;  %6878 = vmatprep.mubr.msk.f32.mxu1 %vm493_vm2, %v7586_v43 }
 0x199   : > { %6679 = vmatmul.mubr.msk.f32.vlgmr.msra.gmra.mrb[32].mxu0 %vm493_vm2, %v8654_v37  ;;  %6879 = vmatmul.mubr.msk.f32.vlgmr.msra.gmra.mrb[32].mxu1 %vm493_vm2, %v7614_v54 }
 0x19a   : > { %6727 = vmatpush3.msk.msra.mxu0 %vm558_vm0, %v8631_v16  ;;  %6927 = vmatpush3.msk.msra.mxu1 %vm558_vm0, %v8636_v17  ;;  %v7395_v16 = vld [vmem:[%s7501_s27 + $0x90] sm:$0xff] }
 0x19b   : > { %6681 = vmatprep.mubr.msk.f32.mxu0 %vm493_vm2, %v8661_v12  ;;  %6881 = vmatprep.mubr.msk.f32.mxu1 %vm493_vm2, %v7622_v58  ;;  %v7398_v12 = vld [vmem:[%s7501_s27 + $0xb0] sm:$0xff] }
 0x19d   : > { %6682 = vmatmul.mubr.msk.f32.gmra.mrb[34].mxu0 %vm493_vm2, %v8668_v41  ;;  %6882 = vmatmul.mubr.msk.f32.gmra.mrb[34].mxu1 %vm493_vm2, %v7641_v1 }
 0x19e   : > { %6684 = vmatprep.mubr.msk.f32.mxu0 %vm493_vm2, %v8675_v59  ;;  %6884 = vmatprep.mubr.msk.f32.mxu1 %vm493_vm2, %v7651_v3 }
 0x1a1   : > { %6685 = vmatmul.mubr.msk.f32.gmra.mrb[36].mxu0 %vm493_vm2, %v8682_v11  ;;  %6885 = vmatmul.mubr.msk.f32.gmra.mrb[36].mxu1 %vm493_vm2, %v7676_v21 }
 0x1a2   : > { %6687 = vmatprep.mubr.msk.f32.mxu0 %vm493_vm2, %v8689_v40  ;;  %6887 = vmatprep.mubr.msk.f32.mxu1 %vm493_vm2, %v7684_v32  ;;  %v8856_v40 = vld [vmem:[%s9483_s2] ss:$0 sm:$0xff] }
 0x1a5   : > { %6688 = vmatmul.mubr.msk.f32.gmra.mrb[38].mxu0 %vm493_vm2, %v8696_v8  ;;  %6888 = vmatmul.mubr.msk.f32.gmra.mrb[38].mxu1 %vm493_vm2, %v7703_v44 }
 0x1a6   : > { %6690 = vmatprep.mubr.msk.f32.mxu0 %vm493_vm2, %v7395_v16  ;;  %6890 = vmatprep.mubr.msk.f32.mxu1 %vm493_vm2, %v7713_v49  ;;  %v7399_v16 = vld [vmem:[%s7501_s27 + $0xc0] sm:$0xff] }
 0x1a9   : > { %6691 = vmatmul.mubr.msk.f32.gmra.mrb[40].mxu0 %vm493_vm2, %v7396_v45  ;;  %6891 = vmatmul.mubr.msk.f32.gmra.mrb[40].mxu1 %vm493_vm2, %v7738_v9 }
 0x1aa   : > { %6693 = vmatprep.mubr.msk.f32.mxu0 %vm493_vm2, %v7397_v6  ;;  %6893 = vmatprep.mubr.msk.f32.mxu1 %vm493_vm2, %v7746_v19 }
 0x1ac   : > { %v6330_v38 = vpop.f32.mrb[0].mxu0  ;;  %v6530_v11 = vpop.f32.mrb[0].mxu1 }
 0x1ad   : > { %v1618_v8 = vadd.f32 %v6330_v38, %v8856_v40  ;;  %v2734_v17 = vadd.f32 %v6530_v11, %v8856_v40  ;;  %v1420_v27 = vpop.f32.mrb[1].mxu0  ;;  %v2542_v37 = vpop.f32.mrb[1].mxu1  ;;  %6694 = vmatmul.mubr.msk.f32.gmra.mrb[42].mxu0 %vm493_vm2, %v7398_v12  ;;  %6894 = vmatmul.mubr.msk.f32.gmra.mrb[42].mxu1 %vm493_vm2, %v7765_v50  ;;  %v7400_v12 = vld [vmem:[%s7501_s27 + $0xc8] sm:$0xff] }
 0x1ae   : > { %v1617_v41 = vadd.f32 %v8856_v40, %v1420_v27  ;;  %v2733_v59 = vadd.f32 %v8856_v40, %v2542_v37  ;;  %6696 = vmatprep.mubr.msk.f32.mxu0 %vm493_vm2, %v7399_v16  ;;  %6896 = vmatprep.mubr.msk.f32.mxu1 %vm493_vm2, %v7775_v52 }
 0x1af   : > { %1650 = vst.msk [vmem:[%s8865_s7 + $0x8] sm:$0xff] %vm493_vm2, %v1618_v8  ;;  %5278 = vst.msk [vmem:[%s8865_s7 + $0x108] sm:$0xff] %vm493_vm2, %v2734_v17 }
 0x1b0   : > { %1649 = vst.msk [vmem:[%s8865_s7] sm:$0xff] %vm493_vm2, %v1617_v41  ;;  %5277 = vst.msk [vmem:[%s8865_s7 + $0x100] sm:$0xff] %vm493_vm2, %v2733_v59  ;;  %v6333_v45 = vpop.f32.mrb[2].mxu0  ;;  %v6533_v6 = vpop.f32.mrb[2].mxu1  ;;  %v7401_v41 = vld [vmem:[%s7501_s27 + $0xd8] sm:$0xff] }
 0x1b1   : > { %v1620_v38 = vadd.f32 %v6333_v45, %v8856_v40  ;;  %v2736_v11 = vadd.f32 %v6533_v6, %v8856_v40  ;;  %v1430_v27 = vpop.f32.mrb[3].mxu0  ;;  %v2552_v37 = vpop.f32.mrb[3].mxu1  ;;  %6697 = vmatmul.mubr.msk.f32.gmra.mrb[44].mxu0 %vm493_vm2, %v7400_v12  ;;  %6897 = vmatmul.mubr.msk.f32.gmra.mrb[44].mxu1 %vm493_vm2, %v7800_v28  ;;  %v7402_v12 = vld [vmem:[%s7501_s27 + $0xe0] sm:$0xff] }
 0x1b2   : > { %v1619_v8 = vadd.f32 %v8856_v40, %v1430_v27  ;;  %v2735_v17 = vadd.f32 %v8856_v40, %v2552_v37  ;;  %6699 = vmatprep.mubr.msk.f32.mxu0 %vm493_vm2, %v7401_v41  ;;  %6899 = vmatprep.mubr.msk.f32.mxu1 %vm493_vm2, %v7808_v51 }
 0x1b3   : > { %1652 = vst.msk [vmem:[%s8865_s7 + $0x18] sm:$0xff] %vm493_vm2, %v1620_v38  ;;  %5280 = vst.msk [vmem:[%s8865_s7 + $0x118] sm:$0xff] %vm493_vm2, %v2736_v11 }
 0x1b4   : > { %1651 = vst.msk [vmem:[%s8865_s7 + $0x10] sm:$0xff] %vm493_vm2, %v1619_v8  ;;  %5279 = vst.msk [vmem:[%s8865_s7 + $0x110] sm:$0xff] %vm493_vm2, %v2735_v17  ;;  %v6336_v59 = vpop.f32.mrb[4].mxu0  ;;  %v6536_v16 = vpop.f32.mrb[4].mxu1  ;;  %v7403_v8 = vld [vmem:[%s7501_s27 + $0xf0] sm:$0xff] }
 0x1b5   : > { %v1622_v45 = vadd.f32 %v6336_v59, %v8856_v40  ;;  %v2738_v6 = vadd.f32 %v6536_v16, %v8856_v40  ;;  %v1440_v27 = vpop.f32.mrb[5].mxu0  ;;  %v2562_v37 = vpop.f32.mrb[5].mxu1  ;;  %6700 = vmatmul.mubr.msk.f32.gmra.mrb[46].mxu0 %vm493_vm2, %v7402_v12  ;;  %6900 = vmatmul.mubr.msk.f32.gmra.mrb[46].mxu1 %vm493_vm2, %v7827_v56  ;;  %v7404_v12 = vld [vmem:[%s7501_s27 + $0xf8] sm:$0xff] }
 0x1b6   : > { %v1621_v38 = vadd.f32 %v8856_v40, %v1440_v27  ;;  %v2737_v11 = vadd.f32 %v8856_v40, %v2562_v37  ;;  %6702 = vmatprep.mubr.msk.f32.mxu0 %vm493_vm2, %v7403_v8  ;;  %6902 = vmatprep.mubr.msk.f32.mxu1 %vm493_vm2, %v9674_v4 }
 0x1b7   : > { %1654 = vst.msk [vmem:[%s8865_s7 + $0x28] sm:$0xff] %vm493_vm2, %v1622_v45  ;;  %5282 = vst.msk [vmem:[%s8865_s7 + $0x128] sm:$0xff] %vm493_vm2, %v2738_v6 }
 0x1b8   : > { %1653 = vst.msk [vmem:[%s8865_s7 + $0x20] sm:$0xff] %vm493_vm2, %v1621_v38  ;;  %5281 = vst.msk [vmem:[%s8865_s7 + $0x120] sm:$0xff] %vm493_vm2, %v2737_v11  ;;  %v6339_v17 = vpop.f32.mrb[6].mxu0  ;;  %v6539_v41 = vpop.f32.mrb[6].mxu1  ;;  %v7405_v38 = vld [vmem:[%s7501_s27 + $0x108] sm:$0xff] }
 0x1b9   : > { %v1624_v59 = vadd.f32 %v6339_v17, %v8856_v40  ;;  %v2740_v16 = vadd.f32 %v6539_v41, %v8856_v40  ;;  %v1450_v27 = vpop.f32.mrb[7].mxu0  ;;  %v2572_v37 = vpop.f32.mrb[7].mxu1  ;;  %6703 = vmatmul.mubr.msk.f32.gmra.mrb[48].mxu0 %vm493_vm2, %v7404_v12  ;;  %6903 = vmatmul.mubr.msk.f32.gmra.mrb[48].mxu1 %vm493_vm2, %v9676_v18  ;;  %v7406_v12 = vld [vmem:[%s7501_s27 + $0x110] sm:$0xff] }
 0x1ba   : > { %v1623_v45 = vadd.f32 %v8856_v40, %v1450_v27  ;;  %v2739_v6 = vadd.f32 %v8856_v40, %v2572_v37  ;;  %6705 = vmatprep.mubr.msk.f32.mxu0 %vm493_vm2, %v7405_v38  ;;  %6905 = vmatprep.mubr.msk.f32.mxu1 %vm493_vm2, %v9678_v30 }
 0x1bb   : > { %1656 = vst.msk [vmem:[%s8865_s7 + $0x38] sm:$0xff] %vm493_vm2, %v1624_v59  ;;  %5284 = vst.msk [vmem:[%s8865_s7 + $0x138] sm:$0xff] %vm493_vm2, %v2740_v16 }
 0x1bc   : > { %1655 = vst.msk [vmem:[%s8865_s7 + $0x30] sm:$0xff] %vm493_vm2, %v1623_v45  ;;  %5283 = vst.msk [vmem:[%s8865_s7 + $0x130] sm:$0xff] %vm493_vm2, %v2739_v6  ;;  %v6342_v11 = vpop.f32.mrb[8].mxu0  ;;  %v6542_v8 = vpop.f32.mrb[8].mxu1  ;;  %v7407_v45 = vld [vmem:[%s7501_s27 + $0x120] sm:$0xff] }
 0x1bd   : > { %v1626_v17 = vadd.f32 %v6342_v11, %v8856_v40  ;;  %v2742_v41 = vadd.f32 %v6542_v8, %v8856_v40  ;;  %v1460_v27 = vpop.f32.mrb[9].mxu0  ;;  %v2582_v37 = vpop.f32.mrb[9].mxu1  ;;  %6706 = vmatmul.mubr.msk.f32.gmra.mrb[50].mxu0 %vm493_vm2, %v7406_v12  ;;  %6906 = vmatmul.mubr.msk.f32.gmra.mrb[50].mxu1 %vm493_vm2, %v9680_v31  ;;  %v7408_v12 = vld [vmem:[%s7501_s27 + $0x128] sm:$0xff] }
 0x1be   : > { %v1625_v59 = vadd.f32 %v8856_v40, %v1460_v27  ;;  %v2741_v16 = vadd.f32 %v8856_v40, %v2582_v37  ;;  %6708 = vmatprep.mubr.msk.f32.mxu0 %vm493_vm2, %v7407_v45  ;;  %6908 = vmatprep.mubr.msk.f32.mxu1 %vm493_vm2, %v9682_v26 }
 0x1bf   : > { %1658 = vst.msk [vmem:[%s8865_s7 + $0x48] sm:$0xff] %vm493_vm2, %v1626_v17  ;;  %5286 = vst.msk [vmem:[%s8865_s7 + $0x148] sm:$0xff] %vm493_vm2, %v2742_v41 }
 0x1c0   : > { %1657 = vst.msk [vmem:[%s8865_s7 + $0x40] sm:$0xff] %vm493_vm2, %v1625_v59  ;;  %5285 = vst.msk [vmem:[%s8865_s7 + $0x140] sm:$0xff] %vm493_vm2, %v2741_v16  ;;  %v6345_v6 = vpop.f32.mrb[10].mxu0  ;;  %v6545_v38 = vpop.f32.mrb[10].mxu1  ;;  %v7409_v59 = vld [vmem:[%s7501_s27 + $0x138] sm:$0xff] }
 0x1c1   : > { %v1628_v11 = vadd.f32 %v6345_v6, %v8856_v40  ;;  %v2744_v8 = vadd.f32 %v6545_v38, %v8856_v40  ;;  %v1470_v27 = vpop.f32.mrb[11].mxu0  ;;  %v2592_v37 = vpop.f32.mrb[11].mxu1  ;;  %6709 = vmatmul.mubr.msk.f32.gmra.mrb[52].mxu0 %vm493_vm2, %v7408_v12  ;;  %6909 = vmatmul.mubr.msk.f32.gmra.mrb[52].mxu1 %vm493_vm2, %v9724_v15  ;;  %v7410_v12 = vld [vmem:[%s7501_s27 + $0x140] sm:$0xff] }
 0x1c2   : > { %v1627_v17 = vadd.f32 %v8856_v40, %v1470_v27  ;;  %v2743_v41 = vadd.f32 %v8856_v40, %v2592_v37  ;;  %6711 = vmatprep.mubr.msk.f32.mxu0 %vm493_vm2, %v7409_v59  ;;  %6911 = vmatprep.mubr.msk.f32.mxu1 %vm493_vm2, %v7932_v57 }
 0x1c3   : > { %1660 = vst.msk [vmem:[%s8865_s7 + $0x58] sm:$0xff] %vm493_vm2, %v1628_v11  ;;  %5288 = vst.msk [vmem:[%s8865_s7 + $0x158] sm:$0xff] %vm493_vm2, %v2744_v8 }
 0x1c4   : > { %1659 = vst.msk [vmem:[%s8865_s7 + $0x50] sm:$0xff] %vm493_vm2, %v1627_v17  ;;  %5287 = vst.msk [vmem:[%s8865_s7 + $0x150] sm:$0xff] %vm493_vm2, %v2743_v41  ;;  %v6348_v16 = vpop.f32.mrb[12].mxu0  ;;  %v6548_v45 = vpop.f32.mrb[12].mxu1  ;;  %v7411_v17 = vld [vmem:[%s7501_s27 + $0x150] sm:$0xff] }
 0x1c5   : > { %v1630_v6 = vadd.f32 %v6348_v16, %v8856_v40  ;;  %v2746_v38 = vadd.f32 %v6548_v45, %v8856_v40  ;;  %v1480_v27 = vpop.f32.mrb[13].mxu0  ;;  %v2602_v37 = vpop.f32.mrb[13].mxu1  ;;  %6712 = vmatmul.mubr.msk.f32.gmra.mrb[54].mxu0 %vm493_vm2, %v7410_v12  ;;  %6912 = vmatmul.mubr.msk.f32.gmra.mrb[54].mxu1 %vm493_vm2, %v7951_v53  ;;  %v7412_v12 = vld [vmem:[%s7501_s27 + $0x158] sm:$0xff] }
 0x1c6   : > { %v1629_v11 = vadd.f32 %v8856_v40, %v1480_v27  ;;  %v2745_v8 = vadd.f32 %v8856_v40, %v2602_v37  ;;  %6714 = vmatprep.mubr.msk.f32.mxu0 %vm493_vm2, %v7411_v17  ;;  %6914 = vmatprep.mubr.msk.f32.mxu1 %vm493_vm2, %v9728_v48  ;;  %v394_v17 = vrot.slane %v8783_v0, 1 }
 0x1c7   : > { %1662 = vst.msk [vmem:[%s8865_s7 + $0x68] sm:$0xff] %vm493_vm2, %v1630_v6  ;;  %5290 = vst.msk [vmem:[%s8865_s7 + $0x168] sm:$0xff] %vm493_vm2, %v2746_v38 }
 0x1c8   : > { %1661 = vst.msk [vmem:[%s8865_s7 + $0x60] sm:$0xff] %vm493_vm2, %v1629_v11  ;;  %5289 = vst.msk [vmem:[%s8865_s7 + $0x160] sm:$0xff] %vm493_vm2, %v2745_v8  ;;  %v6351_v41 = vpop.f32.mrb[14].mxu0  ;;  %v6551_v59 = vpop.f32.mrb[14].mxu1  ;;  %v7413_v11 = vld [vmem:[%s7501_s27 + $0x168] sm:$0xff]  ;;  %v393_v8 = vrot.slane %v8779_v62, 1 }
 0x1c9   : > { %v1632_v16 = vadd.f32 %v6351_v41, %v8856_v40  ;;  %v2748_v45 = vadd.f32 %v6551_v59, %v8856_v40  ;;  %v1490_v27 = vpop.f32.mrb[15].mxu0  ;;  %v2612_v37 = vpop.f32.mrb[15].mxu1  ;;  %6715 = vmatmul.mubr.msk.f32.gmra.mrb[56].mxu0 %vm493_vm2, %v7412_v12  ;;  %6915 = vmatmul.mubr.msk.f32.gmra.mrb[56].mxu1 %vm493_vm2, %v7980_v7  ;;  %v7414_v12 = vld [vmem:[%s7501_s27 + $0x170] sm:$0xff] }
 0x1ca   : > { %v1631_v6 = vadd.f32 %v8856_v40, %v1490_v27  ;;  %v2747_v38 = vadd.f32 %v8856_v40, %v2612_v37  ;;  %6717 = vmatprep.mubr.msk.f32.mxu0 %vm493_vm2, %v7413_v11  ;;  %6917 = vmatprep.mubr.msk.f32.mxu1 %vm493_vm2, %v7986_v42  ;;  %v396_v11 = vrot.slane %v8790_v63, 1 }
 0x1cb   : > { %1664 = vst.msk [vmem:[%s8865_s7 + $0x78] sm:$0xff] %vm493_vm2, %v1632_v16  ;;  %5292 = vst.msk [vmem:[%s8865_s7 + $0x178] sm:$0xff] %vm493_vm2, %v2748_v45 }
 0x1cc   : > { %1663 = vst.msk [vmem:[%s8865_s7 + $0x70] sm:$0xff] %vm493_vm2, %v1631_v6  ;;  %5291 = vst.msk [vmem:[%s8865_s7 + $0x170] sm:$0xff] %vm493_vm2, %v2747_v38  ;;  %v6354_v41 = vpop.f32.mrb[16].mxu0  ;;  %v6554_v59 = vpop.f32.mrb[16].mxu1 }
 0x1cd   : > { %v1634_v27 = vadd.f32 %v6354_v41, %v8856_v40  ;;  %v2750_v16 = vadd.f32 %v6554_v59, %v8856_v40  ;;  %v1500_v37 = vpop.f32.mrb[17].mxu0  ;;  %v2622_v45 = vpop.f32.mrb[17].mxu1  ;;  %6718 = vmatmul.mubr.msk.f32.gmra.mrb[58].mxu0 %vm493_vm2, %v7414_v12  ;;  %6918 = vmatmul.mubr.msk.f32.gmra.mrb[58].mxu1 %vm493_vm2, %v8000_v33  ;;  %v9047_v41 = vsel %vm307_vm1, %v393_v8, %v394_v17 }
 0x1ce   : > { %v1633_v6 = vadd.f32 %v8856_v40, %v1500_v37  ;;  %v2749_v38 = vadd.f32 %v8856_v40, %v2622_v45  ;;  %6720 = vmatprep.mubr.msk.f32.mxu0 %vm493_vm2, %v9750_v29  ;;  %6920 = vmatprep.mubr.msk.f32.mxu1 %vm493_vm2, %v8302_v46  ;;  %v9066_v12 = vsel %vm307_vm1, %v394_v17, %v396_v11 }
 0x1cf   : > { %1666 = vst.msk [vmem:[%s8865_s7 + $0x88] sm:$0xff] %vm493_vm2, %v1634_v27  ;;  %5294 = vst.msk [vmem:[%s8865_s7 + $0x188] sm:$0xff] %vm493_vm2, %v2750_v16 }
 0x1d0   : > { %1665 = vst.msk [vmem:[%s8865_s7 + $0x80] sm:$0xff] %vm493_vm2, %v1633_v6  ;;  %5293 = vst.msk [vmem:[%s8865_s7 + $0x180] sm:$0xff] %vm493_vm2, %v2749_v38  ;;  %v6357_v29 = vpop.f32.mrb[18].mxu0  ;;  %v6557_v59 = vpop.f32.mrb[18].mxu1 }
 0x1d1   : > { %v1636_v37 = vadd.f32 %v6357_v29, %v8856_v40  ;;  %v2752_v63 = vadd.f32 %v6557_v59, %v8856_v40  ;;  %v1510_v27 = vpop.f32.mrb[19].mxu0  ;;  %v2632_v45 = vpop.f32.mrb[19].mxu1  ;;  %6721 = vmatmul.mubr.msk.f32.gmra.mrb[60].mxu0 %vm493_vm2, %v9751_v25  ;;  %6921 = vmatmul.mubr.msk.f32.gmra.mrb[60].mxu1 %vm493_vm2, %v8313_v47 }
 0x1d2   : > { %v1635_v8 = vadd.f32 %v8856_v40, %v1510_v27  ;;  %v2751_v16 = vadd.f32 %v8856_v40, %v2632_v45  ;;  %6723 = vmatprep.mubr.msk.f32.mxu0 %vm493_vm2, %v8779_v62  ;;  %6923 = vmatprep.mubr.msk.f32.mxu1 %vm493_vm2, %v9047_v41 }
 0x1d3   : > { %1668 = vst.msk [vmem:[%s8865_s7 + $0x98] sm:$0xff] %vm493_vm2, %v1636_v37  ;;  %5296 = vst.msk [vmem:[%s8865_s7 + $0x198] sm:$0xff] %vm493_vm2, %v2752_v63 }
 0x1d4   : > { %1667 = vst.msk [vmem:[%s8865_s7 + $0x90] sm:$0xff] %vm493_vm2, %v1635_v8  ;;  %5295 = vst.msk [vmem:[%s8865_s7 + $0x190] sm:$0xff] %vm493_vm2, %v2751_v16  ;;  %v6360_v25 = vpop.f32.mrb[20].mxu0  ;;  %v6560_v62 = vpop.f32.mrb[20].mxu1 }
 0x1d5   : > { %v1638_v6 = vadd.f32 %v6360_v25, %v8856_v40  ;;  %v2754_v38 = vadd.f32 %v6560_v62, %v8856_v40  ;;  %v1520_v17 = vpop.f32.mrb[21].mxu0  ;;  %v2642_v11 = vpop.f32.mrb[21].mxu1  ;;  %6724 = vmatmul.mubr.msk.f32.gmra.mrb[62].mxu0 %vm493_vm2, %v8783_v0  ;;  %6924 = vmatmul.mubr.msk.f32.gmra.mrb[62].mxu1 %vm493_vm2, %v9066_v12 }
 0x1d6   : > { %v1637_v29 = vadd.f32 %v8856_v40, %v1520_v17  ;;  %v2753_v59 = vadd.f32 %v8856_v40, %v2642_v11  ;;  %6728 = vmatprep.mubr.msk.f32.mxu0 %vm493_vm2, %v7586_v43  ;;  %6928 = vmatprep.mubr.msk.f32.mxu1 %vm493_vm2, %v9694_v22 }
 0x1d7   : > { %1670 = vst.msk [vmem:[%s8865_s7 + $0xa8] sm:$0xff] %vm493_vm2, %v1638_v6  ;;  %5298 = vst.msk [vmem:[%s8865_s7 + $0x1a8] sm:$0xff] %vm493_vm2, %v2754_v38 }
 0x1d8   : > { %1669 = vst.msk [vmem:[%s8865_s7 + $0xa0] sm:$0xff] %vm493_vm2, %v1637_v29  ;;  %5297 = vst.msk [vmem:[%s8865_s7 + $0x1a0] sm:$0xff] %vm493_vm2, %v2753_v59  ;;  %v6363_v0 = vpop.f32.mrb[22].mxu0  ;;  %v6563_v37 = vpop.f32.mrb[22].mxu1 }
 0x1d9   : > { %v1640_v63 = vadd.f32 %v6363_v0, %v8856_v40  ;;  %v2756_v43 = vadd.f32 %v6563_v37, %v8856_v40  ;;  %v1530_v27 = vpop.f32.mrb[23].mxu0  ;;  %v2652_v22 = vpop.f32.mrb[23].mxu1  ;;  %6729 = vmatmul.mubr.msk.f32.vlgmr.msra.gmra.mrb[32].mxu0 %vm493_vm2, %v7614_v54  ;;  %6929 = vmatmul.mubr.msk.f32.vlgmr.msra.gmra.mrb[32].mxu1 %vm493_vm2, %v9695_v23 }
 0x1da   : > { %v1639_v45 = vadd.f32 %v8856_v40, %v1530_v27  ;;  %v2755_v8 = vadd.f32 %v8856_v40, %v2652_v22  ;;  %6731 = vmatprep.mubr.msk.f32.mxu0 %vm493_vm2, %v7622_v58  ;;  %6931 = vmatprep.mubr.msk.f32.mxu1 %vm493_vm2, %v9696_v55 }
 0x1db   : > { %1672 = vst.msk [vmem:[%s8865_s7 + $0xb8] sm:$0xff] %vm493_vm2, %v1640_v63  ;;  %5300 = vst.msk [vmem:[%s8865_s7 + $0x1b8] sm:$0xff] %vm493_vm2, %v2756_v43 }
 0x1dc   : > { %1671 = vst.msk [vmem:[%s8865_s7 + $0xb0] sm:$0xff] %vm493_vm2, %v1639_v45  ;;  %5299 = vst.msk [vmem:[%s8865_s7 + $0x1b0] sm:$0xff] %vm493_vm2, %v2755_v8  ;;  %v6366_v54 = vpop.f32.mrb[24].mxu0  ;;  %v6566_v23 = vpop.f32.mrb[24].mxu1 }
 0x1dd   : > { %v1642_v16 = vadd.f32 %v6366_v54, %v8856_v40  ;;  %v2758_v58 = vadd.f32 %v6566_v23, %v8856_v40  ;;  %v1540_v25 = vpop.f32.mrb[25].mxu0  ;;  %v2662_v55 = vpop.f32.mrb[25].mxu1  ;;  %6732 = vmatmul.mubr.msk.f32.gmra.mrb[34].mxu0 %vm493_vm2, %v7641_v1  ;;  %6932 = vmatmul.mubr.msk.f32.gmra.mrb[34].mxu1 %vm493_vm2, %v9697_v61 }
 0x1de   : > { %v1641_v62 = vadd.f32 %v8856_v40, %v1540_v25  ;;  %v2757_v6 = vadd.f32 %v8856_v40, %v2662_v55  ;;  %6734 = vmatprep.mubr.msk.f32.mxu0 %vm493_vm2, %v7651_v3  ;;  %6934 = vmatprep.mubr.msk.f32.mxu1 %vm493_vm2, %v9698_v35 }
 0x1df   : > { %1674 = vst.msk [vmem:[%s8865_s7 + $0xc8] sm:$0xff] %vm493_vm2, %v1642_v16  ;;  %5302 = vst.msk [vmem:[%s8865_s7 + $0x1c8] sm:$0xff] %vm493_vm2, %v2758_v58 }
 0x1e0   : > { %1673 = vst.msk [vmem:[%s8865_s7 + $0xc0] sm:$0xff] %vm493_vm2, %v1641_v62  ;;  %5301 = vst.msk [vmem:[%s8865_s7 + $0x1c0] sm:$0xff] %vm493_vm2, %v2757_v6  ;;  %v6369_v1 = vpop.f32.mrb[26].mxu0  ;;  %v6569_v61 = vpop.f32.mrb[26].mxu1 }
 0x1e1   : > { %v1644_v38 = vadd.f32 %v6369_v1, %v8856_v40  ;;  %v2760_v3 = vadd.f32 %v6569_v61, %v8856_v40  ;;  %v1550_v17 = vpop.f32.mrb[27].mxu0  ;;  %v2672_v35 = vpop.f32.mrb[27].mxu1  ;;  %6735 = vmatmul.mubr.msk.f32.gmra.mrb[36].mxu0 %vm493_vm2, %v7676_v21  ;;  %6935 = vmatmul.mubr.msk.f32.gmra.mrb[36].mxu1 %vm493_vm2, %v9699_v10 }
 0x1e2   : > { %v1643_v11 = vadd.f32 %v8856_v40, %v1550_v17  ;;  %v2759_v29 = vadd.f32 %v8856_v40, %v2672_v35  ;;  %6737 = vmatprep.mubr.msk.f32.mxu0 %vm493_vm2, %v7684_v32  ;;  %6937 = vmatprep.mubr.msk.f32.mxu1 %vm493_vm2, %v9700_v13 }
 0x1e3   : > { %1676 = vst.msk [vmem:[%s8865_s7 + $0xd8] sm:$0xff] %vm493_vm2, %v1644_v38  ;;  %5304 = vst.msk [vmem:[%s8865_s7 + $0x1d8] sm:$0xff] %vm493_vm2, %v2760_v3 }
 0x1e4   : > { %1675 = vst.msk [vmem:[%s8865_s7 + $0xd0] sm:$0xff] %vm493_vm2, %v1643_v11  ;;  %5303 = vst.msk [vmem:[%s8865_s7 + $0x1d0] sm:$0xff] %vm493_vm2, %v2759_v29  ;;  %v6372_v21 = vpop.f32.mrb[28].mxu0  ;;  %v6572_v10 = vpop.f32.mrb[28].mxu1 }
 0x1e5   : > { %v1646_v59 = vadd.f32 %v6372_v21, %v8856_v40  ;;  %v2762_v32 = vadd.f32 %v6572_v10, %v8856_v40  ;;  %v1560_v0 = vpop.f32.mrb[29].mxu0  ;;  %v2682_v13 = vpop.f32.mrb[29].mxu1  ;;  %6738 = vmatmul.mubr.msk.f32.gmra.mrb[38].mxu0 %vm493_vm2, %v7703_v44  ;;  %6938 = vmatmul.mubr.msk.f32.gmra.mrb[38].mxu1 %vm493_vm2, %v9701_v60 }
 0x1e6   : > { %v1645_v37 = vadd.f32 %v8856_v40, %v1560_v0  ;;  %v2761_v63 = vadd.f32 %v8856_v40, %v2682_v13  ;;  %6740 = vmatprep.mubr.msk.f32.mxu0 %vm493_vm2, %v7713_v49  ;;  %6940 = vmatprep.mubr.msk.f32.mxu1 %vm493_vm2, %v9702_v14 }
 0x1e7   : > { %1678 = vst.msk [vmem:[%s8865_s7 + $0xe8] sm:$0xff] %vm493_vm2, %v1646_v59  ;;  %5306 = vst.msk [vmem:[%s8865_s7 + $0x1e8] sm:$0xff] %vm493_vm2, %v2762_v32 }
 0x1e8   : > { %1677 = vst.msk [vmem:[%s8865_s7 + $0xe0] sm:$0xff] %vm493_vm2, %v1645_v37  ;;  %5305 = vst.msk [vmem:[%s8865_s7 + $0x1e0] sm:$0xff] %vm493_vm2, %v2761_v63  ;;  %v6375_v44 = vpop.f32.mrb[30].mxu0  ;;  %v6575_v60 = vpop.f32.mrb[30].mxu1 }
 0x1e9   : > { %v1648_v43 = vadd.f32 %v6375_v44, %v8856_v40  ;;  %v2764_v49 = vadd.f32 %v6575_v60, %v8856_v40  ;;  %v1570_v27 = vpop.f32.mrb[31].mxu0  ;;  %v2692_v14 = vpop.f32.mrb[31].mxu1  ;;  %6741 = vmatmul.mubr.msk.f32.gmra.mrb[40].mxu0 %vm493_vm2, %v7738_v9  ;;  %6941 = vmatmul.mubr.msk.f32.gmra.mrb[40].mxu1 %vm493_vm2, %v9703_v34  ;;  %v9752_v9 = vld [vmem:[#allocation28_spill] sm:$0xff] }
 0x1ea   : > { %v1647_v22 = vadd.f32 %v8856_v40, %v1570_v27  ;;  %v2763_v45 = vadd.f32 %v8856_v40, %v2692_v14  ;;  %6743 = vmatprep.mubr.msk.f32.mxu0 %vm493_vm2, %v7746_v19  ;;  %6943 = vmatprep.mubr.msk.f32.mxu1 %vm493_vm2, %v9704_v20  ;;  %v9753_v19 = vld [vmem:[#allocation31_spill] sm:$0xff] }
 0x1eb   : > { %1680 = vst.msk [vmem:[%s8865_s7 + $0xf8] sm:$0xff] %vm493_vm2, %v1648_v43  ;;  %5308 = vst.msk [vmem:[%s8865_s7 + $0x1f8] sm:$0xff] %vm493_vm2, %v2764_v49 }
 0x1ec   : > { %1679 = vst.msk [vmem:[%s8865_s7 + $0xf0] sm:$0xff] %vm493_vm2, %v1647_v22  ;;  %5307 = vst.msk [vmem:[%s8865_s7 + $0x1f0] sm:$0xff] %vm493_vm2, %v2763_v45 }
 0x1ed   : > { %6744 = vmatmul.mubr.msk.f32.gmra.mrb[42].mxu0 %vm493_vm2, %v7765_v50  ;;  %6944 = vmatmul.mubr.msk.f32.gmra.mrb[42].mxu1 %vm493_vm2, %v9705_v24  ;;  %v9754_v50 = vld [vmem:[#allocation33_spill] sm:$0xff] }
 0x1ee   : > { %6746 = vmatprep.mubr.msk.f32.mxu0 %vm493_vm2, %v7775_v52  ;;  %6946 = vmatprep.mubr.msk.f32.mxu1 %vm493_vm2, %v9706_v2  ;;  %v9755_v52 = vld [vmem:[#allocation37_spill] sm:$0xff]  ;;  %v9766_v2 = vld [vmem:[#allocation38_spill] sm:$0xff] }
 0x1f1   : > { %6747 = vmatmul.mubr.msk.f32.gmra.mrb[44].mxu0 %vm493_vm2, %v7800_v28  ;;  %6947 = vmatmul.mubr.msk.f32.gmra.mrb[44].mxu1 %vm493_vm2, %v9707_v36  ;;  %v9757_v28 = vld [vmem:[#allocation43_spill] sm:$0xff] }
 0x1f2   : > { %6749 = vmatprep.mubr.msk.f32.mxu0 %vm493_vm2, %v7808_v51  ;;  %6949 = vmatprep.mubr.msk.f32.mxu1 %vm493_vm2, %v9752_v9  ;;  %v9756_v51 = vld [vmem:[#allocation39_spill] sm:$0xff] }
 0x1f3   : > { %v9762_v36 = vld [vmem:[#allocation55_spill] sm:$0xff] }
 0x1f5   : > { %6750 = vmatmul.mubr.msk.f32.gmra.mrb[46].mxu0 %vm493_vm2, %v7827_v56  ;;  %6950 = vmatmul.mubr.msk.f32.gmra.mrb[46].mxu1 %vm493_vm2, %v9753_v19  ;;  %v9758_v56 = vld [vmem:[#allocation45_spill] sm:$0xff] }
 0x1f6   : > { %6752 = vmatprep.mubr.msk.f32.mxu0 %vm493_vm2, %v9674_v4  ;;  %6952 = vmatprep.mubr.msk.f32.mxu1 %vm493_vm2, %v9754_v50  ;;  %v9759_v4 = vld [vmem:[#allocation49_spill] sm:$0xff] }
 0x1f9   : > { %6753 = vmatmul.mubr.msk.f32.gmra.mrb[48].mxu0 %vm493_vm2, %v9676_v18  ;;  %6953 = vmatmul.mubr.msk.f32.gmra.mrb[48].mxu1 %vm493_vm2, %v9755_v52  ;;  %v9760_v18 = vld [vmem:[#allocation50_spill] sm:$0xff] }
 0x1fa   : > { %6755 = vmatprep.mubr.msk.f32.mxu0 %vm493_vm2, %v9678_v30  ;;  %6955 = vmatprep.mubr.msk.f32.mxu1 %vm493_vm2, %v9756_v51  ;;  %v9761_v30 = vld [vmem:[#allocation53_spill] sm:$0xff] }
 0x1fd   : > { %6756 = vmatmul.mubr.msk.f32.gmra.mrb[50].mxu0 %vm493_vm2, %v9680_v31  ;;  %6956 = vmatmul.mubr.msk.f32.gmra.mrb[50].mxu1 %vm493_vm2, %v9757_v28  ;;  %v9763_v31 = vld [vmem:[#allocation56_spill] sm:$0xff] }
 0x1fe   : > { %6758 = vmatprep.mubr.msk.f32.mxu0 %vm493_vm2, %v9682_v26  ;;  %6958 = vmatprep.mubr.msk.f32.mxu1 %vm493_vm2, %v9758_v56 }
 0x201   : > { %6759 = vmatmul.mubr.msk.f32.gmra.mrb[52].mxu0 %vm493_vm2, %v9724_v15  ;;  %6959 = vmatmul.mubr.msk.f32.gmra.mrb[52].mxu1 %vm493_vm2, %v9759_v4 }
 0x202   : > { %6761 = vmatprep.mubr.msk.f32.mxu0 %vm493_vm2, %v7932_v57  ;;  %6961 = vmatprep.mubr.msk.f32.mxu1 %vm493_vm2, %v9760_v18  ;;  %v9764_v57 = vld [vmem:[#allocation57_spill] sm:$0xff] }
 0x205   : > { %6762 = vmatmul.mubr.msk.f32.gmra.mrb[54].mxu0 %vm493_vm2, %v7951_v53  ;;  %6962 = vmatmul.mubr.msk.f32.gmra.mrb[54].mxu1 %vm493_vm2, %v9761_v30  ;;  %v9765_v53 = vld [vmem:[#allocation58_spill] sm:$0xff] }
 0x206   : > { %6764 = vmatprep.mubr.msk.f32.mxu0 %vm493_vm2, %v9728_v48  ;;  %6964 = vmatprep.mubr.msk.f32.mxu1 %vm493_vm2, %v9762_v36 }
 0x209   : > { %6765 = vmatmul.mubr.msk.f32.gmra.mrb[56].mxu0 %vm493_vm2, %v7980_v7  ;;  %6965 = vmatmul.mubr.msk.f32.gmra.mrb[56].mxu1 %vm493_vm2, %v9763_v31 }
 0x20a   : > { %6767 = vmatprep.mubr.msk.f32.mxu0 %vm493_vm2, %v7986_v42  ;;  %6967 = vmatprep.mubr.msk.f32.mxu1 %vm493_vm2, %v9764_v57  ;;  %v9767_v42 = vld [vmem:[#allocation42_spill] sm:$0xff] }
 0x20d   : > { %6768 = vmatmul.mubr.msk.f32.gmra.mrb[58].mxu0 %vm493_vm2, %v8000_v33  ;;  %6968 = vmatmul.mubr.msk.f32.gmra.mrb[58].mxu1 %vm493_vm2, %v9765_v53 }
 0x20e   : > { %6770 = vmatprep.mubr.msk.f32.mxu0 %vm493_vm2, %v8302_v46  ;;  %6970 = vmatprep.mubr.msk.f32.mxu1 %vm493_vm2, %v9766_v2 }
 0x211   : > { %6771 = vmatmul.mubr.msk.f32.gmra.mrb[60].mxu0 %vm493_vm2, %v8313_v47  ;;  %6971 = vmatmul.mubr.msk.f32.gmra.mrb[60].mxu1 %vm493_vm2, %v9767_v42 }
 0x212   : > { %6773 = vmatprep.mubr.msk.f32.mxu0 %vm493_vm2, %v9047_v41  ;;  %6973 = vmatprep.mubr.msk.f32.mxu1 %vm493_vm2, %v8799_v5 }
 0x215   : > { %6774 = vmatmul.mubr.msk.f32.gmra.mrb[62].mxu0 %vm493_vm2, %v9066_v12  ;;  %6974 = vmatmul.mubr.msk.f32.gmra.mrb[62].mxu1 %vm493_vm2, %v8802_v39 }
 0x2ac   : > { %v6730_v7 = vpop.f32.mrb[32].mxu0  ;;  %v6930_v33 = vpop.f32.mrb[32].mxu1 }
 0x2ad   : > { %v3791_v26 = vadd.f32 %v6730_v7, %v8856_v40  ;;  %v4844_v24 = vadd.f32 %v6930_v33, %v8856_v40  ;;  %v3599_v20 = vpop.f32.mrb[33].mxu0  ;;  %v4652_v34 = vpop.f32.mrb[33].mxu1 }
 0x2ae   : > { %v3790_v46 = vadd.f32 %v8856_v40, %v3599_v20  ;;  %v4843_v5 = vadd.f32 %v8856_v40, %v4652_v34 }
 0x2af   : > { %5446 = vst.msk [vmem:[%s8865_s7 + $0x208] sm:$0xff] %vm493_vm2, %v3791_v26  ;;  %5614 = vst.msk [vmem:[%s8865_s7 + $0x308] sm:$0xff] %vm493_vm2, %v4844_v24 }
 0x2b0   : > { %5445 = vst.msk [vmem:[%s8865_s7 + $0x200] sm:$0xff] %vm493_vm2, %v3790_v46  ;;  %5613 = vst.msk [vmem:[%s8865_s7 + $0x300] sm:$0xff] %vm493_vm2, %v4843_v5  ;;  %v6733_v47 = vpop.f32.mrb[34].mxu0  ;;  %v6933_v15 = vpop.f32.mrb[34].mxu1 }
 0x2b1   : > { %v3793_v48 = vadd.f32 %v6733_v47, %v8856_v40  ;;  %v4846_v39 = vadd.f32 %v6933_v15, %v8856_v40  ;;  %v3609_v41 = vpop.f32.mrb[35].mxu0  ;;  %v4662_v12 = vpop.f32.mrb[35].mxu1 }
 0x2b2   : > { %v3792_v8 = vadd.f32 %v8856_v40, %v3609_v41  ;;  %v4845_v54 = vadd.f32 %v8856_v40, %v4662_v12 }
 0x2b3   : > { %5448 = vst.msk [vmem:[%s8865_s7 + $0x218] sm:$0xff] %vm493_vm2, %v3793_v48  ;;  %5616 = vst.msk [vmem:[%s8865_s7 + $0x318] sm:$0xff] %vm493_vm2, %v4846_v39 }
 0x2b4   : > { %5447 = vst.msk [vmem:[%s8865_s7 + $0x210] sm:$0xff] %vm493_vm2, %v3792_v8  ;;  %5615 = vst.msk [vmem:[%s8865_s7 + $0x310] sm:$0xff] %vm493_vm2, %v4845_v54  ;;  %v6736_v23 = vpop.f32.mrb[36].mxu0  ;;  %v6936_v16 = vpop.f32.mrb[36].mxu1 }
 0x2b5   : > { %v3795_v58 = vadd.f32 %v6736_v23, %v8856_v40  ;;  %v4848_v25 = vadd.f32 %v6936_v16, %v8856_v40  ;;  %v3619_v55 = vpop.f32.mrb[37].mxu0  ;;  %v4672_v62 = vpop.f32.mrb[37].mxu1 }
 0x2b6   : > { %v3794_v6 = vadd.f32 %v8856_v40, %v3619_v55  ;;  %v4847_v1 = vadd.f32 %v8856_v40, %v4672_v62 }
 0x2b7   : > { %5450 = vst.msk [vmem:[%s8865_s7 + $0x228] sm:$0xff] %vm493_vm2, %v3795_v58  ;;  %5618 = vst.msk [vmem:[%s8865_s7 + $0x328] sm:$0xff] %vm493_vm2, %v4848_v25 }
 0x2b8   : > { %5449 = vst.msk [vmem:[%s8865_s7 + $0x220] sm:$0xff] %vm493_vm2, %v3794_v6  ;;  %5617 = vst.msk [vmem:[%s8865_s7 + $0x320] sm:$0xff] %vm493_vm2, %v4847_v1  ;;  %v6739_v61 = vpop.f32.mrb[38].mxu0  ;;  %v6939_v38 = vpop.f32.mrb[38].mxu1 }
 0x2b9   : > { %v3797_v3 = vadd.f32 %v6739_v61, %v8856_v40  ;;  %v4850_v17 = vadd.f32 %v6939_v38, %v8856_v40  ;;  %v3629_v35 = vpop.f32.mrb[39].mxu0  ;;  %v4682_v11 = vpop.f32.mrb[39].mxu1 }
 0x2ba   : > { %v3796_v29 = vadd.f32 %v8856_v40, %v3629_v35  ;;  %v4849_v21 = vadd.f32 %v8856_v40, %v4682_v11 }
 0x2bb   : > { %5452 = vst.msk [vmem:[%s8865_s7 + $0x238] sm:$0xff] %vm493_vm2, %v3797_v3  ;;  %5620 = vst.msk [vmem:[%s8865_s7 + $0x338] sm:$0xff] %vm493_vm2, %v4850_v17 }
 0x2bc   : > { %5451 = vst.msk [vmem:[%s8865_s7 + $0x230] sm:$0xff] %vm493_vm2, %v3796_v29  ;;  %5619 = vst.msk [vmem:[%s8865_s7 + $0x330] sm:$0xff] %vm493_vm2, %v4849_v21  ;;  %v6742_v10 = vpop.f32.mrb[40].mxu0  ;;  %v6942_v59 = vpop.f32.mrb[40].mxu1 }
 0x2bd   : > { %v3799_v32 = vadd.f32 %v6742_v10, %v8856_v40  ;;  %v4852_v0 = vadd.f32 %v6942_v59, %v8856_v40  ;;  %v3639_v13 = vpop.f32.mrb[41].mxu0  ;;  %v4692_v37 = vpop.f32.mrb[41].mxu1 }
 0x2be   : > { %v3798_v63 = vadd.f32 %v8856_v40, %v3639_v13  ;;  %v4851_v44 = vadd.f32 %v8856_v40, %v4692_v37 }
 0x2bf   : > { %5454 = vst.msk [vmem:[%s8865_s7 + $0x248] sm:$0xff] %vm493_vm2, %v3799_v32  ;;  %5622 = vst.msk [vmem:[%s8865_s7 + $0x348] sm:$0xff] %vm493_vm2, %v4852_v0 }
 0x2c0   : > { %5453 = vst.msk [vmem:[%s8865_s7 + $0x240] sm:$0xff] %vm493_vm2, %v3798_v63  ;;  %5621 = vst.msk [vmem:[%s8865_s7 + $0x340] sm:$0xff] %vm493_vm2, %v4851_v44  ;;  %v6745_v60 = vpop.f32.mrb[42].mxu0  ;;  %v6945_v43 = vpop.f32.mrb[42].mxu1 }
 0x2c1   : > { %v3801_v49 = vadd.f32 %v6745_v60, %v8856_v40  ;;  %v4854_v27 = vadd.f32 %v6945_v43, %v8856_v40  ;;  %v3649_v14 = vpop.f32.mrb[43].mxu0  ;;  %v4702_v22 = vpop.f32.mrb[43].mxu1 }
 0x2c2   : > { %v3800_v45 = vadd.f32 %v8856_v40, %v3649_v14  ;;  %v4853_v9 = vadd.f32 %v8856_v40, %v4702_v22 }
 0x2c3   : > { %5456 = vst.msk [vmem:[%s8865_s7 + $0x258] sm:$0xff] %vm493_vm2, %v3801_v49  ;;  %5624 = vst.msk [vmem:[%s8865_s7 + $0x358] sm:$0xff] %vm493_vm2, %v4854_v27 }
 0x2c4   : > { %5455 = vst.msk [vmem:[%s8865_s7 + $0x250] sm:$0xff] %vm493_vm2, %v3800_v45  ;;  %5623 = vst.msk [vmem:[%s8865_s7 + $0x350] sm:$0xff] %vm493_vm2, %v4853_v9  ;;  %v6748_v19 = vpop.f32.mrb[44].mxu0  ;;  %v6948_v50 = vpop.f32.mrb[44].mxu1 }
 0x2c5   : > { %v3803_v52 = vadd.f32 %v6748_v19, %v8856_v40  ;;  %v4856_v51 = vadd.f32 %v6948_v50, %v8856_v40  ;;  %v3659_v28 = vpop.f32.mrb[45].mxu0  ;;  %v4712_v56 = vpop.f32.mrb[45].mxu1 }
 0x2c6   : > { %v3802_v4 = vadd.f32 %v8856_v40, %v3659_v28  ;;  %v4855_v18 = vadd.f32 %v8856_v40, %v4712_v56 }
 0x2c7   : > { %5458 = vst.msk [vmem:[%s8865_s7 + $0x268] sm:$0xff] %vm493_vm2, %v3803_v52  ;;  %5626 = vst.msk [vmem:[%s8865_s7 + $0x368] sm:$0xff] %vm493_vm2, %v4856_v51 }
 0x2c8   : > { %5457 = vst.msk [vmem:[%s8865_s7 + $0x260] sm:$0xff] %vm493_vm2, %v3802_v4  ;;  %5625 = vst.msk [vmem:[%s8865_s7 + $0x360] sm:$0xff] %vm493_vm2, %v4855_v18  ;;  %v6751_v30 = vpop.f32.mrb[46].mxu0  ;;  %v6951_v36 = vpop.f32.mrb[46].mxu1 }
 0x2c9   : > { %v3805_v31 = vadd.f32 %v6751_v30, %v8856_v40  ;;  %v4858_v57 = vadd.f32 %v6951_v36, %v8856_v40  ;;  %v3669_v53 = vpop.f32.mrb[47].mxu0  ;;  %v4722_v2 = vpop.f32.mrb[47].mxu1 }
 0x2ca   : > { %v3804_v42 = vadd.f32 %v8856_v40, %v3669_v53  ;;  %v4857_v7 = vadd.f32 %v8856_v40, %v4722_v2 }
 0x2cb   : > { %5460 = vst.msk [vmem:[%s8865_s7 + $0x278] sm:$0xff] %vm493_vm2, %v3805_v31  ;;  %5628 = vst.msk [vmem:[%s8865_s7 + $0x378] sm:$0xff] %vm493_vm2, %v4858_v57 }
 0x2cc   : > { %5459 = vst.msk [vmem:[%s8865_s7 + $0x270] sm:$0xff] %vm493_vm2, %v3804_v42  ;;  %5627 = vst.msk [vmem:[%s8865_s7 + $0x370] sm:$0xff] %vm493_vm2, %v4857_v7  ;;  %v6754_v33 = vpop.f32.mrb[48].mxu0  ;;  %v6954_v26 = vpop.f32.mrb[48].mxu1 }
 0x2cd   : > { %v3807_v24 = vadd.f32 %v6754_v33, %v8856_v40  ;;  %v4860_v20 = vadd.f32 %v6954_v26, %v8856_v40  ;;  %v3679_v34 = vpop.f32.mrb[49].mxu0  ;;  %v4732_v46 = vpop.f32.mrb[49].mxu1 }
 0x2ce   : > { %v3806_v5 = vadd.f32 %v8856_v40, %v3679_v34  ;;  %v4859_v47 = vadd.f32 %v8856_v40, %v4732_v46 }
 0x2cf   : > { %5462 = vst.msk [vmem:[%s8865_s7 + $0x288] sm:$0xff] %vm493_vm2, %v3807_v24  ;;  %5630 = vst.msk [vmem:[%s8865_s7 + $0x388] sm:$0xff] %vm493_vm2, %v4860_v20 }
 0x2d0   : > { %5461 = vst.msk [vmem:[%s8865_s7 + $0x280] sm:$0xff] %vm493_vm2, %v3806_v5  ;;  %5629 = vst.msk [vmem:[%s8865_s7 + $0x380] sm:$0xff] %vm493_vm2, %v4859_v47  ;;  %v6757_v15 = vpop.f32.mrb[50].mxu0  ;;  %v6957_v48 = vpop.f32.mrb[50].mxu1 }
 0x2d1   : > { %v3809_v39 = vadd.f32 %v6757_v15, %v8856_v40  ;;  %v4862_v41 = vadd.f32 %v6957_v48, %v8856_v40  ;;  %v3689_v12 = vpop.f32.mrb[51].mxu0  ;;  %v4742_v8 = vpop.f32.mrb[51].mxu1 }
 0x2d2   : > { %v3808_v54 = vadd.f32 %v8856_v40, %v3689_v12  ;;  %v4861_v23 = vadd.f32 %v8856_v40, %v4742_v8 }
 0x2d3   : > { %5464 = vst.msk [vmem:[%s8865_s7 + $0x298] sm:$0xff] %vm493_vm2, %v3809_v39  ;;  %5632 = vst.msk [vmem:[%s8865_s7 + $0x398] sm:$0xff] %vm493_vm2, %v4862_v41 }
 0x2d4   : > { %5463 = vst.msk [vmem:[%s8865_s7 + $0x290] sm:$0xff] %vm493_vm2, %v3808_v54  ;;  %5631 = vst.msk [vmem:[%s8865_s7 + $0x390] sm:$0xff] %vm493_vm2, %v4861_v23  ;;  %v6760_v16 = vpop.f32.mrb[52].mxu0  ;;  %v6960_v58 = vpop.f32.mrb[52].mxu1 }
 0x2d5   : > { %v3811_v25 = vadd.f32 %v6760_v16, %v8856_v40  ;;  %v4864_v55 = vadd.f32 %v6960_v58, %v8856_v40  ;;  %v3699_v62 = vpop.f32.mrb[53].mxu0  ;;  %v4752_v6 = vpop.f32.mrb[53].mxu1 }
 0x2d6   : > { %v3810_v1 = vadd.f32 %v8856_v40, %v3699_v62  ;;  %v4863_v61 = vadd.f32 %v8856_v40, %v4752_v6 }
 0x2d7   : > { %5466 = vst.msk [vmem:[%s8865_s7 + $0x2a8] sm:$0xff] %vm493_vm2, %v3811_v25  ;;  %5634 = vst.msk [vmem:[%s8865_s7 + $0x3a8] sm:$0xff] %vm493_vm2, %v4864_v55 }
 0x2d8   : > { %5465 = vst.msk [vmem:[%s8865_s7 + $0x2a0] sm:$0xff] %vm493_vm2, %v3810_v1  ;;  %5633 = vst.msk [vmem:[%s8865_s7 + $0x3a0] sm:$0xff] %vm493_vm2, %v4863_v61  ;;  %v6763_v38 = vpop.f32.mrb[54].mxu0  ;;  %v6963_v3 = vpop.f32.mrb[54].mxu1 }
 0x2d9   : > { %v3813_v17 = vadd.f32 %v6763_v38, %v8856_v40  ;;  %v4866_v35 = vadd.f32 %v6963_v3, %v8856_v40  ;;  %v3709_v11 = vpop.f32.mrb[55].mxu0  ;;  %v4762_v29 = vpop.f32.mrb[55].mxu1 }
 0x2da   : > { %v3812_v21 = vadd.f32 %v8856_v40, %v3709_v11  ;;  %v4865_v10 = vadd.f32 %v8856_v40, %v4762_v29 }
 0x2db   : > { %5468 = vst.msk [vmem:[%s8865_s7 + $0x2b8] sm:$0xff] %vm493_vm2, %v3813_v17  ;;  %5636 = vst.msk [vmem:[%s8865_s7 + $0x3b8] sm:$0xff] %vm493_vm2, %v4866_v35 }
 0x2dc   : > { %5467 = vst.msk [vmem:[%s8865_s7 + $0x2b0] sm:$0xff] %vm493_vm2, %v3812_v21  ;;  %5635 = vst.msk [vmem:[%s8865_s7 + $0x3b0] sm:$0xff] %vm493_vm2, %v4865_v10  ;;  %v6766_v59 = vpop.f32.mrb[56].mxu0  ;;  %v6966_v32 = vpop.f32.mrb[56].mxu1 }
 0x2dd   : > { %v3815_v0 = vadd.f32 %v6766_v59, %v8856_v40  ;;  %v4868_v13 = vadd.f32 %v6966_v32, %v8856_v40  ;;  %v3719_v37 = vpop.f32.mrb[57].mxu0  ;;  %v4772_v63 = vpop.f32.mrb[57].mxu1 }
 0x2de   : > { %v3814_v44 = vadd.f32 %v8856_v40, %v3719_v37  ;;  %v4867_v60 = vadd.f32 %v8856_v40, %v4772_v63 }
 0x2df   : > { %5470 = vst.msk [vmem:[%s8865_s7 + $0x2c8] sm:$0xff] %vm493_vm2, %v3815_v0  ;;  %5638 = vst.msk [vmem:[%s8865_s7 + $0x3c8] sm:$0xff] %vm493_vm2, %v4868_v13 }
 0x2e0   : > { %5469 = vst.msk [vmem:[%s8865_s7 + $0x2c0] sm:$0xff] %vm493_vm2, %v3814_v44  ;;  %5637 = vst.msk [vmem:[%s8865_s7 + $0x3c0] sm:$0xff] %vm493_vm2, %v4867_v60  ;;  %v6769_v43 = vpop.f32.mrb[58].mxu0  ;;  %v6969_v49 = vpop.f32.mrb[58].mxu1 }
 0x2e1   : > { %v3817_v27 = vadd.f32 %v6769_v43, %v8856_v40  ;;  %v4870_v14 = vadd.f32 %v6969_v49, %v8856_v40  ;;  %v3729_v22 = vpop.f32.mrb[59].mxu0  ;;  %v4782_v45 = vpop.f32.mrb[59].mxu1 }
 0x2e2   : > { %v3816_v9 = vadd.f32 %v8856_v40, %v3729_v22  ;;  %v4869_v19 = vadd.f32 %v8856_v40, %v4782_v45 }
 0x2e3   : > { %5472 = vst.msk [vmem:[%s8865_s7 + $0x2d8] sm:$0xff] %vm493_vm2, %v3817_v27  ;;  %5640 = vst.msk [vmem:[%s8865_s7 + $0x3d8] sm:$0xff] %vm493_vm2, %v4870_v14 }
 0x2e4   : > { %5471 = vst.msk [vmem:[%s8865_s7 + $0x2d0] sm:$0xff] %vm493_vm2, %v3816_v9  ;;  %5639 = vst.msk [vmem:[%s8865_s7 + $0x3d0] sm:$0xff] %vm493_vm2, %v4869_v19  ;;  %v6772_v50 = vpop.f32.mrb[60].mxu0  ;;  %v6972_v52 = vpop.f32.mrb[60].mxu1 }
 0x2e5   : > { %v3819_v51 = vadd.f32 %v6772_v50, %v8856_v40  ;;  %v4872_v28 = vadd.f32 %v6972_v52, %v8856_v40  ;;  %v3739_v56 = vpop.f32.mrb[61].mxu0  ;;  %v4792_v4 = vpop.f32.mrb[61].mxu1 }
 0x2e6   : > { %v3818_v18 = vadd.f32 %v8856_v40, %v3739_v56  ;;  %v4871_v30 = vadd.f32 %v8856_v40, %v4792_v4 }
 0x2e7   : > { %5474 = vst.msk [vmem:[%s8865_s7 + $0x2e8] sm:$0xff] %vm493_vm2, %v3819_v51  ;;  %5642 = vst.msk [vmem:[%s8865_s7 + $0x3e8] sm:$0xff] %vm493_vm2, %v4872_v28 }
 0x2e8   : > { %5473 = vst.msk [vmem:[%s8865_s7 + $0x2e0] sm:$0xff] %vm493_vm2, %v3818_v18  ;;  %5641 = vst.msk [vmem:[%s8865_s7 + $0x3e0] sm:$0xff] %vm493_vm2, %v4871_v30  ;;  %v6775_v36 = vpop.f32.mrb[62].mxu0  ;;  %v6975_v31 = vpop.f32.mrb[62].mxu1 }
 0x2e9   : > { %v3821_v57 = vadd.f32 %v6775_v36, %v8856_v40  ;;  %v4874_v53 = vadd.f32 %v6975_v31, %v8856_v40  ;;  %v3749_v2 = vpop.f32.mrb[63].mxu0  ;;  %v4802_v42 = vpop.f32.mrb[63].mxu1 }
 0x2ea   : > { %v3820_v7 = vadd.f32 %v8856_v40, %v3749_v2  ;;  %v4873_v33 = vadd.f32 %v8856_v40, %v4802_v42 }
 0x2eb   : > { %5476 = vst.msk [vmem:[%s8865_s7 + $0x2f8] sm:$0xff] %vm493_vm2, %v3821_v57  ;;  %5644 = vst.msk [vmem:[%s8865_s7 + $0x3f8] sm:$0xff] %vm493_vm2, %v4874_v53 }
 0x2ec   : > { %5475 = vst.msk [vmem:[%s8865_s7 + $0x2f0] sm:$0xff] %vm493_vm2, %v3820_v7  ;;  %5643 = vst.msk [vmem:[%s8865_s7 + $0x3f0] sm:$0xff] %vm493_vm2, %v4873_v33 }
 0x2ed PF: > { %s13_s14 = sadd.s32 1, %s7437_s14   ;;  %s9768_s12 = smov %s7433_s13 }
 0x2ee   : > { %p10_p5 = scmp.ge.s32.totalorder %s13_s14, 4   ;;  %s9769_s13 = smov %s9771_s15 }
 0x2f0   :  { %12 = sbr.rel (!%p10_p5) target bundleno = 2 (0x2), region = 81 }

// kernel: tpu_custom_call.1
= control target key start
LH: loop header
LB: loop body
LE: loop exit
PB: predicated region body
PF: predicated region fallthrough
CT: control target
= control target key end

     0   :  { %s7459_s12 = smov 0   ;;  %s7461_s13 = smov 0   ;;  %s9481_s0 = inlined_call_operand.vmem [shape: f32[2,18,18,4], index: 0, kind: input, shape index: {}]   ;;  %s9482_s1 = inlined_call_operand.vmem [shape: f32[4,2,2,4,4], index: 1, kind: input, shape index: {}]   ;;  %s9483_s2 = inlined_call_operand.vmem [shape: f32[1,4], index: 2, kind: input, shape index: {}]   ;;  %s9484_s3 = inlined_call_operand.vmem [shape: f32[2,4,16,16,4], index: 3, kind: output, shape index: {}]  }
   0x1   :  { %s7463_s14 = smov 0  }
   0x2 LB: > { %s25_s15 = sadd.s32 1, %s7433_s13  ;;  %p5001_p0 = scmp.ge.s32.totalorder %s7437_s14, 1  ;;  %s7437_s14 = sphi %s7463_s14, %s13_s14   ;;  %s7433_s13 = sphi %s7461_s13, %s9769_s13   ;;  %s7429_s12 = sphi %s7459_s12, %s9768_s12  }
   0x3   : > { %p27_p1 = scmp.ge.s32.totalorder %s25_s15, 2  ;;  %p151_p2 = scmp.lt.s32.totalorder %s7437_s14, 3 }
   0x5   : > { %s9771_s15 = smov (%p27_p1, %s25_s15), 0  ;;  %p152_p3 = pnand %p5001_p0, %p151_p2 }
   0x7   : > { %155 = sbr.rel (%p152_p3) target bundleno = 749 (0x2ed), region = 32 }
   0xe   : > { %v5005_v0 = vld [vmem:[%s9482_s1 + $0x4] sm:$0xf]  ;;  %vm558_vm0 = vcmask 1043456   ;;  %v5142_v1 = vld [vmem:[%s9482_s1 + $0x14] sm:$0xf]  ;;  %p180_p4 = scmp.lt.s32.totalorder %s7429_s12, 1 }
   0xf   : > { %6176 = vmatprep.subr.msk.mxu0 %vm558_vm0, %v5005_v0  ;;  %6376 = vmatprep.subr.msk.mxu1 %vm558_vm0, %v5142_v1  ;;  %v490_v2 = vld [vmem:[%s9482_s1] sm:$0xf]  ;;  %v5141_v3 = vld [vmem:[%s9482_s1 + $0x10] sm:$0xf]  ;;  %vm307_vm1 = vcmask 1046528   ;;  %vm493_vm2 = vcmask 31744  }
  0x10   : > { %6177 = vmatpush3.msk.msra.mxu0 %vm558_vm0, %v5005_v0  ;;  %6377 = vmatpush3.msk.msra.mxu1 %vm558_vm0, %v5142_v1  ;;  %s9773_s12 = smov (!%p180_p4, %s7429_s12), 1  ;;  %vm398_vm3 = vcmask 1045504   ;;  %v7552_v30 = vld [vmem:[%s9482_s1 + $0x8] sm:$0xf]  ;;  %v7568_v36 = vld [vmem:[%s9482_s1 + $0x18] sm:$0xf] }
  0x11   : > { %6226 = vmatprep.subr.msk.mxu0 %vm558_vm0, %v490_v2  ;;  %6426 = vmatprep.subr.msk.mxu1 %vm558_vm0, %v5141_v3  ;;  %s7360_s24 = smul.u32 432, %s9773_s12  ;;  %s5647_s30 = sshll.u32 %s9773_s12, 10 }
  0x12   : > { %s8865_s7 = scalar_lea.vmem %s9484_s3, %s5647_s30 }
  0x13   : > { %s7501_s27 = scalar_lea.vmem %s9481_s0, %s7360_s24 }
  0x14   : > { %v7504_v4 = vld [vmem:[%s7501_s27] sm:$0xff]  ;;  %v7507_v5 = vld [vmem:[%s7501_s27 + $0x8] sm:$0xff]  ;;  %v201_v6 = vld [vmem:[%s7501_s27 + $0x10] sm:$0x3] }
  0x15   : > { %v308_v7 = vrot.slane %v7504_v4, 1  ;;  %v309_v8 = vrot.slane %v7507_v5, 1  ;;  %v399_v9 = vrot.slane %v7504_v4, 2  ;;  %v400_v10 = vrot.slane %v7507_v5, 2  ;;  %v7515_v11 = vld [vmem:[%s7501_s27 + $0x18] sm:$0xff]  ;;  %v7518_v12 = vld [vmem:[%s7501_s27 + $0x20] sm:$0xff] }
  0x16   : > { %v311_v13 = vrot.slane %v201_v6, 1  ;;  %v402_v14 = vrot.slane %v201_v6, 2  ;;  %v313_v15 = vrot.slane %v7515_v11, 1  ;;  %v314_v16 = vrot.slane %v7518_v12, 1  ;;  %v204_v17 = vld [vmem:[%s7501_s27 + $0x28] sm:$0x3] }
  0x17   : > { %v7524_v18 = vsel %vm307_vm1, %v308_v7, %v309_v8  ;;  %v401_v19 = vsel %vm398_vm3, %v399_v9, %v400_v10  ;;  %v404_v20 = vrot.slane %v7515_v11, 2  ;;  %v405_v21 = vrot.slane %v7518_v12, 2  ;;  %v7530_v22 = vld [vmem:[%s7501_s27 + $0x30] sm:$0xff]  ;;  %v7533_v23 = vld [vmem:[%s7501_s27 + $0x38] sm:$0xff]  ;;  %v207_v24 = vld [vmem:[%s7501_s27 + $0x40] sm:$0x3] }
  0x18   : > { %6178 = vmatprep.mubr.msk.f32.mxu0 %vm493_vm2, %v7524_v18  ;;  %6378 = vmatprep.mubr.msk.f32.mxu1 %vm493_vm2, %v401_v19  ;;  %v7540_v25 = vsel %vm307_vm1, %v309_v8, %v311_v13  ;;  %v403_v26 = vsel %vm398_vm3, %v400_v10, %v402_v14  ;;  %v7544_v27 = vsel %vm307_vm1, %v313_v15, %v314_v16  ;;  %v316_v28 = vrot.slane %v204_v17, 1  ;;  %v7547_v29 = vld [vmem:[%s7501_s27 + $0x48] sm:$0xff]  ;;  %v7563_v35 = vld [vmem:[%s7501_s27 + $0x50] sm:$0xff]  ;;  %v210_v41 = vld [vmem:[%s7501_s27 + $0x58] sm:$0x3] }
  0x19   : > { %6179 = vmatmul.mubr.msk.f32.vlgmr.msra.gmra.mrb[0].mxu0 %vm493_vm2, %v7540_v25  ;;  %6379 = vmatmul.mubr.msk.f32.vlgmr.msra.gmra.mrb[0].mxu1 %vm493_vm2, %v403_v26  ;;  %v7558_v31 = vsel %vm398_vm3, %v404_v20, %v405_v21  ;;  %v407_v32 = vrot.slane %v204_v17, 2  ;;  %v318_v33 = vrot.slane %v7530_v22, 1  ;;  %v319_v34 = vrot.slane %v7533_v23, 1  ;;  %v7590_v46 = vld [vmem:[%s7501_s27 + $0x60] sm:$0xff]  ;;  %v7593_v47 = vld [vmem:[%s7501_s27 + $0x68] sm:$0xff]  ;;  %v7631_v63 = vld [vmem:[%s7501_s27 + $0x78] sm:$0xff] }
  0x1a   : > { %9617 = vst [vmem:[#allocation2_spill] sm:$0xff] %v7558_v31  ;;  %6227 = vmatpush3.msk.msra.mxu0 %vm558_vm0, %v490_v2  ;;  %6427 = vmatpush3.msk.msra.mxu1 %vm558_vm0, %v5141_v3  ;;  %v7573_v37 = vsel %vm307_vm1, %v314_v16, %v316_v28  ;;  %v409_v38 = vrot.slane %v7530_v22, 2  ;;  %v410_v39 = vrot.slane %v7533_v23, 2  ;;  %v321_v40 = vrot.slane %v207_v24, 1  ;;  %v213_v62 = vld [vmem:[%s7501_s27 + $0x70] sm:$0x3] }
  0x1b   : > { %6181 = vmatprep.mubr.msk.f32.mxu0 %vm493_vm2, %v7544_v27  ;;  %6381 = vmatprep.mubr.msk.f32.mxu1 %vm493_vm2, %v7558_v31  ;;  %v7583_v42 = vsel %vm398_vm3, %v405_v21, %v407_v32  ;;  %v7586_v43 = vsel %vm307_vm1, %v318_v33, %v319_v34  ;;  %v412_v44 = vrot.slane %v207_v24, 2  ;;  %v323_v45 = vrot.slane %v7547_v29, 1  ;;  %v7634_v0 = vld [vmem:[%s7501_s27 + $0x80] sm:$0xff]  ;;  %v216_v9 = vld [vmem:[%s7501_s27 + $0x88] sm:$0x3]  ;;  %v7662_v16 = vld [vmem:[%s7501_s27 + $0x90] sm:$0xff] }
  0x1c   : > { %9618 = vst [vmem:[#allocation3_spill] sm:$0xff] %v7583_v42  ;;  %v7596_v48 = vsel %vm398_vm3, %v409_v38, %v410_v39  ;;  %v324_v49 = vrot.slane %v7563_v35, 1  ;;  %v414_v50 = vrot.slane %v7547_v29, 2  ;;  %6276 = vmatprep.subr.msk.mxu0 %vm558_vm0, %v7552_v30  ;;  %6476 = vmatprep.subr.msk.mxu1 %vm558_vm0, %v7568_v36  ;;  %v415_v51 = vrot.slane %v7563_v35, 2  ;;  %9624 = vst [vmem:[#allocation9_spill] sm:$0xff] %v7662_v16  ;;  %v7665_v17 = vld [vmem:[%s7501_s27 + $0x98] sm:$0xff] }
  0x1d   : > { %9619 = vst [vmem:[#allocation4_spill] sm:$0xff] %v7596_v48  ;;  %6182 = vmatmul.mubr.msk.f32.gmra.mrb[2].mxu0 %vm493_vm2, %v7573_v37  ;;  %6382 = vmatmul.mubr.msk.f32.gmra.mrb[2].mxu1 %vm493_vm2, %v7583_v42  ;;  %v326_v52 = vrot.slane %v210_v41, 1  ;;  %v417_v53 = vrot.slane %v210_v41, 2  ;;  %v7614_v54 = vsel %vm307_vm1, %v319_v34, %v321_v40  ;;  %v7617_v55 = vsel %vm398_vm3, %v410_v39, %v412_v44  ;;  %v219_v39 = vld [vmem:[%s7501_s27 + $0xa0] sm:$0x3]  ;;  %v7693_v40 = vld [vmem:[%s7501_s27 + $0xa8] sm:$0xff] }
  0x1e   : > { %6184 = vmatprep.mubr.msk.f32.mxu0 %vm493_vm2, %v7586_v43  ;;  %6384 = vmatprep.mubr.msk.f32.mxu1 %vm493_vm2, %v7596_v48  ;;  %9620 = vst [vmem:[#allocation5_spill] sm:$0xff] %v7617_v55  ;;  %v328_v56 = vrot.slane %v7590_v46, 1  ;;  %v329_v57 = vrot.slane %v7593_v47, 1  ;;  %v7622_v58 = vsel %vm307_vm1, %v323_v45, %v324_v49  ;;  %v7625_v59 = vsel %vm398_vm3, %v414_v50, %v415_v51  ;;  %v7696_v41 = vld [vmem:[%s7501_s27 + $0xb0] sm:$0xff]  ;;  %v7848_v42 = vld [vmem:[%s7501_s27 + $0x120] sm:$0xff] }
  0x1f   : > { %9621 = vst [vmem:[#allocation6_spill] sm:$0xff] %v7625_v59  ;;  %v419_v60 = vrot.slane %v7590_v46, 2  ;;  %v420_v61 = vrot.slane %v7593_v47, 2  ;;  %v7641_v1 = vsel %vm307_vm1, %v324_v49, %v326_v52  ;;  %v7644_v2 = vsel %vm398_vm3, %v415_v51, %v417_v53  ;;  %9625 = vst [vmem:[#allocation10_spill] sm:$0xff] %v7665_v17  ;;  %v222_v53 = vld [vmem:[%s7501_s27 + $0xb8] sm:$0x3] }
  0x20   : > { %9622 = vst [vmem:[#allocation7_spill] sm:$0xff] %v7644_v2  ;;  %v7651_v3 = vsel %vm307_vm1, %v328_v56, %v329_v57  ;;  %v331_v6 = vrot.slane %v213_v62, 1  ;;  %v422_v7 = vrot.slane %v213_v62, 2  ;;  %v333_v8 = vrot.slane %v7631_v63, 1  ;;  %9628 = vst [vmem:[#allocation13_spill] sm:$0xff] %v7693_v40  ;;  %v7724_v62 = vld [vmem:[%s7501_s27 + $0xc0] sm:$0xff] }
  0x21   : > { %6185 = vmatmul.mubr.msk.f32.gmra.mrb[4].mxu0 %vm493_vm2, %v7614_v54  ;;  %6385 = vmatmul.mubr.msk.f32.gmra.mrb[4].mxu1 %vm493_vm2, %v7617_v55  ;;  %v7656_v10 = vsel %vm398_vm3, %v419_v60, %v420_v61  ;;  %v334_v13 = vrot.slane %v7634_v0, 1  ;;  %v424_v14 = vrot.slane %v7631_v63, 2  ;;  %v425_v15 = vrot.slane %v7634_v0, 2  ;;  %9629 = vst [vmem:[#allocation14_spill] sm:$0xff] %v7696_v41  ;;  %9632 = vst [vmem:[#allocation17_spill] sm:$0xff] %v7724_v62 }
  0x22   : > { %6187 = vmatprep.mubr.msk.f32.mxu0 %vm493_vm2, %v7622_v58  ;;  %6387 = vmatprep.mubr.msk.f32.mxu1 %vm493_vm2, %v7625_v59  ;;  %9623 = vst [vmem:[#allocation8_spill] sm:$0xff] %v7656_v10  ;;  %v336_v19 = vrot.slane %v216_v9, 1  ;;  %v427_v20 = vrot.slane %v216_v9, 2  ;;  %v7676_v21 = vsel %vm307_vm1, %v329_v57, %v331_v6  ;;  %v7679_v24 = vsel %vm398_vm3, %v420_v61, %v422_v7  ;;  %v7727_v6 = vld [vmem:[%s7501_s27 + $0xc8] sm:$0xff] }
  0x23   : > { %9626 = vst [vmem:[#allocation11_spill] sm:$0xff] %v7679_v24  ;;  %v338_v26 = vrot.slane %v7662_v16, 1  ;;  %v339_v28 = vrot.slane %v7665_v17, 1  ;;  %v7684_v32 = vsel %vm307_vm1, %v333_v8, %v334_v13  ;;  %v7687_v33 = vsel %vm398_vm3, %v424_v14, %v425_v15  ;;  %9633 = vst [vmem:[#allocation18_spill] sm:$0xff] %v7727_v6 }
  0x24   : > { %9627 = vst [vmem:[#allocation12_spill] sm:$0xff] %v7687_v33  ;;  %v429_v34 = vrot.slane %v7662_v16, 2  ;;  %v430_v38 = vrot.slane %v7665_v17, 2  ;;  %v7703_v44 = vsel %vm307_vm1, %v334_v13, %v336_v19  ;;  %v7706_v45 = vsel %vm398_vm3, %v425_v15, %v427_v20  ;;  %9649 = vst [vmem:[#allocation34_spill] sm:$0xff] %v7848_v42 }
  0x25   : > { %6188 = vmatmul.mubr.msk.f32.gmra.mrb[6].mxu0 %vm493_vm2, %v7641_v1  ;;  %6388 = vmatmul.mubr.msk.f32.gmra.mrb[6].mxu1 %vm493_vm2, %v7644_v2  ;;  %9630 = vst [vmem:[#allocation15_spill] sm:$0xff] %v7706_v45  ;;  %v7713_v49 = vsel %vm307_vm1, %v338_v26, %v339_v28  ;;  %v341_v50 = vrot.slane %v219_v39, 1  ;;  %v432_v51 = vrot.slane %v219_v39, 2  ;;  %v343_v52 = vrot.slane %v7693_v40, 1  ;;  %v7755_v39 = vld [vmem:[%s7501_s27 + $0xd8] sm:$0xff] }
  0x26   : > { %6190 = vmatprep.mubr.msk.f32.mxu0 %vm493_vm2, %v7651_v3  ;;  %6390 = vmatprep.mubr.msk.f32.mxu1 %vm493_vm2, %v7656_v10  ;;  %v7718_v56 = vsel %vm398_vm3, %v429_v34, %v430_v38  ;;  %v344_v57 = vrot.slane %v7696_v41, 1  ;;  %v434_v60 = vrot.slane %v7693_v40, 2  ;;  %v435_v61 = vrot.slane %v7696_v41, 2  ;;  %9636 = vst [vmem:[#allocation21_spill] sm:$0xff] %v7755_v39 }
  0x27   : > { %9631 = vst [vmem:[#allocation16_spill] sm:$0xff] %v7718_v56  ;;  %v346_v7 = vrot.slane %v222_v53, 1  ;;  %v437_v8 = vrot.slane %v222_v53, 2  ;;  %v7738_v9 = vsel %vm307_vm1, %v339_v28, %v341_v50  ;;  %v7741_v13 = vsel %vm398_vm3, %v430_v38, %v432_v51  ;;  %v225_v28 = vld [vmem:[%s7501_s27 + $0xd0] sm:$0x3]  ;;  %v7758_v38 = vld [vmem:[%s7501_s27 + $0xe0] sm:$0xff] }
  0x28   : > { %9634 = vst [vmem:[#allocation19_spill] sm:$0xff] %v7741_v13  ;;  %v348_v14 = vrot.slane %v7724_v62, 1  ;;  %v349_v15 = vrot.slane %v7727_v6, 1  ;;  %v7746_v19 = vsel %vm307_vm1, %v343_v52, %v344_v57  ;;  %v7749_v20 = vsel %vm398_vm3, %v434_v60, %v435_v61  ;;  %9637 = vst [vmem:[#allocation22_spill] sm:$0xff] %v7758_v38 }
  0x29   : > { %6191 = vmatmul.mubr.msk.f32.gmra.mrb[8].mxu0 %vm493_vm2, %v7676_v21  ;;  %6391 = vmatmul.mubr.msk.f32.gmra.mrb[8].mxu1 %vm493_vm2, %v7679_v24  ;;  %9635 = vst [vmem:[#allocation20_spill] sm:$0xff] %v7749_v20  ;;  %v439_v26 = vrot.slane %v7724_v62, 2  ;;  %v440_v34 = vrot.slane %v7727_v6, 2  ;;  %v7765_v50 = vsel %vm307_vm1, %v344_v57, %v346_v7  ;;  %v7768_v51 = vsel %vm398_vm3, %v435_v61, %v437_v8 }
  0x2a   : > { %6193 = vmatprep.mubr.msk.f32.mxu0 %vm493_vm2, %v7684_v32  ;;  %6393 = vmatprep.mubr.msk.f32.mxu1 %vm493_vm2, %v7687_v33  ;;  %9638 = vst [vmem:[#allocation23_spill] sm:$0xff] %v7768_v51  ;;  %v7775_v52 = vsel %vm307_vm1, %v348_v14, %v349_v15  ;;  %v351_v53 = vrot.slane %v225_v28, 1  ;;  %v442_v60 = vrot.slane %v225_v28, 2  ;;  %v354_v61 = vrot.slane %v7758_v38, 1 }
  0x2b   : > { %v7780_v57 = vsel %vm398_vm3, %v439_v26, %v440_v34  ;;  %v444_v7 = vrot.slane %v7755_v39, 2  ;;  %v445_v8 = vrot.slane %v7758_v38, 2 }
  0x2c   : > { %9639 = vst [vmem:[#allocation24_spill] sm:$0xff] %v7780_v57  ;;  %v7800_v28 = vsel %vm307_vm1, %v349_v15, %v351_v53  ;;  %v7803_v33 = vsel %vm398_vm3, %v440_v34, %v442_v60  ;;  %v231_v15 = vld [vmem:[%s7501_s27 + $0x100] sm:$0x3]  ;;  %v7817_v53 = vld [vmem:[%s7501_s27 + $0x108] sm:$0xff]  ;;  %v7820_v34 = vld [vmem:[%s7501_s27 + $0x110] sm:$0xff] }
  0x2d   : > { %6194 = vmatmul.mubr.msk.f32.gmra.mrb[10].mxu0 %vm493_vm2, %v7703_v44  ;;  %6394 = vmatmul.mubr.msk.f32.gmra.mrb[10].mxu1 %vm493_vm2, %v7706_v45  ;;  %v7786_v45 = vld [vmem:[%s7501_s27 + $0xf0] sm:$0xff]  ;;  %9642 = vst [vmem:[#allocation27_spill] sm:$0xff] %v7803_v33  ;;  %9644 = vst [vmem:[#allocation29_spill] sm:$0xff] %v7817_v53  ;;  %v361_v59 = vrot.slane %v231_v15, 1  ;;  %v452_v55 = vrot.slane %v231_v15, 2  ;;  %v363_v48 = vrot.slane %v7817_v53, 1 }
  0x2e   : > { %6196 = vmatprep.mubr.msk.f32.mxu0 %vm493_vm2, %v7713_v49  ;;  %6396 = vmatprep.mubr.msk.f32.mxu1 %vm493_vm2, %v7718_v56  ;;  %v353_v56 = vrot.slane %v7755_v39, 1  ;;  %9640 = vst [vmem:[#allocation25_spill] sm:$0xff] %v7786_v45  ;;  %v358_v24 = vrot.slane %v7786_v45, 1  ;;  %v449_v2 = vrot.slane %v7786_v45, 2  ;;  %9645 = vst [vmem:[#allocation30_spill] sm:$0xff] %v7820_v34 }
  0x31   : > { %6197 = vmatmul.mubr.msk.f32.gmra.mrb[12].mxu0 %vm493_vm2, %v7738_v9  ;;  %6397 = vmatmul.mubr.msk.f32.gmra.mrb[12].mxu1 %vm493_vm2, %v7741_v13  ;;  %v228_v13 = vld [vmem:[%s7501_s27 + $0xe8] sm:$0x3] }
  0x32   : > { %6199 = vmatprep.mubr.msk.f32.mxu0 %vm493_vm2, %v7746_v19  ;;  %6399 = vmatprep.mubr.msk.f32.mxu1 %vm493_vm2, %v7749_v20  ;;  %v7789_v20 = vld [vmem:[%s7501_s27 + $0xf8] sm:$0xff]  ;;  %v356_v14 = vrot.slane %v228_v13, 1  ;;  %v447_v26 = vrot.slane %v228_v13, 2  ;;  %v7811_v13 = vsel %vm398_vm3, %v444_v7, %v445_v8 }
  0x33   : > { %9641 = vst [vmem:[#allocation26_spill] sm:$0xff] %v7789_v20  ;;  %v359_v10 = vrot.slane %v7789_v20, 1  ;;  %9643 = vst [vmem:[#allocation28_spill] sm:$0xff] %v7811_v13 }
  0x34   : > { %v7830_v60 = vsel %vm398_vm3, %v445_v8, %v447_v26  ;;  %v364_v8 = vrot.slane %v7820_v34, 1  ;;  %v455_v26 = vrot.slane %v7820_v34, 2  ;;  %v368_v34 = vrot.slane %v7848_v42, 1 }
  0x35   : > { %6200 = vmatmul.mubr.msk.f32.gmra.mrb[14].mxu0 %vm493_vm2, %v7765_v50  ;;  %6400 = vmatmul.mubr.msk.f32.gmra.mrb[14].mxu1 %vm493_vm2, %v7768_v51  ;;  %v7808_v51 = vsel %vm307_vm1, %v353_v56, %v354_v61  ;;  %v7827_v56 = vsel %vm307_vm1, %v354_v61, %v356_v14  ;;  %9646 = vst [vmem:[#allocation31_spill] sm:$0xff] %v7830_v60  ;;  %v454_v14 = vrot.slane %v7817_v53, 2 }
  0x36   : > { %6202 = vmatprep.mubr.msk.f32.mxu0 %vm493_vm2, %v7775_v52  ;;  %6402 = vmatprep.mubr.msk.f32.mxu1 %vm493_vm2, %v7780_v57  ;;  %v450_v57 = vrot.slane %v7789_v20, 2  ;;  %v7837_v7 = vsel %vm307_vm1, %v358_v24, %v359_v10  ;;  %v7862_v15 = vsel %vm307_vm1, %v359_v10, %v361_v59  ;;  %v459_v20 = vrot.slane %v7848_v42, 2  ;;  %v237_v59 = vld [vmem:[%s7501_s27 + $0x130] sm:$0x3]  ;;  %v7879_v10 = vld [vmem:[%s7501_s27 + $0x138] sm:$0xff] }
  0x37   : > { %9647 = vst [vmem:[#allocation32_spill] sm:$0xff] %v7837_v7  ;;  %9651 = vst [vmem:[#allocation36_spill] sm:$0xff] %v7862_v15  ;;  %v462_v42 = vrot.slane %v237_v59, 2 }
  0x38   : > { %v7842_v61 = vsel %vm398_vm3, %v449_v2, %v450_v57  ;;  %v7865_v31 = vsel %vm398_vm3, %v450_v57, %v452_v55  ;;  %9655 = vst [vmem:[#allocation40_spill] sm:$0xff] %v7879_v10  ;;  %v7882_v55 = vld [vmem:[%s7501_s27 + $0x140] sm:$0xff] }
  0x39   : > { %6203 = vmatmul.mubr.msk.f32.gmra.mrb[16].mxu0 %vm493_vm2, %v7800_v28  ;;  %6403 = vmatmul.mubr.msk.f32.gmra.mrb[16].mxu1 %vm493_vm2, %v7803_v33  ;;  %v234_v33 = vld [vmem:[%s7501_s27 + $0x118] sm:$0x3]  ;;  %9648 = vst [vmem:[#allocation33_spill] sm:$0xff] %v7842_v61  ;;  %9652 = vst [vmem:[#allocation37_spill] sm:$0xff] %v7865_v31 }
  0x3a   : > { %6205 = vmatprep.mubr.msk.f32.mxu0 %vm493_vm2, %v7808_v51  ;;  %6405 = vmatprep.mubr.msk.f32.mxu1 %vm493_vm2, %v7811_v13  ;;  %v7851_v13 = vld [vmem:[%s7501_s27 + $0x128] sm:$0xff]  ;;  %v366_v2 = vrot.slane %v234_v33, 1  ;;  %v457_v24 = vrot.slane %v234_v33, 2  ;;  %v7873_v33 = vsel %vm398_vm3, %v454_v14, %v455_v26  ;;  %9656 = vst [vmem:[#allocation41_spill] sm:$0xff] %v7882_v55 }
  0x3b   : > { %9650 = vst [vmem:[#allocation35_spill] sm:$0xff] %v7851_v13  ;;  %v369_v53 = vrot.slane %v7851_v13, 1  ;;  %9654 = vst [vmem:[#allocation39_spill] sm:$0xff] %v7873_v33 }
  0x3c   : > { %v7892_v57 = vsel %vm398_vm3, %v455_v26, %v457_v24  ;;  %v374_v26 = vrot.slane %v7882_v55, 1  ;;  %v465_v24 = vrot.slane %v7882_v55, 2 }
  0x3d   : > { %6206 = vmatmul.mubr.msk.f32.gmra.mrb[18].mxu0 %vm493_vm2, %v7827_v56  ;;  %6406 = vmatmul.mubr.msk.f32.gmra.mrb[18].mxu1 %vm493_vm2, %v7830_v60  ;;  %v7870_v60 = vsel %vm307_vm1, %v363_v48, %v364_v8  ;;  %v7889_v48 = vsel %vm307_vm1, %v364_v8, %v366_v2  ;;  %9658 = vst [vmem:[#allocation43_spill] sm:$0xff] %v7892_v57  ;;  %v464_v2 = vrot.slane %v7879_v10, 2 }
  0x3e   : > { %6208 = vmatprep.mubr.msk.f32.mxu0 %vm493_vm2, %v7837_v7  ;;  %6408 = vmatprep.mubr.msk.f32.mxu1 %vm493_vm2, %v7842_v61  ;;  %9653 = vst [vmem:[#allocation38_spill] sm:$0xff] %v7870_v60  ;;  %v460_v61 = vrot.slane %v7851_v13, 2  ;;  %9657 = vst [vmem:[#allocation42_spill] sm:$0xff] %v7889_v48  ;;  %v7899_v14 = vsel %vm307_vm1, %v368_v34, %v369_v53  ;;  %v371_v13 = vrot.slane %v237_v59, 1  ;;  %v243_v7 = vld [vmem:[%s7501_s27 + $0x160] sm:$0x3] }
  0x3f   : > { %9659 = vst [vmem:[#allocation44_spill] sm:$0xff] %v7899_v14 }
  0x40   : > { %v7904_v8 = vsel %vm398_vm3, %v459_v20, %v460_v61  ;;  %v7924_v59 = vsel %vm307_vm1, %v369_v53, %v371_v13  ;;  %v7927_v55 = vsel %vm398_vm3, %v460_v61, %v462_v42  ;;  %v7941_v13 = vld [vmem:[%s7501_s27 + $0x168] sm:$0xff]  ;;  %v7944_v42 = vld [vmem:[%s7501_s27 + $0x170] sm:$0xff] }
  0x41   : > { %6209 = vmatmul.mubr.msk.f32.gmra.mrb[20].mxu0 %vm493_vm2, %v7862_v15  ;;  %6409 = vmatmul.mubr.msk.f32.gmra.mrb[20].mxu1 %vm493_vm2, %v7865_v31  ;;  %v373_v15 = vrot.slane %v7879_v10, 1  ;;  %v240_v31 = vld [vmem:[%s7501_s27 + $0x148] sm:$0x3]  ;;  %9660 = vst [vmem:[#allocation45_spill] sm:$0xff] %v7904_v8  ;;  %9663 = vst [vmem:[#allocation48_spill] sm:$0xff] %v7924_v59 }
  0x42   : > { %6211 = vmatprep.mubr.msk.f32.mxu0 %vm493_vm2, %v7870_v60  ;;  %6411 = vmatprep.mubr.msk.f32.mxu1 %vm493_vm2, %v7873_v33  ;;  %v7910_v60 = vld [vmem:[%s7501_s27 + $0x150] sm:$0xff]  ;;  %v7913_v33 = vld [vmem:[%s7501_s27 + $0x158] sm:$0xff]  ;;  %v376_v20 = vrot.slane %v240_v31, 1  ;;  %v467_v34 = vrot.slane %v240_v31, 2  ;;  %9664 = vst [vmem:[#allocation49_spill] sm:$0xff] %v7927_v55  ;;  %v7935_v31 = vsel %vm398_vm3, %v464_v2, %v465_v24  ;;  %9666 = vst [vmem:[#allocation51_spill] sm:$0xff] %v7941_v13 }
  0x43   : > { %9661 = vst [vmem:[#allocation46_spill] sm:$0xff] %v7910_v60  ;;  %9662 = vst [vmem:[#allocation47_spill] sm:$0xff] %v7913_v33  ;;  %v378_v10 = vrot.slane %v7910_v60, 1  ;;  %v381_v2 = vrot.slane %v243_v7, 1 }
  0x44   : > { %9665 = vst [vmem:[#allocation50_spill] sm:$0xff] %v7935_v31  ;;  %9667 = vst [vmem:[#allocation52_spill] sm:$0xff] %v7944_v42  ;;  %v7951_v53 = vsel %vm307_vm1, %v374_v26, %v376_v20  ;;  %v7954_v61 = vsel %vm398_vm3, %v465_v24, %v467_v34  ;;  %v474_v24 = vrot.slane %v7941_v13, 2  ;;  %v475_v20 = vrot.slane %v7944_v42, 2  ;;  %v246_v34 = vld [vmem:[%s7501_s27 + $0x178] sm:$0x3] }
  0x45   : > { %6212 = vmatmul.mubr.msk.f32.gmra.mrb[22].mxu0 %vm493_vm2, %v7889_v48  ;;  %6412 = vmatmul.mubr.msk.f32.gmra.mrb[22].mxu1 %vm493_vm2, %v7892_v57  ;;  %v379_v48 = vrot.slane %v7913_v33, 1  ;;  %v7932_v57 = vsel %vm307_vm1, %v373_v15, %v374_v26  ;;  %9668 = vst [vmem:[#allocation53_spill] sm:$0xff] %v7954_v61  ;;  %v384_v26 = vrot.slane %v7944_v42, 1 }
  0x46   : > { %6214 = vmatprep.mubr.msk.f32.mxu0 %vm493_vm2, %v7899_v14  ;;  %6414 = vmatprep.mubr.msk.f32.mxu1 %vm493_vm2, %v7904_v8  ;;  %v469_v14 = vrot.slane %v7910_v60, 2  ;;  %v470_v8 = vrot.slane %v7913_v33, 2  ;;  %v472_v33 = vrot.slane %v243_v7, 2  ;;  %v383_v60 = vrot.slane %v7941_v13, 1 }
  0x47   : > { %v7961_v15 = vsel %vm307_vm1, %v378_v10, %v379_v48  ;;  %v7980_v7 = vsel %vm307_vm1, %v379_v48, %v381_v2  ;;  %v7989_v13 = vsel %vm398_vm3, %v474_v24, %v475_v20  ;;  %v8020_v48 = vld [vmem:[%s9482_s1 + $0xc] sm:$0xf]  ;;  %v9681_v2 = vld [vmem:[#allocation34_spill] sm:$0xff] }
  0x48   : > { %9669 = vst [vmem:[#allocation54_spill] sm:$0xff] %v7961_v15  ;;  %v7983_v10 = vsel %vm398_vm3, %v470_v8, %v472_v33  ;;  %v7986_v42 = vsel %vm307_vm1, %v383_v60, %v384_v26  ;;  %9672 = vst [vmem:[#allocation57_spill] sm:$0xff] %v7989_v13  ;;  %v9683_v24 = vld [vmem:[#allocation35_spill] sm:$0xff] }
  0x49   : > { %6215 = vmatmul.mubr.msk.f32.gmra.mrb[24].mxu0 %vm493_vm2, %v7924_v59  ;;  %6415 = vmatmul.mubr.msk.f32.gmra.mrb[24].mxu1 %vm493_vm2, %v7927_v55  ;;  %v7965_v55 = vsel %vm398_vm3, %v469_v14, %v470_v8  ;;  %9671 = vst [vmem:[#allocation56_spill] sm:$0xff] %v7983_v10  ;;  %v386_v14 = vrot.slane %v246_v34, 1  ;;  %v8025_v8 = vld [vmem:[%s9482_s1 + $0x1c] sm:$0xf] }
  0x4a   : > { %6217 = vmatprep.mubr.msk.f32.mxu0 %vm493_vm2, %v7932_v57  ;;  %6417 = vmatprep.mubr.msk.f32.mxu1 %vm493_vm2, %v7935_v31  ;;  %9670 = vst [vmem:[#allocation55_spill] sm:$0xff] %v7965_v55  ;;  %v477_v31 = vrot.slane %v246_v34, 2  ;;  %v9685_v34 = vld [vmem:[#allocation41_spill] sm:$0xff] }
  0x4b   : > { %v8000_v33 = vsel %vm307_vm1, %v384_v26, %v386_v14  ;;  %v9682_v26 = vld [vmem:[#allocation44_spill] sm:$0xff]  ;;  %v9686_v14 = vld [vmem:[#allocation46_spill] sm:$0xff] }
  0x4c   : > { %v8003_v60 = vsel %vm398_vm3, %v475_v20, %v477_v31  ;;  %v9680_v31 = vld [vmem:[#allocation42_spill] sm:$0xff]  ;;  %v9684_v20 = vld [vmem:[#allocation40_spill] sm:$0xff] }
  0x4d   : > { %6218 = vmatmul.mubr.msk.f32.gmra.mrb[26].mxu0 %vm493_vm2, %v7951_v53  ;;  %6418 = vmatmul.mubr.msk.f32.gmra.mrb[26].mxu1 %vm493_vm2, %v7954_v61  ;;  %9673 = vst [vmem:[#allocation58_spill] sm:$0xff] %v8003_v60  ;;  %v8171_v61 = vld [vmem:[%s9482_s1 + $0x34] sm:$0xf] }
  0x4e   : > { %6220 = vmatprep.mubr.msk.f32.mxu0 %vm493_vm2, %v7961_v15  ;;  %6420 = vmatprep.mubr.msk.f32.mxu1 %vm493_vm2, %v7965_v55  ;;  %v8166_v55 = vld [vmem:[%s9482_s1 + $0x24] sm:$0xf] }
  0x51   : > { %6221 = vmatmul.mubr.msk.f32.gmra.mrb[28].mxu0 %vm493_vm2, %v7980_v7  ;;  %6421 = vmatmul.mubr.msk.f32.gmra.mrb[28].mxu1 %vm493_vm2, %v7983_v10  ;;  %v9689_v10 = vld [vmem:[#allocation52_spill] sm:$0xff] }
  0x52   : > { %6223 = vmatprep.mubr.msk.f32.mxu0 %vm493_vm2, %v7986_v42  ;;  %6423 = vmatprep.mubr.msk.f32.mxu1 %vm493_vm2, %v7989_v13  ;;  %v9688_v13 = vld [vmem:[#allocation51_spill] sm:$0xff] }
  0x55   : > { %6224 = vmatmul.mubr.msk.f32.gmra.mrb[30].mxu0 %vm493_vm2, %v8000_v33  ;;  %6424 = vmatmul.mubr.msk.f32.gmra.mrb[30].mxu1 %vm493_vm2, %v8003_v60  ;;  %v9687_v60 = vld [vmem:[#allocation47_spill] sm:$0xff] }
  0x56   : > { %6228 = vmatprep.mubr.msk.f32.mxu0 %vm493_vm2, %v7504_v4  ;;  %6428 = vmatprep.mubr.msk.f32.mxu1 %vm493_vm2, %v7524_v18  ;;  %v9674_v4 = vld [vmem:[#allocation32_spill] sm:$0xff] }
  0x57   : > { %v9676_v18 = vld [vmem:[#allocation36_spill] sm:$0xff] }
  0x59   : > { %6229 = vmatmul.mubr.msk.f32.vlgmr.msra.gmra.mrb[0].mxu0 %vm493_vm2, %v7507_v5  ;;  %6429 = vmatmul.mubr.msk.f32.vlgmr.msra.gmra.mrb[0].mxu1 %vm493_vm2, %v7540_v25  ;;  %v9675_v5 = vld [vmem:[#allocation26_spill] sm:$0xff]  ;;  %v9677_v25 = vld [vmem:[#allocation29_spill] sm:$0xff] }
  0x5a   : > { %6277 = vmatpush3.msk.msra.mxu0 %vm558_vm0, %v7552_v30  ;;  %6477 = vmatpush3.msk.msra.mxu1 %vm558_vm0, %v7568_v36  ;;  %v9678_v30 = vld [vmem:[#allocation38_spill] sm:$0xff] }
  0x5b   : > { %6231 = vmatprep.mubr.msk.f32.mxu0 %vm493_vm2, %v7515_v11  ;;  %6431 = vmatprep.mubr.msk.f32.mxu1 %vm493_vm2, %v7544_v27  ;;  %v9679_v36 = vld [vmem:[#allocation30_spill] sm:$0xff] }
  0x5c   : > { %6326 = vmatprep.subr.msk.mxu0 %vm558_vm0, %v8020_v48  ;;  %6526 = vmatprep.subr.msk.mxu1 %vm558_vm0, %v8025_v8 }
  0x5d   : > { %6232 = vmatmul.mubr.msk.f32.gmra.mrb[2].mxu0 %vm493_vm2, %v7518_v12  ;;  %6432 = vmatmul.mubr.msk.f32.gmra.mrb[2].mxu1 %vm493_vm2, %v7573_v37 }
  0x5e   : > { %6234 = vmatprep.mubr.msk.f32.mxu0 %vm493_vm2, %v7530_v22  ;;  %6434 = vmatprep.mubr.msk.f32.mxu1 %vm493_vm2, %v7586_v43 }
  0x61   : > { %6235 = vmatmul.mubr.msk.f32.gmra.mrb[4].mxu0 %vm493_vm2, %v7533_v23  ;;  %6435 = vmatmul.mubr.msk.f32.gmra.mrb[4].mxu1 %vm493_vm2, %v7614_v54 }
  0x62   : > { %6237 = vmatprep.mubr.msk.f32.mxu0 %vm493_vm2, %v7547_v29  ;;  %6437 = vmatprep.mubr.msk.f32.mxu1 %vm493_vm2, %v7622_v58 }
  0x65   : > { %6238 = vmatmul.mubr.msk.f32.gmra.mrb[6].mxu0 %vm493_vm2, %v7563_v35  ;;  %6438 = vmatmul.mubr.msk.f32.gmra.mrb[6].mxu1 %vm493_vm2, %v7641_v1 }
  0x66   : > { %6240 = vmatprep.mubr.msk.f32.mxu0 %vm493_vm2, %v7590_v46  ;;  %6440 = vmatprep.mubr.msk.f32.mxu1 %vm493_vm2, %v7651_v3 }
  0x69   : > { %6241 = vmatmul.mubr.msk.f32.gmra.mrb[8].mxu0 %vm493_vm2, %v7593_v47  ;;  %6441 = vmatmul.mubr.msk.f32.gmra.mrb[8].mxu1 %vm493_vm2, %v7676_v21 }
  0x6a   : > { %6243 = vmatprep.mubr.msk.f32.mxu0 %vm493_vm2, %v7631_v63  ;;  %6443 = vmatprep.mubr.msk.f32.mxu1 %vm493_vm2, %v7684_v32 }
  0x6d   : > { %6244 = vmatmul.mubr.msk.f32.gmra.mrb[10].mxu0 %vm493_vm2, %v7634_v0  ;;  %6444 = vmatmul.mubr.msk.f32.gmra.mrb[10].mxu1 %vm493_vm2, %v7703_v44 }
  0x6e   : > { %6246 = vmatprep.mubr.msk.f32.mxu0 %vm493_vm2, %v7662_v16  ;;  %6446 = vmatprep.mubr.msk.f32.mxu1 %vm493_vm2, %v7713_v49 }
  0x71   : > { %6247 = vmatmul.mubr.msk.f32.gmra.mrb[12].mxu0 %vm493_vm2, %v7665_v17  ;;  %6447 = vmatmul.mubr.msk.f32.gmra.mrb[12].mxu1 %vm493_vm2, %v7738_v9 }
  0x72   : > { %6249 = vmatprep.mubr.msk.f32.mxu0 %vm493_vm2, %v7693_v40  ;;  %6449 = vmatprep.mubr.msk.f32.mxu1 %vm493_vm2, %v7746_v19 }
  0x75   : > { %6250 = vmatmul.mubr.msk.f32.gmra.mrb[14].mxu0 %vm493_vm2, %v7696_v41  ;;  %6450 = vmatmul.mubr.msk.f32.gmra.mrb[14].mxu1 %vm493_vm2, %v7765_v50 }
  0x76   : > { %6252 = vmatprep.mubr.msk.f32.mxu0 %vm493_vm2, %v7724_v62  ;;  %6452 = vmatprep.mubr.msk.f32.mxu1 %vm493_vm2, %v7775_v52 }
  0x79   : > { %6253 = vmatmul.mubr.msk.f32.gmra.mrb[16].mxu0 %vm493_vm2, %v7727_v6  ;;  %6453 = vmatmul.mubr.msk.f32.gmra.mrb[16].mxu1 %vm493_vm2, %v7800_v28 }
  0x7a   : > { %6255 = vmatprep.mubr.msk.f32.mxu0 %vm493_vm2, %v7755_v39  ;;  %6455 = vmatprep.mubr.msk.f32.mxu1 %vm493_vm2, %v7808_v51 }
  0x7d   : > { %6256 = vmatmul.mubr.msk.f32.gmra.mrb[18].mxu0 %vm493_vm2, %v7758_v38  ;;  %6456 = vmatmul.mubr.msk.f32.gmra.mrb[18].mxu1 %vm493_vm2, %v7827_v56 }
  0x7e   : > { %6258 = vmatprep.mubr.msk.f32.mxu0 %vm493_vm2, %v7786_v45  ;;  %6458 = vmatprep.mubr.msk.f32.mxu1 %vm493_vm2, %v9674_v4 }
  0x81   : > { %6259 = vmatmul.mubr.msk.f32.gmra.mrb[20].mxu0 %vm493_vm2, %v9675_v5  ;;  %6459 = vmatmul.mubr.msk.f32.gmra.mrb[20].mxu1 %vm493_vm2, %v9676_v18 }
  0x82   : > { %6261 = vmatprep.mubr.msk.f32.mxu0 %vm493_vm2, %v9677_v25  ;;  %6461 = vmatprep.mubr.msk.f32.mxu1 %vm493_vm2, %v9678_v30 }
  0x85   : > { %6262 = vmatmul.mubr.msk.f32.gmra.mrb[22].mxu0 %vm493_vm2, %v9679_v36  ;;  %6462 = vmatmul.mubr.msk.f32.gmra.mrb[22].mxu1 %vm493_vm2, %v9680_v31 }
  0x86   : > { %6264 = vmatprep.mubr.msk.f32.mxu0 %vm493_vm2, %v9681_v2  ;;  %6464 = vmatprep.mubr.msk.f32.mxu1 %vm493_vm2, %v9682_v26 }
  0x89   : > { %6265 = vmatmul.mubr.msk.f32.gmra.mrb[24].mxu0 %vm493_vm2, %v9683_v24  ;;  %6465 = vmatmul.mubr.msk.f32.gmra.mrb[24].mxu1 %vm493_vm2, %v7924_v59 }
  0x8a   : > { %6267 = vmatprep.mubr.msk.f32.mxu0 %vm493_vm2, %v9684_v20  ;;  %6467 = vmatprep.mubr.msk.f32.mxu1 %vm493_vm2, %v7932_v57 }
  0x8d   : > { %6268 = vmatmul.mubr.msk.f32.gmra.mrb[26].mxu0 %vm493_vm2, %v9685_v34  ;;  %6468 = vmatmul.mubr.msk.f32.gmra.mrb[26].mxu1 %vm493_vm2, %v7951_v53 }
  0x8e   : > { %6270 = vmatprep.mubr.msk.f32.mxu0 %vm493_vm2, %v9686_v14  ;;  %6470 = vmatprep.mubr.msk.f32.mxu1 %vm493_vm2, %v7961_v15 }
  0x91   : > { %6271 = vmatmul.mubr.msk.f32.gmra.mrb[28].mxu0 %vm493_vm2, %v9687_v60  ;;  %6471 = vmatmul.mubr.msk.f32.gmra.mrb[28].mxu1 %vm493_vm2, %v7980_v7 }
  0x92   : > { %6273 = vmatprep.mubr.msk.f32.mxu0 %vm493_vm2, %v9688_v13  ;;  %6473 = vmatprep.mubr.msk.f32.mxu1 %vm493_vm2, %v7986_v42 }
  0x95   : > { %6274 = vmatmul.mubr.msk.f32.gmra.mrb[30].mxu0 %vm493_vm2, %v9689_v10  ;;  %6474 = vmatmul.mubr.msk.f32.gmra.mrb[30].mxu1 %vm493_vm2, %v8000_v33 }
  0x96   : > { %6278 = vmatprep.mubr.msk.f32.mxu0 %vm493_vm2, %v7515_v11  ;;  %6478 = vmatprep.mubr.msk.f32.mxu1 %vm493_vm2, %v7544_v27  ;;  %v8274_v11 = vld [vmem:[%s7501_s27 + $0x180] sm:$0xff] }
  0x97   : > { %9690 = vst [vmem:[#allocation32_spill] sm:$0xff] %v8274_v11 }
  0x99   : > { %6279 = vmatmul.mubr.msk.f32.vlgmr.msra.gmra.mrb[0].mxu0 %vm493_vm2, %v7518_v12  ;;  %6479 = vmatmul.mubr.msk.f32.vlgmr.msra.gmra.mrb[0].mxu1 %vm493_vm2, %v7573_v37  ;;  %v8277_v12 = vld [vmem:[%s7501_s27 + $0x188] sm:$0xff] }
  0x9a   : > { %6327 = vmatpush3.msk.msra.mxu0 %vm558_vm0, %v8020_v48  ;;  %6527 = vmatpush3.msk.msra.mxu1 %vm558_vm0, %v8025_v8  ;;  %9691 = vst [vmem:[#allocation36_spill] sm:$0xff] %v8277_v12  ;;  %v8330_v48 = vld [vmem:[%s9482_s1 + $0x20] sm:$0xf]  ;;  %v8335_v8 = vld [vmem:[%s9482_s1 + $0x30] sm:$0xf] }
  0x9b   : > { %6281 = vmatprep.mubr.msk.f32.mxu0 %vm493_vm2, %v7530_v22  ;;  %6481 = vmatprep.mubr.msk.f32.mxu1 %vm493_vm2, %v7586_v43  ;;  %v388_v22 = vrot.slane %v8274_v11, 1 }
  0x9c   : > { %6576 = vmatprep.subr.msk.mxu0 %vm558_vm0, %v8166_v55  ;;  %6776 = vmatprep.subr.msk.mxu1 %vm558_vm0, %v8171_v61 }
  0x9d   : > { %6282 = vmatmul.mubr.msk.f32.gmra.mrb[2].mxu0 %vm493_vm2, %v7533_v23  ;;  %6482 = vmatmul.mubr.msk.f32.gmra.mrb[2].mxu1 %vm493_vm2, %v7614_v54  ;;  %v389_v23 = vrot.slane %v8277_v12, 1 }
  0x9e   : > { %6284 = vmatprep.mubr.msk.f32.mxu0 %vm493_vm2, %v7547_v29  ;;  %6484 = vmatprep.mubr.msk.f32.mxu1 %vm493_vm2, %v7622_v58  ;;  %v8290_v29 = vld [vmem:[%s7501_s27 + $0x190] sm:$0x3] }
  0xa1   : > { %6285 = vmatmul.mubr.msk.f32.gmra.mrb[4].mxu0 %vm493_vm2, %v7563_v35  ;;  %6485 = vmatmul.mubr.msk.f32.gmra.mrb[4].mxu1 %vm493_vm2, %v7641_v1  ;;  %v391_v35 = vrot.slane %v8290_v29, 1 }
  0xa2   : > { %6287 = vmatprep.mubr.msk.f32.mxu0 %vm493_vm2, %v7590_v46  ;;  %6487 = vmatprep.mubr.msk.f32.mxu1 %vm493_vm2, %v7651_v3  ;;  %v8302_v46 = vsel %vm307_vm1, %v388_v22, %v389_v23  ;;  %v9694_v22 = vld [vmem:[#allocation4_spill] sm:$0xff] }
  0xa5   : > { %6288 = vmatmul.mubr.msk.f32.gmra.mrb[6].mxu0 %vm493_vm2, %v7593_v47  ;;  %6488 = vmatmul.mubr.msk.f32.gmra.mrb[6].mxu1 %vm493_vm2, %v7676_v21  ;;  %v8313_v47 = vsel %vm307_vm1, %v389_v23, %v391_v35  ;;  %v9695_v23 = vld [vmem:[#allocation5_spill] sm:$0xff]  ;;  %v9698_v35 = vld [vmem:[#allocation8_spill] sm:$0xff] }
  0xa6   : > { %6290 = vmatprep.mubr.msk.f32.mxu0 %vm493_vm2, %v7631_v63  ;;  %6490 = vmatprep.mubr.msk.f32.mxu1 %vm493_vm2, %v7684_v32  ;;  %v9692_v63 = vld [vmem:[#allocation2_spill] sm:$0xff] }
  0xa9   : > { %6291 = vmatmul.mubr.msk.f32.gmra.mrb[8].mxu0 %vm493_vm2, %v7634_v0  ;;  %6491 = vmatmul.mubr.msk.f32.gmra.mrb[8].mxu1 %vm493_vm2, %v7703_v44  ;;  %v9693_v0 = vld [vmem:[#allocation3_spill] sm:$0xff] }
  0xaa   : > { %6293 = vmatprep.mubr.msk.f32.mxu0 %vm493_vm2, %v7662_v16  ;;  %6493 = vmatprep.mubr.msk.f32.mxu1 %vm493_vm2, %v7713_v49  ;;  %v9718_v16 = vld [vmem:[#allocation55_spill] sm:$0xff] }
  0xad   : > { %6294 = vmatmul.mubr.msk.f32.gmra.mrb[10].mxu0 %vm493_vm2, %v7665_v17  ;;  %6494 = vmatmul.mubr.msk.f32.gmra.mrb[10].mxu1 %vm493_vm2, %v7738_v9  ;;  %v9717_v17 = vld [vmem:[#allocation53_spill] sm:$0xff] }
  0xae   : > { %6296 = vmatprep.mubr.msk.f32.mxu0 %vm493_vm2, %v7693_v40  ;;  %6496 = vmatprep.mubr.msk.f32.mxu1 %vm493_vm2, %v7746_v19  ;;  %v9716_v40 = vld [vmem:[#allocation50_spill] sm:$0xff] }
  0xb1   : > { %6297 = vmatmul.mubr.msk.f32.gmra.mrb[12].mxu0 %vm493_vm2, %v7696_v41  ;;  %6497 = vmatmul.mubr.msk.f32.gmra.mrb[12].mxu1 %vm493_vm2, %v7765_v50  ;;  %v9715_v41 = vld [vmem:[#allocation49_spill] sm:$0xff] }
  0xb2   : > { %6299 = vmatprep.mubr.msk.f32.mxu0 %vm493_vm2, %v7724_v62  ;;  %6499 = vmatprep.mubr.msk.f32.mxu1 %vm493_vm2, %v7775_v52  ;;  %v9714_v62 = vld [vmem:[#allocation45_spill] sm:$0xff] }
  0xb5   : > { %6300 = vmatmul.mubr.msk.f32.gmra.mrb[14].mxu0 %vm493_vm2, %v7727_v6  ;;  %6500 = vmatmul.mubr.msk.f32.gmra.mrb[14].mxu1 %vm493_vm2, %v7800_v28  ;;  %v9713_v6 = vld [vmem:[#allocation43_spill] sm:$0xff] }
  0xb6   : > { %6302 = vmatprep.mubr.msk.f32.mxu0 %vm493_vm2, %v7755_v39  ;;  %6502 = vmatprep.mubr.msk.f32.mxu1 %vm493_vm2, %v7808_v51  ;;  %v9712_v39 = vld [vmem:[#allocation39_spill] sm:$0xff] }
  0xb9   : > { %6303 = vmatmul.mubr.msk.f32.gmra.mrb[16].mxu0 %vm493_vm2, %v7758_v38  ;;  %6503 = vmatmul.mubr.msk.f32.gmra.mrb[16].mxu1 %vm493_vm2, %v7827_v56  ;;  %v9711_v38 = vld [vmem:[#allocation37_spill] sm:$0xff] }
  0xba   : > { %6305 = vmatprep.mubr.msk.f32.mxu0 %vm493_vm2, %v7786_v45  ;;  %6505 = vmatprep.mubr.msk.f32.mxu1 %vm493_vm2, %v9674_v4  ;;  %v9710_v45 = vld [vmem:[#allocation33_spill] sm:$0xff] }
  0xbd   : > { %6306 = vmatmul.mubr.msk.f32.gmra.mrb[18].mxu0 %vm493_vm2, %v9675_v5  ;;  %6506 = vmatmul.mubr.msk.f32.gmra.mrb[18].mxu1 %vm493_vm2, %v9676_v18  ;;  %v9709_v5 = vld [vmem:[#allocation31_spill] sm:$0xff] }
  0xbe   : > { %6308 = vmatprep.mubr.msk.f32.mxu0 %vm493_vm2, %v9677_v25  ;;  %6508 = vmatprep.mubr.msk.f32.mxu1 %vm493_vm2, %v9678_v30  ;;  %v9708_v25 = vld [vmem:[#allocation28_spill] sm:$0xff] }
  0xc1   : > { %6309 = vmatmul.mubr.msk.f32.gmra.mrb[20].mxu0 %vm493_vm2, %v9679_v36  ;;  %6509 = vmatmul.mubr.msk.f32.gmra.mrb[20].mxu1 %vm493_vm2, %v9680_v31  ;;  %v9707_v36 = vld [vmem:[#allocation27_spill] sm:$0xff] }
  0xc2   : > { %6311 = vmatprep.mubr.msk.f32.mxu0 %vm493_vm2, %v9681_v2  ;;  %6511 = vmatprep.mubr.msk.f32.mxu1 %vm493_vm2, %v9682_v26  ;;  %v9706_v2 = vld [vmem:[#allocation24_spill] sm:$0xff] }
  0xc5   : > { %6312 = vmatmul.mubr.msk.f32.gmra.mrb[22].mxu0 %vm493_vm2, %v9683_v24  ;;  %6512 = vmatmul.mubr.msk.f32.gmra.mrb[22].mxu1 %vm493_vm2, %v7924_v59  ;;  %v9705_v24 = vld [vmem:[#allocation23_spill] sm:$0xff] }
  0xc6   : > { %6314 = vmatprep.mubr.msk.f32.mxu0 %vm493_vm2, %v9684_v20  ;;  %6514 = vmatprep.mubr.msk.f32.mxu1 %vm493_vm2, %v7932_v57  ;;  %v9704_v20 = vld [vmem:[#allocation20_spill] sm:$0xff] }
  0xc9   : > { %6315 = vmatmul.mubr.msk.f32.gmra.mrb[24].mxu0 %vm493_vm2, %v9685_v34  ;;  %6515 = vmatmul.mubr.msk.f32.gmra.mrb[24].mxu1 %vm493_vm2, %v7951_v53  ;;  %v9703_v34 = vld [vmem:[#allocation19_spill] sm:$0xff] }
  0xca   : > { %6317 = vmatprep.mubr.msk.f32.mxu0 %vm493_vm2, %v9686_v14  ;;  %6517 = vmatprep.mubr.msk.f32.mxu1 %vm493_vm2, %v7961_v15  ;;  %v9702_v14 = vld [vmem:[#allocation16_spill] sm:$0xff] }
  0xcd   : > { %6318 = vmatmul.mubr.msk.f32.gmra.mrb[26].mxu0 %vm493_vm2, %v9687_v60  ;;  %6518 = vmatmul.mubr.msk.f32.gmra.mrb[26].mxu1 %vm493_vm2, %v7980_v7  ;;  %v9701_v60 = vld [vmem:[#allocation15_spill] sm:$0xff] }
  0xce   : > { %6320 = vmatprep.mubr.msk.f32.mxu0 %vm493_vm2, %v9688_v13  ;;  %6520 = vmatprep.mubr.msk.f32.mxu1 %vm493_vm2, %v7986_v42  ;;  %v9700_v13 = vld [vmem:[#allocation12_spill] sm:$0xff] }
  0xd1   : > { %6321 = vmatmul.mubr.msk.f32.gmra.mrb[28].mxu0 %vm493_vm2, %v9689_v10  ;;  %6521 = vmatmul.mubr.msk.f32.gmra.mrb[28].mxu1 %vm493_vm2, %v8000_v33  ;;  %v9699_v10 = vld [vmem:[#allocation11_spill] sm:$0xff] }
  0xd2   : > { %6323 = vmatprep.mubr.msk.f32.mxu0 %vm493_vm2, %v8274_v11  ;;  %6523 = vmatprep.mubr.msk.f32.mxu1 %vm493_vm2, %v8302_v46 }
  0xd5   : > { %6324 = vmatmul.mubr.msk.f32.gmra.mrb[30].mxu0 %vm493_vm2, %v8277_v12  ;;  %6524 = vmatmul.mubr.msk.f32.gmra.mrb[30].mxu1 %vm493_vm2, %v8313_v47 }
  0xd6   : > { %6328 = vmatprep.mubr.msk.f32.mxu0 %vm493_vm2, %v7544_v27  ;;  %6528 = vmatprep.mubr.msk.f32.mxu1 %vm493_vm2, %v9692_v63 }
  0xd9   : > { %6329 = vmatmul.mubr.msk.f32.vlgmr.msra.gmra.mrb[0].mxu0 %vm493_vm2, %v7573_v37  ;;  %6529 = vmatmul.mubr.msk.f32.vlgmr.msra.gmra.mrb[0].mxu1 %vm493_vm2, %v9693_v0 }
  0xda   : > { %6577 = vmatpush3.msk.msra.mxu0 %vm558_vm0, %v8166_v55  ;;  %6777 = vmatpush3.msk.msra.mxu1 %vm558_vm0, %v8171_v61  ;;  %v9696_v55 = vld [vmem:[#allocation6_spill] sm:$0xff]  ;;  %v9697_v61 = vld [vmem:[#allocation7_spill] sm:$0xff] }
  0xdb   : > { %6331 = vmatprep.mubr.msk.f32.mxu0 %vm493_vm2, %v7586_v43  ;;  %6531 = vmatprep.mubr.msk.f32.mxu1 %vm493_vm2, %v9694_v22 }
  0xdc   : > { %6626 = vmatprep.subr.msk.mxu0 %vm558_vm0, %v8330_v48  ;;  %6826 = vmatprep.subr.msk.mxu1 %vm558_vm0, %v8335_v8 }
  0xdd   : > { %6332 = vmatmul.mubr.msk.f32.gmra.mrb[2].mxu0 %vm493_vm2, %v7614_v54  ;;  %6532 = vmatmul.mubr.msk.f32.gmra.mrb[2].mxu1 %vm493_vm2, %v9695_v23 }
  0xde   : > { %6334 = vmatprep.mubr.msk.f32.mxu0 %vm493_vm2, %v7622_v58  ;;  %6534 = vmatprep.mubr.msk.f32.mxu1 %vm493_vm2, %v9696_v55 }
  0xe1   : > { %6335 = vmatmul.mubr.msk.f32.gmra.mrb[4].mxu0 %vm493_vm2, %v7641_v1  ;;  %6535 = vmatmul.mubr.msk.f32.gmra.mrb[4].mxu1 %vm493_vm2, %v9697_v61 }
  0xe2   : > { %6337 = vmatprep.mubr.msk.f32.mxu0 %vm493_vm2, %v7651_v3  ;;  %6537 = vmatprep.mubr.msk.f32.mxu1 %vm493_vm2, %v9698_v35 }
  0xe5   : > { %6338 = vmatmul.mubr.msk.f32.gmra.mrb[6].mxu0 %vm493_vm2, %v7676_v21  ;;  %6538 = vmatmul.mubr.msk.f32.gmra.mrb[6].mxu1 %vm493_vm2, %v9699_v10 }
  0xe6   : > { %6340 = vmatprep.mubr.msk.f32.mxu0 %vm493_vm2, %v7684_v32  ;;  %6540 = vmatprep.mubr.msk.f32.mxu1 %vm493_vm2, %v9700_v13 }
  0xe9   : > { %6341 = vmatmul.mubr.msk.f32.gmra.mrb[8].mxu0 %vm493_vm2, %v7703_v44  ;;  %6541 = vmatmul.mubr.msk.f32.gmra.mrb[8].mxu1 %vm493_vm2, %v9701_v60 }
  0xea   : > { %6343 = vmatprep.mubr.msk.f32.mxu0 %vm493_vm2, %v7713_v49  ;;  %6543 = vmatprep.mubr.msk.f32.mxu1 %vm493_vm2, %v9702_v14 }
  0xed   : > { %6344 = vmatmul.mubr.msk.f32.gmra.mrb[10].mxu0 %vm493_vm2, %v7738_v9  ;;  %6544 = vmatmul.mubr.msk.f32.gmra.mrb[10].mxu1 %vm493_vm2, %v9703_v34 }
  0xee   : > { %6346 = vmatprep.mubr.msk.f32.mxu0 %vm493_vm2, %v7746_v19  ;;  %6546 = vmatprep.mubr.msk.f32.mxu1 %vm493_vm2, %v9704_v20 }
  0xf1   : > { %6347 = vmatmul.mubr.msk.f32.gmra.mrb[12].mxu0 %vm493_vm2, %v7765_v50  ;;  %6547 = vmatmul.mubr.msk.f32.gmra.mrb[12].mxu1 %vm493_vm2, %v9705_v24 }
  0xf2   : > { %6349 = vmatprep.mubr.msk.f32.mxu0 %vm493_vm2, %v7775_v52  ;;  %6549 = vmatprep.mubr.msk.f32.mxu1 %vm493_vm2, %v9706_v2 }
  0xf5   : > { %6350 = vmatmul.mubr.msk.f32.gmra.mrb[14].mxu0 %vm493_vm2, %v7800_v28  ;;  %6550 = vmatmul.mubr.msk.f32.gmra.mrb[14].mxu1 %vm493_vm2, %v9707_v36 }
  0xf6   : > { %6352 = vmatprep.mubr.msk.f32.mxu0 %vm493_vm2, %v7808_v51  ;;  %6552 = vmatprep.mubr.msk.f32.mxu1 %vm493_vm2, %v9708_v25 }
  0xf9   : > { %6353 = vmatmul.mubr.msk.f32.gmra.mrb[16].mxu0 %vm493_vm2, %v7827_v56  ;;  %6553 = vmatmul.mubr.msk.f32.gmra.mrb[16].mxu1 %vm493_vm2, %v9709_v5 }
  0xfa   : > { %6355 = vmatprep.mubr.msk.f32.mxu0 %vm493_vm2, %v9674_v4  ;;  %6555 = vmatprep.mubr.msk.f32.mxu1 %vm493_vm2, %v9710_v45 }
  0xfd   : > { %6356 = vmatmul.mubr.msk.f32.gmra.mrb[18].mxu0 %vm493_vm2, %v9676_v18  ;;  %6556 = vmatmul.mubr.msk.f32.gmra.mrb[18].mxu1 %vm493_vm2, %v9711_v38 }
  0xfe   : > { %6358 = vmatprep.mubr.msk.f32.mxu0 %vm493_vm2, %v9678_v30  ;;  %6558 = vmatprep.mubr.msk.f32.mxu1 %vm493_vm2, %v9712_v39 }
 0x101   : > { %6359 = vmatmul.mubr.msk.f32.gmra.mrb[20].mxu0 %vm493_vm2, %v9680_v31  ;;  %6559 = vmatmul.mubr.msk.f32.gmra.mrb[20].mxu1 %vm493_vm2, %v9713_v6 }
 0x102   : > { %6361 = vmatprep.mubr.msk.f32.mxu0 %vm493_vm2, %v9682_v26  ;;  %6561 = vmatprep.mubr.msk.f32.mxu1 %vm493_vm2, %v9714_v62 }
 0x105   : > { %6362 = vmatmul.mubr.msk.f32.gmra.mrb[22].mxu0 %vm493_vm2, %v7924_v59  ;;  %6562 = vmatmul.mubr.msk.f32.gmra.mrb[22].mxu1 %vm493_vm2, %v9715_v41  ;;  %v479_v41 = vrot.slane %v8274_v11, 2  ;;  %v480_v59 = vrot.slane %v8277_v12, 2  ;;  %v9722_v12 = vld [vmem:[#allocation58_spill] sm:$0xff] }
 0x106   : > { %6364 = vmatprep.mubr.msk.f32.mxu0 %vm493_vm2, %v7932_v57  ;;  %6564 = vmatprep.mubr.msk.f32.mxu1 %vm493_vm2, %v9716_v40  ;;  %v9719_v40 = vld [vmem:[#allocation56_spill] sm:$0xff] }
 0x109   : > { %6365 = vmatmul.mubr.msk.f32.gmra.mrb[24].mxu0 %vm493_vm2, %v7951_v53  ;;  %6565 = vmatmul.mubr.msk.f32.gmra.mrb[24].mxu1 %vm493_vm2, %v9717_v17  ;;  %v9720_v17 = vld [vmem:[#allocation57_spill] sm:$0xff] }
 0x10a   : > { %6367 = vmatprep.mubr.msk.f32.mxu0 %vm493_vm2, %v7961_v15  ;;  %6567 = vmatprep.mubr.msk.f32.mxu1 %vm493_vm2, %v9718_v16  ;;  %v482_v15 = vrot.slane %v8290_v29, 2  ;;  %v8457_v16 = vsel %vm398_vm3, %v479_v41, %v480_v59  ;;  %v8485_v41 = vld [vmem:[%s9482_s1 + $0x28] sm:$0xf]  ;;  %v9725_v29 = vld [vmem:[#allocation49_spill] sm:$0xff] }
 0x10b   : > { %9721 = vst [vmem:[#allocation38_spill] sm:$0xff] %v8457_v16 }
 0x10c   : > { %v8468_v11 = vsel %vm398_vm3, %v480_v59, %v482_v15  ;;  %v8490_v59 = vld [vmem:[%s9482_s1 + $0x38] sm:$0xf]  ;;  %v9724_v15 = vld [vmem:[#allocation48_spill] sm:$0xff] }
 0x10d   : > { %6368 = vmatmul.mubr.msk.f32.gmra.mrb[26].mxu0 %vm493_vm2, %v7980_v7  ;;  %6568 = vmatmul.mubr.msk.f32.gmra.mrb[26].mxu1 %vm493_vm2, %v9719_v40  ;;  %9723 = vst [vmem:[#allocation42_spill] sm:$0xff] %v8468_v11 }
 0x10e   : > { %6370 = vmatprep.mubr.msk.f32.mxu0 %vm493_vm2, %v7986_v42  ;;  %6570 = vmatprep.mubr.msk.f32.mxu1 %vm493_vm2, %v9720_v17 }
 0x111   : > { %6371 = vmatmul.mubr.msk.f32.gmra.mrb[28].mxu0 %vm493_vm2, %v8000_v33  ;;  %6571 = vmatmul.mubr.msk.f32.gmra.mrb[28].mxu1 %vm493_vm2, %v9722_v12 }
 0x112   : > { %6373 = vmatprep.mubr.msk.f32.mxu0 %vm493_vm2, %v8302_v46  ;;  %6573 = vmatprep.mubr.msk.f32.mxu1 %vm493_vm2, %v8457_v16 }
 0x115   : > { %6374 = vmatmul.mubr.msk.f32.gmra.mrb[30].mxu0 %vm493_vm2, %v8313_v47  ;;  %6574 = vmatmul.mubr.msk.f32.gmra.mrb[30].mxu1 %vm493_vm2, %v8468_v11 }
 0x116   : > { %6578 = vmatprep.mubr.msk.f32.mxu0 %vm493_vm2, %v7544_v27  ;;  %6778 = vmatprep.mubr.msk.f32.mxu1 %vm493_vm2, %v9692_v63  ;;  %v9726_v63 = vld [vmem:[#allocation50_spill] sm:$0xff] }
 0x119   : > { %6579 = vmatmul.mubr.msk.f32.vlgmr.msra.gmra.mrb[32].mxu0 %vm493_vm2, %v7573_v37  ;;  %6779 = vmatmul.mubr.msk.f32.vlgmr.msra.gmra.mrb[32].mxu1 %vm493_vm2, %v9693_v0  ;;  %v9727_v0 = vld [vmem:[#allocation53_spill] sm:$0xff] }
 0x11a   : > { %6627 = vmatpush3.msk.msra.mxu0 %vm558_vm0, %v8330_v48  ;;  %6827 = vmatpush3.msk.msra.mxu1 %vm558_vm0, %v8335_v8  ;;  %v9728_v48 = vld [vmem:[#allocation54_spill] sm:$0xff]  ;;  %v9729_v8 = vld [vmem:[#allocation55_spill] sm:$0xff] }
 0x11b   : > { %6581 = vmatprep.mubr.msk.f32.mxu0 %vm493_vm2, %v7586_v43  ;;  %6781 = vmatprep.mubr.msk.f32.mxu1 %vm493_vm2, %v9694_v22 }
 0x11c   : > { %6676 = vmatprep.subr.msk.mxu0 %vm558_vm0, %v8485_v41  ;;  %6876 = vmatprep.subr.msk.mxu1 %vm558_vm0, %v8490_v59 }
 0x11d   : > { %6582 = vmatmul.mubr.msk.f32.gmra.mrb[34].mxu0 %vm493_vm2, %v7614_v54  ;;  %6782 = vmatmul.mubr.msk.f32.gmra.mrb[34].mxu1 %vm493_vm2, %v9695_v23 }
 0x11e   : > { %6584 = vmatprep.mubr.msk.f32.mxu0 %vm493_vm2, %v7622_v58  ;;  %6784 = vmatprep.mubr.msk.f32.mxu1 %vm493_vm2, %v9696_v55 }
 0x121   : > { %6585 = vmatmul.mubr.msk.f32.gmra.mrb[36].mxu0 %vm493_vm2, %v7641_v1  ;;  %6785 = vmatmul.mubr.msk.f32.gmra.mrb[36].mxu1 %vm493_vm2, %v9697_v61 }
 0x122   : > { %6587 = vmatprep.mubr.msk.f32.mxu0 %vm493_vm2, %v7651_v3  ;;  %6787 = vmatprep.mubr.msk.f32.mxu1 %vm493_vm2, %v9698_v35 }
 0x125   : > { %6588 = vmatmul.mubr.msk.f32.gmra.mrb[38].mxu0 %vm493_vm2, %v7676_v21  ;;  %6788 = vmatmul.mubr.msk.f32.gmra.mrb[38].mxu1 %vm493_vm2, %v9699_v10 }
 0x126   : > { %6590 = vmatprep.mubr.msk.f32.mxu0 %vm493_vm2, %v7684_v32  ;;  %6790 = vmatprep.mubr.msk.f32.mxu1 %vm493_vm2, %v9700_v13 }
 0x129   : > { %6591 = vmatmul.mubr.msk.f32.gmra.mrb[40].mxu0 %vm493_vm2, %v7703_v44  ;;  %6791 = vmatmul.mubr.msk.f32.gmra.mrb[40].mxu1 %vm493_vm2, %v9701_v60 }
 0x12a   : > { %6593 = vmatprep.mubr.msk.f32.mxu0 %vm493_vm2, %v7713_v49  ;;  %6793 = vmatprep.mubr.msk.f32.mxu1 %vm493_vm2, %v9702_v14 }
 0x12d   : > { %6594 = vmatmul.mubr.msk.f32.gmra.mrb[42].mxu0 %vm493_vm2, %v7738_v9  ;;  %6794 = vmatmul.mubr.msk.f32.gmra.mrb[42].mxu1 %vm493_vm2, %v9703_v34 }
 0x12e   : > { %6596 = vmatprep.mubr.msk.f32.mxu0 %vm493_vm2, %v7746_v19  ;;  %6796 = vmatprep.mubr.msk.f32.mxu1 %vm493_vm2, %v9704_v20 }
 0x131   : > { %6597 = vmatmul.mubr.msk.f32.gmra.mrb[44].mxu0 %vm493_vm2, %v7765_v50  ;;  %6797 = vmatmul.mubr.msk.f32.gmra.mrb[44].mxu1 %vm493_vm2, %v9705_v24 }
 0x132   : > { %6599 = vmatprep.mubr.msk.f32.mxu0 %vm493_vm2, %v7775_v52  ;;  %6799 = vmatprep.mubr.msk.f32.mxu1 %vm493_vm2, %v9706_v2 }
 0x135   : > { %6600 = vmatmul.mubr.msk.f32.gmra.mrb[46].mxu0 %vm493_vm2, %v7800_v28  ;;  %6800 = vmatmul.mubr.msk.f32.gmra.mrb[46].mxu1 %vm493_vm2, %v9707_v36 }
 0x136   : > { %6602 = vmatprep.mubr.msk.f32.mxu0 %vm493_vm2, %v7808_v51  ;;  %6802 = vmatprep.mubr.msk.f32.mxu1 %vm493_vm2, %v9708_v25  ;;  %v9751_v25 = vld [vmem:[#allocation36_spill] sm:$0xff] }
 0x139   : > { %6603 = vmatmul.mubr.msk.f32.gmra.mrb[48].mxu0 %vm493_vm2, %v7827_v56  ;;  %6803 = vmatmul.mubr.msk.f32.gmra.mrb[48].mxu1 %vm493_vm2, %v9709_v5 }
 0x13a   : > { %6605 = vmatprep.mubr.msk.f32.mxu0 %vm493_vm2, %v9674_v4  ;;  %6805 = vmatprep.mubr.msk.f32.mxu1 %vm493_vm2, %v9710_v45 }
 0x13d   : > { %6606 = vmatmul.mubr.msk.f32.gmra.mrb[50].mxu0 %vm493_vm2, %v9676_v18  ;;  %6806 = vmatmul.mubr.msk.f32.gmra.mrb[50].mxu1 %vm493_vm2, %v9711_v38 }
 0x13e   : > { %6608 = vmatprep.mubr.msk.f32.mxu0 %vm493_vm2, %v9678_v30  ;;  %6808 = vmatprep.mubr.msk.f32.mxu1 %vm493_vm2, %v9712_v39  ;;  %v9749_v39 = vld [vmem:[#allocation52_spill] sm:$0xff] }
 0x141   : > { %6609 = vmatmul.mubr.msk.f32.gmra.mrb[52].mxu0 %vm493_vm2, %v9680_v31  ;;  %6809 = vmatmul.mubr.msk.f32.gmra.mrb[52].mxu1 %vm493_vm2, %v9713_v6 }
 0x142   : > { %6611 = vmatprep.mubr.msk.f32.mxu0 %vm493_vm2, %v9682_v26  ;;  %6811 = vmatprep.mubr.msk.f32.mxu1 %vm493_vm2, %v9714_v62  ;;  %v9733_v62 = vld [vmem:[#allocation14_spill] sm:$0xff] }
 0x145   : > { %6612 = vmatmul.mubr.msk.f32.gmra.mrb[54].mxu0 %vm493_vm2, %v9724_v15  ;;  %6812 = vmatmul.mubr.msk.f32.gmra.mrb[54].mxu1 %vm493_vm2, %v9725_v29  ;;  %v9732_v29 = vld [vmem:[#allocation13_spill] sm:$0xff] }
 0x146   : > { %6614 = vmatprep.mubr.msk.f32.mxu0 %vm493_vm2, %v7932_v57  ;;  %6814 = vmatprep.mubr.msk.f32.mxu1 %vm493_vm2, %v9726_v63  ;;  %v9731_v63 = vld [vmem:[#allocation10_spill] sm:$0xff] }
 0x149   : > { %6615 = vmatmul.mubr.msk.f32.gmra.mrb[56].mxu0 %vm493_vm2, %v7951_v53  ;;  %6815 = vmatmul.mubr.msk.f32.gmra.mrb[56].mxu1 %vm493_vm2, %v9727_v0  ;;  %v9730_v0 = vld [vmem:[#allocation9_spill] sm:$0xff] }
 0x14a   : > { %6617 = vmatprep.mubr.msk.f32.mxu0 %vm493_vm2, %v9728_v48  ;;  %6817 = vmatprep.mubr.msk.f32.mxu1 %vm493_vm2, %v9729_v8  ;;  %v8696_v8 = vld [vmem:[%s7501_s27 + $0x80] sm:$0xff] }
 0x14d   : > { %6618 = vmatmul.mubr.msk.f32.gmra.mrb[58].mxu0 %vm493_vm2, %v7980_v7  ;;  %6818 = vmatmul.mubr.msk.f32.gmra.mrb[58].mxu1 %vm493_vm2, %v9719_v40  ;;  %v8689_v40 = vld [vmem:[%s7501_s27 + $0x78] sm:$0xff] }
 0x14e   : > { %6620 = vmatprep.mubr.msk.f32.mxu0 %vm493_vm2, %v7986_v42  ;;  %6820 = vmatprep.mubr.msk.f32.mxu1 %vm493_vm2, %v9720_v17  ;;  %v7385_v17 = vld [vmem:[%s7501_s27 + $0x18] sm:$0xff] }
 0x151   : > { %6621 = vmatmul.mubr.msk.f32.gmra.mrb[60].mxu0 %vm493_vm2, %v8000_v33  ;;  %6821 = vmatmul.mubr.msk.f32.gmra.mrb[60].mxu1 %vm493_vm2, %v9722_v12  ;;  %v7386_v12 = vld [vmem:[%s7501_s27 + $0x20] sm:$0xff] }
 0x152   : > { %6623 = vmatprep.mubr.msk.f32.mxu0 %vm493_vm2, %v8302_v46  ;;  %6823 = vmatprep.mubr.msk.f32.mxu1 %vm493_vm2, %v8457_v16  ;;  %v8631_v16 = vld [vmem:[%s9482_s1 + $0x2c] sm:$0xf] }
 0x155   : > { %6624 = vmatmul.mubr.msk.f32.gmra.mrb[62].mxu0 %vm493_vm2, %v8313_v47  ;;  %6824 = vmatmul.mubr.msk.f32.gmra.mrb[62].mxu1 %vm493_vm2, %v8468_v11  ;;  %v8682_v11 = vld [vmem:[%s7501_s27 + $0x68] sm:$0xff] }
 0x156   : > { %6628 = vmatprep.mubr.msk.f32.mxu0 %vm493_vm2, %v7385_v17  ;;  %6828 = vmatprep.mubr.msk.f32.mxu1 %vm493_vm2, %v7544_v27  ;;  %v8636_v17 = vld [vmem:[%s9482_s1 + $0x3c] sm:$0xf]  ;;  %v8643_v27 = vld [vmem:[%s7501_s27 + $0x30] sm:$0xff] }
 0x159   : > { %6629 = vmatmul.mubr.msk.f32.vlgmr.msra.gmra.mrb[32].mxu0 %vm493_vm2, %v7386_v12  ;;  %6829 = vmatmul.mubr.msk.f32.vlgmr.msra.gmra.mrb[32].mxu1 %vm493_vm2, %v7573_v37  ;;  %v8654_v37 = vld [vmem:[%s7501_s27 + $0x38] sm:$0xff]  ;;  %v8661_v12 = vld [vmem:[%s7501_s27 + $0x48] sm:$0xff] }
 0x15a   : > { %6677 = vmatpush3.msk.msra.mxu0 %vm558_vm0, %v8485_v41  ;;  %6877 = vmatpush3.msk.msra.mxu1 %vm558_vm0, %v8490_v59  ;;  %v8668_v41 = vld [vmem:[%s7501_s27 + $0x50] sm:$0xff]  ;;  %v8675_v59 = vld [vmem:[%s7501_s27 + $0x60] sm:$0xff] }
 0x15b   : > { %6631 = vmatprep.mubr.msk.f32.mxu0 %vm493_vm2, %v8643_v27  ;;  %6831 = vmatprep.mubr.msk.f32.mxu1 %vm493_vm2, %v7586_v43 }
 0x15c   : > { %6726 = vmatprep.subr.msk.mxu0 %vm558_vm0, %v8631_v16  ;;  %6926 = vmatprep.subr.msk.mxu1 %vm558_vm0, %v8636_v17 }
 0x15d   : > { %6632 = vmatmul.mubr.msk.f32.gmra.mrb[34].mxu0 %vm493_vm2, %v8654_v37  ;;  %6832 = vmatmul.mubr.msk.f32.gmra.mrb[34].mxu1 %vm493_vm2, %v7614_v54 }
 0x15e   : > { %6634 = vmatprep.mubr.msk.f32.mxu0 %vm493_vm2, %v8661_v12  ;;  %6834 = vmatprep.mubr.msk.f32.mxu1 %vm493_vm2, %v7622_v58 }
 0x161   : > { %6635 = vmatmul.mubr.msk.f32.gmra.mrb[36].mxu0 %vm493_vm2, %v8668_v41  ;;  %6835 = vmatmul.mubr.msk.f32.gmra.mrb[36].mxu1 %vm493_vm2, %v7641_v1 }
 0x162   : > { %6637 = vmatprep.mubr.msk.f32.mxu0 %vm493_vm2, %v8675_v59  ;;  %6837 = vmatprep.mubr.msk.f32.mxu1 %vm493_vm2, %v7651_v3 }
 0x165   : > { %6638 = vmatmul.mubr.msk.f32.gmra.mrb[38].mxu0 %vm493_vm2, %v8682_v11  ;;  %6838 = vmatmul.mubr.msk.f32.gmra.mrb[38].mxu1 %vm493_vm2, %v7676_v21 }
 0x166   : > { %6640 = vmatprep.mubr.msk.f32.mxu0 %vm493_vm2, %v8689_v40  ;;  %6840 = vmatprep.mubr.msk.f32.mxu1 %vm493_vm2, %v7684_v32 }
 0x169   : > { %6641 = vmatmul.mubr.msk.f32.gmra.mrb[40].mxu0 %vm493_vm2, %v8696_v8  ;;  %6841 = vmatmul.mubr.msk.f32.gmra.mrb[40].mxu1 %vm493_vm2, %v7703_v44 }
 0x16a   : > { %6643 = vmatprep.mubr.msk.f32.mxu0 %vm493_vm2, %v9730_v0  ;;  %6843 = vmatprep.mubr.msk.f32.mxu1 %vm493_vm2, %v7713_v49  ;;  %v9734_v0 = vld [vmem:[#allocation17_spill] sm:$0xff] }
 0x16d   : > { %6644 = vmatmul.mubr.msk.f32.gmra.mrb[42].mxu0 %vm493_vm2, %v9731_v63  ;;  %6844 = vmatmul.mubr.msk.f32.gmra.mrb[42].mxu1 %vm493_vm2, %v7738_v9  ;;  %v9735_v63 = vld [vmem:[#allocation18_spill] sm:$0xff] }
 0x16e   : > { %6646 = vmatprep.mubr.msk.f32.mxu0 %vm493_vm2, %v9732_v29  ;;  %6846 = vmatprep.mubr.msk.f32.mxu1 %vm493_vm2, %v7746_v19  ;;  %v9736_v29 = vld [vmem:[#allocation21_spill] sm:$0xff] }
 0x171   : > { %6647 = vmatmul.mubr.msk.f32.gmra.mrb[44].mxu0 %vm493_vm2, %v9733_v62  ;;  %6847 = vmatmul.mubr.msk.f32.gmra.mrb[44].mxu1 %vm493_vm2, %v7765_v50  ;;  %v9737_v62 = vld [vmem:[#allocation22_spill] sm:$0xff] }
 0x172   : > { %6649 = vmatprep.mubr.msk.f32.mxu0 %vm493_vm2, %v9734_v0  ;;  %6849 = vmatprep.mubr.msk.f32.mxu1 %vm493_vm2, %v7775_v52  ;;  %v9738_v0 = vld [vmem:[#allocation25_spill] sm:$0xff] }
 0x175   : > { %6650 = vmatmul.mubr.msk.f32.gmra.mrb[46].mxu0 %vm493_vm2, %v9735_v63  ;;  %6850 = vmatmul.mubr.msk.f32.gmra.mrb[46].mxu1 %vm493_vm2, %v7800_v28  ;;  %v9739_v63 = vld [vmem:[#allocation26_spill] sm:$0xff] }
 0x176   : > { %6652 = vmatprep.mubr.msk.f32.mxu0 %vm493_vm2, %v9736_v29  ;;  %6852 = vmatprep.mubr.msk.f32.mxu1 %vm493_vm2, %v7808_v51  ;;  %v9740_v29 = vld [vmem:[#allocation29_spill] sm:$0xff] }
 0x179   : > { %6653 = vmatmul.mubr.msk.f32.gmra.mrb[48].mxu0 %vm493_vm2, %v9737_v62  ;;  %6853 = vmatmul.mubr.msk.f32.gmra.mrb[48].mxu1 %vm493_vm2, %v7827_v56  ;;  %v9741_v62 = vld [vmem:[#allocation30_spill] sm:$0xff] }
 0x17a   : > { %6655 = vmatprep.mubr.msk.f32.mxu0 %vm493_vm2, %v9738_v0  ;;  %6855 = vmatprep.mubr.msk.f32.mxu1 %vm493_vm2, %v9674_v4  ;;  %v9742_v0 = vld [vmem:[#allocation34_spill] sm:$0xff] }
 0x17d   : > { %6656 = vmatmul.mubr.msk.f32.gmra.mrb[50].mxu0 %vm493_vm2, %v9739_v63  ;;  %6856 = vmatmul.mubr.msk.f32.gmra.mrb[50].mxu1 %vm493_vm2, %v9676_v18  ;;  %v9743_v63 = vld [vmem:[#allocation35_spill] sm:$0xff] }
 0x17e   : > { %6658 = vmatprep.mubr.msk.f32.mxu0 %vm493_vm2, %v9740_v29  ;;  %6858 = vmatprep.mubr.msk.f32.mxu1 %vm493_vm2, %v9678_v30  ;;  %v9744_v29 = vld [vmem:[#allocation40_spill] sm:$0xff] }
 0x181   : > { %6659 = vmatmul.mubr.msk.f32.gmra.mrb[52].mxu0 %vm493_vm2, %v9741_v62  ;;  %6859 = vmatmul.mubr.msk.f32.gmra.mrb[52].mxu1 %vm493_vm2, %v9680_v31  ;;  %v9745_v62 = vld [vmem:[#allocation41_spill] sm:$0xff] }
 0x182   : > { %6661 = vmatprep.mubr.msk.f32.mxu0 %vm493_vm2, %v9742_v0  ;;  %6861 = vmatprep.mubr.msk.f32.mxu1 %vm493_vm2, %v9682_v26  ;;  %v9746_v0 = vld [vmem:[#allocation46_spill] sm:$0xff] }
 0x185   : > { %6662 = vmatmul.mubr.msk.f32.gmra.mrb[54].mxu0 %vm493_vm2, %v9743_v63  ;;  %6862 = vmatmul.mubr.msk.f32.gmra.mrb[54].mxu1 %vm493_vm2, %v9724_v15  ;;  %v9747_v63 = vld [vmem:[#allocation47_spill] sm:$0xff] }
 0x186   : > { %6664 = vmatprep.mubr.msk.f32.mxu0 %vm493_vm2, %v9744_v29  ;;  %6864 = vmatprep.mubr.msk.f32.mxu1 %vm493_vm2, %v7932_v57  ;;  %v9748_v29 = vld [vmem:[#allocation51_spill] sm:$0xff] }
 0x189   : > { %6665 = vmatmul.mubr.msk.f32.gmra.mrb[56].mxu0 %vm493_vm2, %v9745_v62  ;;  %6865 = vmatmul.mubr.msk.f32.gmra.mrb[56].mxu1 %vm493_vm2, %v7951_v53  ;;  %v8779_v62 = vld [vmem:[%s7501_s27 + $0x198] sm:$0xff] }
 0x18a   : > { %6667 = vmatprep.mubr.msk.f32.mxu0 %vm493_vm2, %v9746_v0  ;;  %6867 = vmatprep.mubr.msk.f32.mxu1 %vm493_vm2, %v9728_v48  ;;  %v484_v6 = vrot.slane %v8779_v62, 2  ;;  %v8783_v0 = vld [vmem:[%s7501_s27 + $0x1a0] sm:$0xff] }
 0x18b   : > { %v485_v38 = vrot.slane %v8783_v0, 2 }
 0x18d   : > { %6668 = vmatmul.mubr.msk.f32.gmra.mrb[58].mxu0 %vm493_vm2, %v9747_v63  ;;  %6868 = vmatmul.mubr.msk.f32.gmra.mrb[58].mxu1 %vm493_vm2, %v7980_v7  ;;  %v8790_v63 = vld [vmem:[%s7501_s27 + $0x1a8] sm:$0x3]  ;;  %v8799_v5 = vsel %vm398_vm3, %v484_v6, %v485_v38 }
 0x18e   : > { %6670 = vmatprep.mubr.msk.f32.mxu0 %vm493_vm2, %v9748_v29  ;;  %6870 = vmatprep.mubr.msk.f32.mxu1 %vm493_vm2, %v7986_v42  ;;  %v9750_v29 = vld [vmem:[#allocation32_spill] sm:$0xff]  ;;  %v487_v45 = vrot.slane %v8790_v63, 2  ;;  %v7397_v6 = vld [vmem:[%s7501_s27 + $0xa8] sm:$0xff] }
 0x191   : > { %6671 = vmatmul.mubr.msk.f32.gmra.mrb[60].mxu0 %vm493_vm2, %v9749_v39  ;;  %6871 = vmatmul.mubr.msk.f32.gmra.mrb[60].mxu1 %vm493_vm2, %v8000_v33  ;;  %v8802_v39 = vsel %vm398_vm3, %v485_v38, %v487_v45  ;;  %v7396_v45 = vld [vmem:[%s7501_s27 + $0x98] sm:$0xff] }
 0x192   : > { %6673 = vmatprep.mubr.msk.f32.mxu0 %vm493_vm2, %v9750_v29  ;;  %6873 = vmatprep.mubr.msk.f32.mxu1 %vm493_vm2, %v8302_v46 }
 0x195   : > { %6674 = vmatmul.mubr.msk.f32.gmra.mrb[62].mxu0 %vm493_vm2, %v9751_v25  ;;  %6874 = vmatmul.mubr.msk.f32.gmra.mrb[62].mxu1 %vm493_vm2, %v8313_v47 }
 0x196   : > { %6678 = vmatprep.mubr.msk.f32.mxu0 %vm493_vm2, %v8643_v27  ;;  %6878 = vmatprep.mubr.msk.f32.mxu1 %vm493_vm2, %v7586_v43 }
 0x199   : > { %6679 = vmatmul.mubr.msk.f32.vlgmr.msra.gmra.mrb[32].mxu0 %vm493_vm2, %v8654_v37  ;;  %6879 = vmatmul.mubr.msk.f32.vlgmr.msra.gmra.mrb[32].mxu1 %vm493_vm2, %v7614_v54 }
 0x19a   : > { %6727 = vmatpush3.msk.msra.mxu0 %vm558_vm0, %v8631_v16  ;;  %6927 = vmatpush3.msk.msra.mxu1 %vm558_vm0, %v8636_v17  ;;  %v7395_v16 = vld [vmem:[%s7501_s27 + $0x90] sm:$0xff] }
 0x19b   : > { %6681 = vmatprep.mubr.msk.f32.mxu0 %vm493_vm2, %v8661_v12  ;;  %6881 = vmatprep.mubr.msk.f32.mxu1 %vm493_vm2, %v7622_v58  ;;  %v7398_v12 = vld [vmem:[%s7501_s27 + $0xb0] sm:$0xff] }
 0x19d   : > { %6682 = vmatmul.mubr.msk.f32.gmra.mrb[34].mxu0 %vm493_vm2, %v8668_v41  ;;  %6882 = vmatmul.mubr.msk.f32.gmra.mrb[34].mxu1 %vm493_vm2, %v7641_v1 }
 0x19e   : > { %6684 = vmatprep.mubr.msk.f32.mxu0 %vm493_vm2, %v8675_v59  ;;  %6884 = vmatprep.mubr.msk.f32.mxu1 %vm493_vm2, %v7651_v3 }
 0x1a1   : > { %6685 = vmatmul.mubr.msk.f32.gmra.mrb[36].mxu0 %vm493_vm2, %v8682_v11  ;;  %6885 = vmatmul.mubr.msk.f32.gmra.mrb[36].mxu1 %vm493_vm2, %v7676_v21 }
 0x1a2   : > { %6687 = vmatprep.mubr.msk.f32.mxu0 %vm493_vm2, %v8689_v40  ;;  %6887 = vmatprep.mubr.msk.f32.mxu1 %vm493_vm2, %v7684_v32  ;;  %v8856_v40 = vld [vmem:[%s9483_s2] ss:$0 sm:$0xff] }
 0x1a5   : > { %6688 = vmatmul.mubr.msk.f32.gmra.mrb[38].mxu0 %vm493_vm2, %v8696_v8  ;;  %6888 = vmatmul.mubr.msk.f32.gmra.mrb[38].mxu1 %vm493_vm2, %v7703_v44 }
 0x1a6   : > { %6690 = vmatprep.mubr.msk.f32.mxu0 %vm493_vm2, %v7395_v16  ;;  %6890 = vmatprep.mubr.msk.f32.mxu1 %vm493_vm2, %v7713_v49  ;;  %v7399_v16 = vld [vmem:[%s7501_s27 + $0xc0] sm:$0xff] }
 0x1a9   : > { %6691 = vmatmul.mubr.msk.f32.gmra.mrb[40].mxu0 %vm493_vm2, %v7396_v45  ;;  %6891 = vmatmul.mubr.msk.f32.gmra.mrb[40].mxu1 %vm493_vm2, %v7738_v9 }
 0x1aa   : > { %6693 = vmatprep.mubr.msk.f32.mxu0 %vm493_vm2, %v7397_v6  ;;  %6893 = vmatprep.mubr.msk.f32.mxu1 %vm493_vm2, %v7746_v19 }
 0x1ac   : > { %v6330_v38 = vpop.f32.mrb[0].mxu0  ;;  %v6530_v11 = vpop.f32.mrb[0].mxu1 }
 0x1ad   : > { %v1618_v8 = vadd.f32 %v6330_v38, %v8856_v40  ;;  %v2734_v17 = vadd.f32 %v6530_v11, %v8856_v40  ;;  %v1420_v27 = vpop.f32.mrb[1].mxu0  ;;  %v2542_v37 = vpop.f32.mrb[1].mxu1  ;;  %6694 = vmatmul.mubr.msk.f32.gmra.mrb[42].mxu0 %vm493_vm2, %v7398_v12  ;;  %6894 = vmatmul.mubr.msk.f32.gmra.mrb[42].mxu1 %vm493_vm2, %v7765_v50  ;;  %v7400_v12 = vld [vmem:[%s7501_s27 + $0xc8] sm:$0xff] }
 0x1ae   : > { %v1617_v41 = vadd.f32 %v8856_v40, %v1420_v27  ;;  %v2733_v59 = vadd.f32 %v8856_v40, %v2542_v37  ;;  %6696 = vmatprep.mubr.msk.f32.mxu0 %vm493_vm2, %v7399_v16  ;;  %6896 = vmatprep.mubr.msk.f32.mxu1 %vm493_vm2, %v7775_v52 }
 0x1af   : > { %1650 = vst.msk [vmem:[%s8865_s7 + $0x8] sm:$0xff] %vm493_vm2, %v1618_v8  ;;  %5278 = vst.msk [vmem:[%s8865_s7 + $0x108] sm:$0xff] %vm493_vm2, %v2734_v17 }
 0x1b0   : > { %1649 = vst.msk [vmem:[%s8865_s7] sm:$0xff] %vm493_vm2, %v1617_v41  ;;  %5277 = vst.msk [vmem:[%s8865_s7 + $0x100] sm:$0xff] %vm493_vm2, %v2733_v59  ;;  %v6333_v45 = vpop.f32.mrb[2].mxu0  ;;  %v6533_v6 = vpop.f32.mrb[2].mxu1  ;;  %v7401_v41 = vld [vmem:[%s7501_s27 + $0xd8] sm:$0xff] }
 0x1b1   : > { %v1620_v38 = vadd.f32 %v6333_v45, %v8856_v40  ;;  %v2736_v11 = vadd.f32 %v6533_v6, %v8856_v40  ;;  %v1430_v27 = vpop.f32.mrb[3].mxu0  ;;  %v2552_v37 = vpop.f32.mrb[3].mxu1  ;;  %6697 = vmatmul.mubr.msk.f32.gmra.mrb[44].mxu0 %vm493_vm2, %v7400_v12  ;;  %6897 = vmatmul.mubr.msk.f32.gmra.mrb[44].mxu1 %vm493_vm2, %v7800_v28  ;;  %v7402_v12 = vld [vmem:[%s7501_s27 + $0xe0] sm:$0xff] }
 0x1b2   : > { %v1619_v8 = vadd.f32 %v8856_v40, %v1430_v27  ;;  %v2735_v17 = vadd.f32 %v8856_v40, %v2552_v37  ;;  %6699 = vmatprep.mubr.msk.f32.mxu0 %vm493_vm2, %v7401_v41  ;;  %6899 = vmatprep.mubr.msk.f32.mxu1 %vm493_vm2, %v7808_v51 }
 0x1b3   : > { %1652 = vst.msk [vmem:[%s8865_s7 + $0x18] sm:$0xff] %vm493_vm2, %v1620_v38  ;;  %5280 = vst.msk [vmem:[%s8865_s7 + $0x118] sm:$0xff] %vm493_vm2, %v2736_v11 }
 0x1b4   : > { %1651 = vst.msk [vmem:[%s8865_s7 + $0x10] sm:$0xff] %vm493_vm2, %v1619_v8  ;;  %5279 = vst.msk [vmem:[%s8865_s7 + $0x110] sm:$0xff] %vm493_vm2, %v2735_v17  ;;  %v6336_v59 = vpop.f32.mrb[4].mxu0  ;;  %v6536_v16 = vpop.f32.mrb[4].mxu1  ;;  %v7403_v8 = vld [vmem:[%s7501_s27 + $0xf0] sm:$0xff] }
 0x1b5   : > { %v1622_v45 = vadd.f32 %v6336_v59, %v8856_v40  ;;  %v2738_v6 = vadd.f32 %v6536_v16, %v8856_v40  ;;  %v1440_v27 = vpop.f32.mrb[5].mxu0  ;;  %v2562_v37 = vpop.f32.mrb[5].mxu1  ;;  %6700 = vmatmul.mubr.msk.f32.gmra.mrb[46].mxu0 %vm493_vm2, %v7402_v12  ;;  %6900 = vmatmul.mubr.msk.f32.gmra.mrb[46].mxu1 %vm493_vm2, %v7827_v56  ;;  %v7404_v12 = vld [vmem:[%s7501_s27 + $0xf8] sm:$0xff] }
 0x1b6   : > { %v1621_v38 = vadd.f32 %v8856_v40, %v1440_v27  ;;  %v2737_v11 = vadd.f32 %v8856_v40, %v2562_v37  ;;  %6702 = vmatprep.mubr.msk.f32.mxu0 %vm493_vm2, %v7403_v8  ;;  %6902 = vmatprep.mubr.msk.f32.mxu1 %vm493_vm2, %v9674_v4 }
 0x1b7   : > { %1654 = vst.msk [vmem:[%s8865_s7 + $0x28] sm:$0xff] %vm493_vm2, %v1622_v45  ;;  %5282 = vst.msk [vmem:[%s8865_s7 + $0x128] sm:$0xff] %vm493_vm2, %v2738_v6 }
 0x1b8   : > { %1653 = vst.msk [vmem:[%s8865_s7 + $0x20] sm:$0xff] %vm493_vm2, %v1621_v38  ;;  %5281 = vst.msk [vmem:[%s8865_s7 + $0x120] sm:$0xff] %vm493_vm2, %v2737_v11  ;;  %v6339_v17 = vpop.f32.mrb[6].mxu0  ;;  %v6539_v41 = vpop.f32.mrb[6].mxu1  ;;  %v7405_v38 = vld [vmem:[%s7501_s27 + $0x108] sm:$0xff] }
 0x1b9   : > { %v1624_v59 = vadd.f32 %v6339_v17, %v8856_v40  ;;  %v2740_v16 = vadd.f32 %v6539_v41, %v8856_v40  ;;  %v1450_v27 = vpop.f32.mrb[7].mxu0  ;;  %v2572_v37 = vpop.f32.mrb[7].mxu1  ;;  %6703 = vmatmul.mubr.msk.f32.gmra.mrb[48].mxu0 %vm493_vm2, %v7404_v12  ;;  %6903 = vmatmul.mubr.msk.f32.gmra.mrb[48].mxu1 %vm493_vm2, %v9676_v18  ;;  %v7406_v12 = vld [vmem:[%s7501_s27 + $0x110] sm:$0xff] }
 0x1ba   : > { %v1623_v45 = vadd.f32 %v8856_v40, %v1450_v27  ;;  %v2739_v6 = vadd.f32 %v8856_v40, %v2572_v37  ;;  %6705 = vmatprep.mubr.msk.f32.mxu0 %vm493_vm2, %v7405_v38  ;;  %6905 = vmatprep.mubr.msk.f32.mxu1 %vm493_vm2, %v9678_v30 }
 0x1bb   : > { %1656 = vst.msk [vmem:[%s8865_s7 + $0x38] sm:$0xff] %vm493_vm2, %v1624_v59  ;;  %5284 = vst.msk [vmem:[%s8865_s7 + $0x138] sm:$0xff] %vm493_vm2, %v2740_v16 }
 0x1bc   : > { %1655 = vst.msk [vmem:[%s8865_s7 + $0x30] sm:$0xff] %vm493_vm2, %v1623_v45  ;;  %5283 = vst.msk [vmem:[%s8865_s7 + $0x130] sm:$0xff] %vm493_vm2, %v2739_v6  ;;  %v6342_v11 = vpop.f32.mrb[8].mxu0  ;;  %v6542_v8 = vpop.f32.mrb[8].mxu1  ;;  %v7407_v45 = vld [vmem:[%s7501_s27 + $0x120] sm:$0xff] }
 0x1bd   : > { %v1626_v17 = vadd.f32 %v6342_v11, %v8856_v40  ;;  %v2742_v41 = vadd.f32 %v6542_v8, %v8856_v40  ;;  %v1460_v27 = vpop.f32.mrb[9].mxu0  ;;  %v2582_v37 = vpop.f32.mrb[9].mxu1  ;;  %6706 = vmatmul.mubr.msk.f32.gmra.mrb[50].mxu0 %vm493_vm2, %v7406_v12  ;;  %6906 = vmatmul.mubr.msk.f32.gmra.mrb[50].mxu1 %vm493_vm2, %v9680_v31  ;;  %v7408_v12 = vld [vmem:[%s7501_s27 + $0x128] sm:$0xff] }
 0x1be   : > { %v1625_v59 = vadd.f32 %v8856_v40, %v1460_v27  ;;  %v2741_v16 = vadd.f32 %v8856_v40, %v2582_v37  ;;  %6708 = vmatprep.mubr.msk.f32.mxu0 %vm493_vm2, %v7407_v45  ;;  %6908 = vmatprep.mubr.msk.f32.mxu1 %vm493_vm2, %v9682_v26 }
 0x1bf   : > { %1658 = vst.msk [vmem:[%s8865_s7 + $0x48] sm:$0xff] %vm493_vm2, %v1626_v17  ;;  %5286 = vst.msk [vmem:[%s8865_s7 + $0x148] sm:$0xff] %vm493_vm2, %v2742_v41 }
 0x1c0   : > { %1657 = vst.msk [vmem:[%s8865_s7 + $0x40] sm:$0xff] %vm493_vm2, %v1625_v59  ;;  %5285 = vst.msk [vmem:[%s8865_s7 + $0x140] sm:$0xff] %vm493_vm2, %v2741_v16  ;;  %v6345_v6 = vpop.f32.mrb[10].mxu0  ;;  %v6545_v38 = vpop.f32.mrb[10].mxu1  ;;  %v7409_v59 = vld [vmem:[%s7501_s27 + $0x138] sm:$0xff] }
 0x1c1   : > { %v1628_v11 = vadd.f32 %v6345_v6, %v8856_v40  ;;  %v2744_v8 = vadd.f32 %v6545_v38, %v8856_v40  ;;  %v1470_v27 = vpop.f32.mrb[11].mxu0  ;;  %v2592_v37 = vpop.f32.mrb[11].mxu1  ;;  %6709 = vmatmul.mubr.msk.f32.gmra.mrb[52].mxu0 %vm493_vm2, %v7408_v12  ;;  %6909 = vmatmul.mubr.msk.f32.gmra.mrb[52].mxu1 %vm493_vm2, %v9724_v15  ;;  %v7410_v12 = vld [vmem:[%s7501_s27 + $0x140] sm:$0xff] }
 0x1c2   : > { %v1627_v17 = vadd.f32 %v8856_v40, %v1470_v27  ;;  %v2743_v41 = vadd.f32 %v8856_v40, %v2592_v37  ;;  %6711 = vmatprep.mubr.msk.f32.mxu0 %vm493_vm2, %v7409_v59  ;;  %6911 = vmatprep.mubr.msk.f32.mxu1 %vm493_vm2, %v7932_v57 }
 0x1c3   : > { %1660 = vst.msk [vmem:[%s8865_s7 + $0x58] sm:$0xff] %vm493_vm2, %v1628_v11  ;;  %5288 = vst.msk [vmem:[%s8865_s7 + $0x158] sm:$0xff] %vm493_vm2, %v2744_v8 }
 0x1c4   : > { %1659 = vst.msk [vmem:[%s8865_s7 + $0x50] sm:$0xff] %vm493_vm2, %v1627_v17  ;;  %5287 = vst.msk [vmem:[%s8865_s7 + $0x150] sm:$0xff] %vm493_vm2, %v2743_v41  ;;  %v6348_v16 = vpop.f32.mrb[12].mxu0  ;;  %v6548_v45 = vpop.f32.mrb[12].mxu1  ;;  %v7411_v17 = vld [vmem:[%s7501_s27 + $0x150] sm:$0xff] }
 0x1c5   : > { %v1630_v6 = vadd.f32 %v6348_v16, %v8856_v40  ;;  %v2746_v38 = vadd.f32 %v6548_v45, %v8856_v40  ;;  %v1480_v27 = vpop.f32.mrb[13].mxu0  ;;  %v2602_v37 = vpop.f32.mrb[13].mxu1  ;;  %6712 = vmatmul.mubr.msk.f32.gmra.mrb[54].mxu0 %vm493_vm2, %v7410_v12  ;;  %6912 = vmatmul.mubr.msk.f32.gmra.mrb[54].mxu1 %vm493_vm2, %v7951_v53  ;;  %v7412_v12 = vld [vmem:[%s7501_s27 + $0x158] sm:$0xff] }
 0x1c6   : > { %v1629_v11 = vadd.f32 %v8856_v40, %v1480_v27  ;;  %v2745_v8 = vadd.f32 %v8856_v40, %v2602_v37  ;;  %6714 = vmatprep.mubr.msk.f32.mxu0 %vm493_vm2, %v7411_v17  ;;  %6914 = vmatprep.mubr.msk.f32.mxu1 %vm493_vm2, %v9728_v48  ;;  %v394_v17 = vrot.slane %v8783_v0, 1 }
 0x1c7   : > { %1662 = vst.msk [vmem:[%s8865_s7 + $0x68] sm:$0xff] %vm493_vm2, %v1630_v6  ;;  %5290 = vst.msk [vmem:[%s8865_s7 + $0x168] sm:$0xff] %vm493_vm2, %v2746_v38 }
 0x1c8   : > { %1661 = vst.msk [vmem:[%s8865_s7 + $0x60] sm:$0xff] %vm493_vm2, %v1629_v11  ;;  %5289 = vst.msk [vmem:[%s8865_s7 + $0x160] sm:$0xff] %vm493_vm2, %v2745_v8  ;;  %v6351_v41 = vpop.f32.mrb[14].mxu0  ;;  %v6551_v59 = vpop.f32.mrb[14].mxu1  ;;  %v7413_v11 = vld [vmem:[%s7501_s27 + $0x168] sm:$0xff]  ;;  %v393_v8 = vrot.slane %v8779_v62, 1 }
 0x1c9   : > { %v1632_v16 = vadd.f32 %v6351_v41, %v8856_v40  ;;  %v2748_v45 = vadd.f32 %v6551_v59, %v8856_v40  ;;  %v1490_v27 = vpop.f32.mrb[15].mxu0  ;;  %v2612_v37 = vpop.f32.mrb[15].mxu1  ;;  %6715 = vmatmul.mubr.msk.f32.gmra.mrb[56].mxu0 %vm493_vm2, %v7412_v12  ;;  %6915 = vmatmul.mubr.msk.f32.gmra.mrb[56].mxu1 %vm493_vm2, %v7980_v7  ;;  %v7414_v12 = vld [vmem:[%s7501_s27 + $0x170] sm:$0xff] }
 0x1ca   : > { %v1631_v6 = vadd.f32 %v8856_v40, %v1490_v27  ;;  %v2747_v38 = vadd.f32 %v8856_v40, %v2612_v37  ;;  %6717 = vmatprep.mubr.msk.f32.mxu0 %vm493_vm2, %v7413_v11  ;;  %6917 = vmatprep.mubr.msk.f32.mxu1 %vm493_vm2, %v7986_v42  ;;  %v396_v11 = vrot.slane %v8790_v63, 1 }
 0x1cb   : > { %1664 = vst.msk [vmem:[%s8865_s7 + $0x78] sm:$0xff] %vm493_vm2, %v1632_v16  ;;  %5292 = vst.msk [vmem:[%s8865_s7 + $0x178] sm:$0xff] %vm493_vm2, %v2748_v45 }
 0x1cc   : > { %1663 = vst.msk [vmem:[%s8865_s7 + $0x70] sm:$0xff] %vm493_vm2, %v1631_v6  ;;  %5291 = vst.msk [vmem:[%s8865_s7 + $0x170] sm:$0xff] %vm493_vm2, %v2747_v38  ;;  %v6354_v41 = vpop.f32.mrb[16].mxu0  ;;  %v6554_v59 = vpop.f32.mrb[16].mxu1 }
 0x1cd   : > { %v1634_v27 = vadd.f32 %v6354_v41, %v8856_v40  ;;  %v2750_v16 = vadd.f32 %v6554_v59, %v8856_v40  ;;  %v1500_v37 = vpop.f32.mrb[17].mxu0  ;;  %v2622_v45 = vpop.f32.mrb[17].mxu1  ;;  %6718 = vmatmul.mubr.msk.f32.gmra.mrb[58].mxu0 %vm493_vm2, %v7414_v12  ;;  %6918 = vmatmul.mubr.msk.f32.gmra.mrb[58].mxu1 %vm493_vm2, %v8000_v33  ;;  %v9047_v41 = vsel %vm307_vm1, %v393_v8, %v394_v17 }
 0x1ce   : > { %v1633_v6 = vadd.f32 %v8856_v40, %v1500_v37  ;;  %v2749_v38 = vadd.f32 %v8856_v40, %v2622_v45  ;;  %6720 = vmatprep.mubr.msk.f32.mxu0 %vm493_vm2, %v9750_v29  ;;  %6920 = vmatprep.mubr.msk.f32.mxu1 %vm493_vm2, %v8302_v46  ;;  %v9066_v12 = vsel %vm307_vm1, %v394_v17, %v396_v11 }
 0x1cf   : > { %1666 = vst.msk [vmem:[%s8865_s7 + $0x88] sm:$0xff] %vm493_vm2, %v1634_v27  ;;  %5294 = vst.msk [vmem:[%s8865_s7 + $0x188] sm:$0xff] %vm493_vm2, %v2750_v16 }
 0x1d0   : > { %1665 = vst.msk [vmem:[%s8865_s7 + $0x80] sm:$0xff] %vm493_vm2, %v1633_v6  ;;  %5293 = vst.msk [vmem:[%s8865_s7 + $0x180] sm:$0xff] %vm493_vm2, %v2749_v38  ;;  %v6357_v29 = vpop.f32.mrb[18].mxu0  ;;  %v6557_v59 = vpop.f32.mrb[18].mxu1 }
 0x1d1   : > { %v1636_v37 = vadd.f32 %v6357_v29, %v8856_v40  ;;  %v2752_v63 = vadd.f32 %v6557_v59, %v8856_v40  ;;  %v1510_v27 = vpop.f32.mrb[19].mxu0  ;;  %v2632_v45 = vpop.f32.mrb[19].mxu1  ;;  %6721 = vmatmul.mubr.msk.f32.gmra.mrb[60].mxu0 %vm493_vm2, %v9751_v25  ;;  %6921 = vmatmul.mubr.msk.f32.gmra.mrb[60].mxu1 %vm493_vm2, %v8313_v47 }
 0x1d2   : > { %v1635_v8 = vadd.f32 %v8856_v40, %v1510_v27  ;;  %v2751_v16 = vadd.f32 %v8856_v40, %v2632_v45  ;;  %6723 = vmatprep.mubr.msk.f32.mxu0 %vm493_vm2, %v8779_v62  ;;  %6923 = vmatprep.mubr.msk.f32.mxu1 %vm493_vm2, %v9047_v41 }
 0x1d3   : > { %1668 = vst.msk [vmem:[%s8865_s7 + $0x98] sm:$0xff] %vm493_vm2, %v1636_v37  ;;  %5296 = vst.msk [vmem:[%s8865_s7 + $0x198] sm:$0xff] %vm493_vm2, %v2752_v63 }
 0x1d4   : > { %1667 = vst.msk [vmem:[%s8865_s7 + $0x90] sm:$0xff] %vm493_vm2, %v1635_v8  ;;  %5295 = vst.msk [vmem:[%s8865_s7 + $0x190] sm:$0xff] %vm493_vm2, %v2751_v16  ;;  %v6360_v25 = vpop.f32.mrb[20].mxu0  ;;  %v6560_v62 = vpop.f32.mrb[20].mxu1 }
 0x1d5   : > { %v1638_v6 = vadd.f32 %v6360_v25, %v8856_v40  ;;  %v2754_v38 = vadd.f32 %v6560_v62, %v8856_v40  ;;  %v1520_v17 = vpop.f32.mrb[21].mxu0  ;;  %v2642_v11 = vpop.f32.mrb[21].mxu1  ;;  %6724 = vmatmul.mubr.msk.f32.gmra.mrb[62].mxu0 %vm493_vm2, %v8783_v0  ;;  %6924 = vmatmul.mubr.msk.f32.gmra.mrb[62].mxu1 %vm493_vm2, %v9066_v12 }
 0x1d6   : > { %v1637_v29 = vadd.f32 %v8856_v40, %v1520_v17  ;;  %v2753_v59 = vadd.f32 %v8856_v40, %v2642_v11  ;;  %6728 = vmatprep.mubr.msk.f32.mxu0 %vm493_vm2, %v7586_v43  ;;  %6928 = vmatprep.mubr.msk.f32.mxu1 %vm493_vm2, %v9694_v22 }
 0x1d7   : > { %1670 = vst.msk [vmem:[%s8865_s7 + $0xa8] sm:$0xff] %vm493_vm2, %v1638_v6  ;;  %5298 = vst.msk [vmem:[%s8865_s7 + $0x1a8] sm:$0xff] %vm493_vm2, %v2754_v38 }
 0x1d8   : > { %1669 = vst.msk [vmem:[%s8865_s7 + $0xa0] sm:$0xff] %vm493_vm2, %v1637_v29  ;;  %5297 = vst.msk [vmem:[%s8865_s7 + $0x1a0] sm:$0xff] %vm493_vm2, %v2753_v59  ;;  %v6363_v0 = vpop.f32.mrb[22].mxu0  ;;  %v6563_v37 = vpop.f32.mrb[22].mxu1 }
 0x1d9   : > { %v1640_v63 = vadd.f32 %v6363_v0, %v8856_v40  ;;  %v2756_v43 = vadd.f32 %v6563_v37, %v8856_v40  ;;  %v1530_v27 = vpop.f32.mrb[23].mxu0  ;;  %v2652_v22 = vpop.f32.mrb[23].mxu1  ;;  %6729 = vmatmul.mubr.msk.f32.vlgmr.msra.gmra.mrb[32].mxu0 %vm493_vm2, %v7614_v54  ;;  %6929 = vmatmul.mubr.msk.f32.vlgmr.msra.gmra.mrb[32].mxu1 %vm493_vm2, %v9695_v23 }
 0x1da   : > { %v1639_v45 = vadd.f32 %v8856_v40, %v1530_v27  ;;  %v2755_v8 = vadd.f32 %v8856_v40, %v2652_v22  ;;  %6731 = vmatprep.mubr.msk.f32.mxu0 %vm493_vm2, %v7622_v58  ;;  %6931 = vmatprep.mubr.msk.f32.mxu1 %vm493_vm2, %v9696_v55 }
 0x1db   : > { %1672 = vst.msk [vmem:[%s8865_s7 + $0xb8] sm:$0xff] %vm493_vm2, %v1640_v63  ;;  %5300 = vst.msk [vmem:[%s8865_s7 + $0x1b8] sm:$0xff] %vm493_vm2, %v2756_v43 }
 0x1dc   : > { %1671 = vst.msk [vmem:[%s8865_s7 + $0xb0] sm:$0xff] %vm493_vm2, %v1639_v45  ;;  %5299 = vst.msk [vmem:[%s8865_s7 + $0x1b0] sm:$0xff] %vm493_vm2, %v2755_v8  ;;  %v6366_v54 = vpop.f32.mrb[24].mxu0  ;;  %v6566_v23 = vpop.f32.mrb[24].mxu1 }
 0x1dd   : > { %v1642_v16 = vadd.f32 %v6366_v54, %v8856_v40  ;;  %v2758_v58 = vadd.f32 %v6566_v23, %v8856_v40  ;;  %v1540_v25 = vpop.f32.mrb[25].mxu0  ;;  %v2662_v55 = vpop.f32.mrb[25].mxu1  ;;  %6732 = vmatmul.mubr.msk.f32.gmra.mrb[34].mxu0 %vm493_vm2, %v7641_v1  ;;  %6932 = vmatmul.mubr.msk.f32.gmra.mrb[34].mxu1 %vm493_vm2, %v9697_v61 }
 0x1de   : > { %v1641_v62 = vadd.f32 %v8856_v40, %v1540_v25  ;;  %v2757_v6 = vadd.f32 %v8856_v40, %v2662_v55  ;;  %6734 = vmatprep.mubr.msk.f32.mxu0 %vm493_vm2, %v7651_v3  ;;  %6934 = vmatprep.mubr.msk.f32.mxu1 %vm493_vm2, %v9698_v35 }
 0x1df   : > { %1674 = vst.msk [vmem:[%s8865_s7 + $0xc8] sm:$0xff] %vm493_vm2, %v1642_v16  ;;  %5302 = vst.msk [vmem:[%s8865_s7 + $0x1c8] sm:$0xff] %vm493_vm2, %v2758_v58 }
 0x1e0   : > { %1673 = vst.msk [vmem:[%s8865_s7 + $0xc0] sm:$0xff] %vm493_vm2, %v1641_v62  ;;  %5301 = vst.msk [vmem:[%s8865_s7 + $0x1c0] sm:$0xff] %vm493_vm2, %v2757_v6  ;;  %v6369_v1 = vpop.f32.mrb[26].mxu0  ;;  %v6569_v61 = vpop.f32.mrb[26].mxu1 }
 0x1e1   : > { %v1644_v38 = vadd.f32 %v6369_v1, %v8856_v40  ;;  %v2760_v3 = vadd.f32 %v6569_v61, %v8856_v40  ;;  %v1550_v17 = vpop.f32.mrb[27].mxu0  ;;  %v2672_v35 = vpop.f32.mrb[27].mxu1  ;;  %6735 = vmatmul.mubr.msk.f32.gmra.mrb[36].mxu0 %vm493_vm2, %v7676_v21  ;;  %6935 = vmatmul.mubr.msk.f32.gmra.mrb[36].mxu1 %vm493_vm2, %v9699_v10 }
 0x1e2   : > { %v1643_v11 = vadd.f32 %v8856_v40, %v1550_v17  ;;  %v2759_v29 = vadd.f32 %v8856_v40, %v2672_v35  ;;  %6737 = vmatprep.mubr.msk.f32.mxu0 %vm493_vm2, %v7684_v32  ;;  %6937 = vmatprep.mubr.msk.f32.mxu1 %vm493_vm2, %v9700_v13 }
 0x1e3   : > { %1676 = vst.msk [vmem:[%s8865_s7 + $0xd8] sm:$0xff] %vm493_vm2, %v1644_v38  ;;  %5304 = vst.msk [vmem:[%s8865_s7 + $0x1d8] sm:$0xff] %vm493_vm2, %v2760_v3 }
 0x1e4   : > { %1675 = vst.msk [vmem:[%s8865_s7 + $0xd0] sm:$0xff] %vm493_vm2, %v1643_v11  ;;  %5303 = vst.msk [vmem:[%s8865_s7 + $0x1d0] sm:$0xff] %vm493_vm2, %v2759_v29  ;;  %v6372_v21 = vpop.f32.mrb[28].mxu0  ;;  %v6572_v10 = vpop.f32.mrb[28].mxu1 }
 0x1e5   : > { %v1646_v59 = vadd.f32 %v6372_v21, %v8856_v40  ;;  %v2762_v32 = vadd.f32 %v6572_v10, %v8856_v40  ;;  %v1560_v0 = vpop.f32.mrb[29].mxu0  ;;  %v2682_v13 = vpop.f32.mrb[29].mxu1  ;;  %6738 = vmatmul.mubr.msk.f32.gmra.mrb[38].mxu0 %vm493_vm2, %v7703_v44  ;;  %6938 = vmatmul.mubr.msk.f32.gmra.mrb[38].mxu1 %vm493_vm2, %v9701_v60 }
 0x1e6   : > { %v1645_v37 = vadd.f32 %v8856_v40, %v1560_v0  ;;  %v2761_v63 = vadd.f32 %v8856_v40, %v2682_v13  ;;  %6740 = vmatprep.mubr.msk.f32.mxu0 %vm493_vm2, %v7713_v49  ;;  %6940 = vmatprep.mubr.msk.f32.mxu1 %vm493_vm2, %v9702_v14 }
 0x1e7   : > { %1678 = vst.msk [vmem:[%s8865_s7 + $0xe8] sm:$0xff] %vm493_vm2, %v1646_v59  ;;  %5306 = vst.msk [vmem:[%s8865_s7 + $0x1e8] sm:$0xff] %vm493_vm2, %v2762_v32 }
 0x1e8   : > { %1677 = vst.msk [vmem:[%s8865_s7 + $0xe0] sm:$0xff] %vm493_vm2, %v1645_v37  ;;  %5305 = vst.msk [vmem:[%s8865_s7 + $0x1e0] sm:$0xff] %vm493_vm2, %v2761_v63  ;;  %v6375_v44 = vpop.f32.mrb[30].mxu0  ;;  %v6575_v60 = vpop.f32.mrb[30].mxu1 }
 0x1e9   : > { %v1648_v43 = vadd.f32 %v6375_v44, %v8856_v40  ;;  %v2764_v49 = vadd.f32 %v6575_v60, %v8856_v40  ;;  %v1570_v27 = vpop.f32.mrb[31].mxu0  ;;  %v2692_v14 = vpop.f32.mrb[31].mxu1  ;;  %6741 = vmatmul.mubr.msk.f32.gmra.mrb[40].mxu0 %vm493_vm2, %v7738_v9  ;;  %6941 = vmatmul.mubr.msk.f32.gmra.mrb[40].mxu1 %vm493_vm2, %v9703_v34  ;;  %v9752_v9 = vld [vmem:[#allocation28_spill] sm:$0xff] }
 0x1ea   : > { %v1647_v22 = vadd.f32 %v8856_v40, %v1570_v27  ;;  %v2763_v45 = vadd.f32 %v8856_v40, %v2692_v14  ;;  %6743 = vmatprep.mubr.msk.f32.mxu0 %vm493_vm2, %v7746_v19  ;;  %6943 = vmatprep.mubr.msk.f32.mxu1 %vm493_vm2, %v9704_v20  ;;  %v9753_v19 = vld [vmem:[#allocation31_spill] sm:$0xff] }
 0x1eb   : > { %1680 = vst.msk [vmem:[%s8865_s7 + $0xf8] sm:$0xff] %vm493_vm2, %v1648_v43  ;;  %5308 = vst.msk [vmem:[%s8865_s7 + $0x1f8] sm:$0xff] %vm493_vm2, %v2764_v49 }
 0x1ec   : > { %1679 = vst.msk [vmem:[%s8865_s7 + $0xf0] sm:$0xff] %vm493_vm2, %v1647_v22  ;;  %5307 = vst.msk [vmem:[%s8865_s7 + $0x1f0] sm:$0xff] %vm493_vm2, %v2763_v45 }
 0x1ed   : > { %6744 = vmatmul.mubr.msk.f32.gmra.mrb[42].mxu0 %vm493_vm2, %v7765_v50  ;;  %6944 = vmatmul.mubr.msk.f32.gmra.mrb[42].mxu1 %vm493_vm2, %v9705_v24  ;;  %v9754_v50 = vld [vmem:[#allocation33_spill] sm:$0xff] }
 0x1ee   : > { %6746 = vmatprep.mubr.msk.f32.mxu0 %vm493_vm2, %v7775_v52  ;;  %6946 = vmatprep.mubr.msk.f32.mxu1 %vm493_vm2, %v9706_v2  ;;  %v9755_v52 = vld [vmem:[#allocation37_spill] sm:$0xff]  ;;  %v9766_v2 = vld [vmem:[#allocation38_spill] sm:$0xff] }
 0x1f1   : > { %6747 = vmatmul.mubr.msk.f32.gmra.mrb[44].mxu0 %vm493_vm2, %v7800_v28  ;;  %6947 = vmatmul.mubr.msk.f32.gmra.mrb[44].mxu1 %vm493_vm2, %v9707_v36  ;;  %v9757_v28 = vld [vmem:[#allocation43_spill] sm:$0xff] }
 0x1f2   : > { %6749 = vmatprep.mubr.msk.f32.mxu0 %vm493_vm2, %v7808_v51  ;;  %6949 = vmatprep.mubr.msk.f32.mxu1 %vm493_vm2, %v9752_v9  ;;  %v9756_v51 = vld [vmem:[#allocation39_spill] sm:$0xff] }
 0x1f3   : > { %v9762_v36 = vld [vmem:[#allocation55_spill] sm:$0xff] }
 0x1f5   : > { %6750 = vmatmul.mubr.msk.f32.gmra.mrb[46].mxu0 %vm493_vm2, %v7827_v56  ;;  %6950 = vmatmul.mubr.msk.f32.gmra.mrb[46].mxu1 %vm493_vm2, %v9753_v19  ;;  %v9758_v56 = vld [vmem:[#allocation45_spill] sm:$0xff] }
 0x1f6   : > { %6752 = vmatprep.mubr.msk.f32.mxu0 %vm493_vm2, %v9674_v4  ;;  %6952 = vmatprep.mubr.msk.f32.mxu1 %vm493_vm2, %v9754_v50  ;;  %v9759_v4 = vld [vmem:[#allocation49_spill] sm:$0xff] }
 0x1f9   : > { %6753 = vmatmul.mubr.msk.f32.gmra.mrb[48].mxu0 %vm493_vm2, %v9676_v18  ;;  %6953 = vmatmul.mubr.msk.f32.gmra.mrb[48].mxu1 %vm493_vm2, %v9755_v52  ;;  %v9760_v18 = vld [vmem:[#allocation50_spill] sm:$0xff] }
 0x1fa   : > { %6755 = vmatprep.mubr.msk.f32.mxu0 %vm493_vm2, %v9678_v30  ;;  %6955 = vmatprep.mubr.msk.f32.mxu1 %vm493_vm2, %v9756_v51  ;;  %v9761_v30 = vld [vmem:[#allocation53_spill] sm:$0xff] }
 0x1fd   : > { %6756 = vmatmul.mubr.msk.f32.gmra.mrb[50].mxu0 %vm493_vm2, %v9680_v31  ;;  %6956 = vmatmul.mubr.msk.f32.gmra.mrb[50].mxu1 %vm493_vm2, %v9757_v28  ;;  %v9763_v31 = vld [vmem:[#allocation56_spill] sm:$0xff] }
 0x1fe   : > { %6758 = vmatprep.mubr.msk.f32.mxu0 %vm493_vm2, %v9682_v26  ;;  %6958 = vmatprep.mubr.msk.f32.mxu1 %vm493_vm2, %v9758_v56 }
 0x201   : > { %6759 = vmatmul.mubr.msk.f32.gmra.mrb[52].mxu0 %vm493_vm2, %v9724_v15  ;;  %6959 = vmatmul.mubr.msk.f32.gmra.mrb[52].mxu1 %vm493_vm2, %v9759_v4 }
 0x202   : > { %6761 = vmatprep.mubr.msk.f32.mxu0 %vm493_vm2, %v7932_v57  ;;  %6961 = vmatprep.mubr.msk.f32.mxu1 %vm493_vm2, %v9760_v18  ;;  %v9764_v57 = vld [vmem:[#allocation57_spill] sm:$0xff] }
 0x205   : > { %6762 = vmatmul.mubr.msk.f32.gmra.mrb[54].mxu0 %vm493_vm2, %v7951_v53  ;;  %6962 = vmatmul.mubr.msk.f32.gmra.mrb[54].mxu1 %vm493_vm2, %v9761_v30  ;;  %v9765_v53 = vld [vmem:[#allocation58_spill] sm:$0xff] }
 0x206   : > { %6764 = vmatprep.mubr.msk.f32.mxu0 %vm493_vm2, %v9728_v48  ;;  %6964 = vmatprep.mubr.msk.f32.mxu1 %vm493_vm2, %v9762_v36 }
 0x209   : > { %6765 = vmatmul.mubr.msk.f32.gmra.mrb[56].mxu0 %vm493_vm2, %v7980_v7  ;;  %6965 = vmatmul.mubr.msk.f32.gmra.mrb[56].mxu1 %vm493_vm2, %v9763_v31 }
 0x20a   : > { %6767 = vmatprep.mubr.msk.f32.mxu0 %vm493_vm2, %v7986_v42  ;;  %6967 = vmatprep.mubr.msk.f32.mxu1 %vm493_vm2, %v9764_v57  ;;  %v9767_v42 = vld [vmem:[#allocation42_spill] sm:$0xff] }
 0x20d   : > { %6768 = vmatmul.mubr.msk.f32.gmra.mrb[58].mxu0 %vm493_vm2, %v8000_v33  ;;  %6968 = vmatmul.mubr.msk.f32.gmra.mrb[58].mxu1 %vm493_vm2, %v9765_v53 }
 0x20e   : > { %6770 = vmatprep.mubr.msk.f32.mxu0 %vm493_vm2, %v8302_v46  ;;  %6970 = vmatprep.mubr.msk.f32.mxu1 %vm493_vm2, %v9766_v2 }
 0x211   : > { %6771 = vmatmul.mubr.msk.f32.gmra.mrb[60].mxu0 %vm493_vm2, %v8313_v47  ;;  %6971 = vmatmul.mubr.msk.f32.gmra.mrb[60].mxu1 %vm493_vm2, %v9767_v42 }
 0x212   : > { %6773 = vmatprep.mubr.msk.f32.mxu0 %vm493_vm2, %v9047_v41  ;;  %6973 = vmatprep.mubr.msk.f32.mxu1 %vm493_vm2, %v8799_v5 }
 0x215   : > { %6774 = vmatmul.mubr.msk.f32.gmra.mrb[62].mxu0 %vm493_vm2, %v9066_v12  ;;  %6974 = vmatmul.mubr.msk.f32.gmra.mrb[62].mxu1 %vm493_vm2, %v8802_v39 }
 0x2ac   : > { %v6730_v7 = vpop.f32.mrb[32].mxu0  ;;  %v6930_v33 = vpop.f32.mrb[32].mxu1 }
 0x2ad   : > { %v3791_v26 = vadd.f32 %v6730_v7, %v8856_v40  ;;  %v4844_v24 = vadd.f32 %v6930_v33, %v8856_v40  ;;  %v3599_v20 = vpop.f32.mrb[33].mxu0  ;;  %v4652_v34 = vpop.f32.mrb[33].mxu1 }
 0x2ae   : > { %v3790_v46 = vadd.f32 %v8856_v40, %v3599_v20  ;;  %v4843_v5 = vadd.f32 %v8856_v40, %v4652_v34 }
 0x2af   : > { %5446 = vst.msk [vmem:[%s8865_s7 + $0x208] sm:$0xff] %vm493_vm2, %v3791_v26  ;;  %5614 = vst.msk [vmem:[%s8865_s7 + $0x308] sm:$0xff] %vm493_vm2, %v4844_v24 }
 0x2b0   : > { %5445 = vst.msk [vmem:[%s8865_s7 + $0x200] sm:$0xff] %vm493_vm2, %v3790_v46  ;;  %5613 = vst.msk [vmem:[%s8865_s7 + $0x300] sm:$0xff] %vm493_vm2, %v4843_v5  ;;  %v6733_v47 = vpop.f32.mrb[34].mxu0  ;;  %v6933_v15 = vpop.f32.mrb[34].mxu1 }
 0x2b1   : > { %v3793_v48 = vadd.f32 %v6733_v47, %v8856_v40  ;;  %v4846_v39 = vadd.f32 %v6933_v15, %v8856_v40  ;;  %v3609_v41 = vpop.f32.mrb[35].mxu0  ;;  %v4662_v12 = vpop.f32.mrb[35].mxu1 }
 0x2b2   : > { %v3792_v8 = vadd.f32 %v8856_v40, %v3609_v41  ;;  %v4845_v54 = vadd.f32 %v8856_v40, %v4662_v12 }
 0x2b3   : > { %5448 = vst.msk [vmem:[%s8865_s7 + $0x218] sm:$0xff] %vm493_vm2, %v3793_v48  ;;  %5616 = vst.msk [vmem:[%s8865_s7 + $0x318] sm:$0xff] %vm493_vm2, %v4846_v39 }
 0x2b4   : > { %5447 = vst.msk [vmem:[%s8865_s7 + $0x210] sm:$0xff] %vm493_vm2, %v3792_v8  ;;  %5615 = vst.msk [vmem:[%s8865_s7 + $0x310] sm:$0xff] %vm493_vm2, %v4845_v54  ;;  %v6736_v23 = vpop.f32.mrb[36].mxu0  ;;  %v6936_v16 = vpop.f32.mrb[36].mxu1 }
 0x2b5   : > { %v3795_v58 = vadd.f32 %v6736_v23, %v8856_v40  ;;  %v4848_v25 = vadd.f32 %v6936_v16, %v8856_v40  ;;  %v3619_v55 = vpop.f32.mrb[37].mxu0  ;;  %v4672_v62 = vpop.f32.mrb[37].mxu1 }
 0x2b6   : > { %v3794_v6 = vadd.f32 %v8856_v40, %v3619_v55  ;;  %v4847_v1 = vadd.f32 %v8856_v40, %v4672_v62 }
 0x2b7   : > { %5450 = vst.msk [vmem:[%s8865_s7 + $0x228] sm:$0xff] %vm493_vm2, %v3795_v58  ;;  %5618 = vst.msk [vmem:[%s8865_s7 + $0x328] sm:$0xff] %vm493_vm2, %v4848_v25 }
 0x2b8   : > { %5449 = vst.msk [vmem:[%s8865_s7 + $0x220] sm:$0xff] %vm493_vm2, %v3794_v6  ;;  %5617 = vst.msk [vmem:[%s8865_s7 + $0x320] sm:$0xff] %vm493_vm2, %v4847_v1  ;;  %v6739_v61 = vpop.f32.mrb[38].mxu0  ;;  %v6939_v38 = vpop.f32.mrb[38].mxu1 }
 0x2b9   : > { %v3797_v3 = vadd.f32 %v6739_v61, %v8856_v40  ;;  %v4850_v17 = vadd.f32 %v6939_v38, %v8856_v40  ;;  %v3629_v35 = vpop.f32.mrb[39].mxu0  ;;  %v4682_v11 = vpop.f32.mrb[39].mxu1 }
 0x2ba   : > { %v3796_v29 = vadd.f32 %v8856_v40, %v3629_v35  ;;  %v4849_v21 = vadd.f32 %v8856_v40, %v4682_v11 }
 0x2bb   : > { %5452 = vst.msk [vmem:[%s8865_s7 + $0x238] sm:$0xff] %vm493_vm2, %v3797_v3  ;;  %5620 = vst.msk [vmem:[%s8865_s7 + $0x338] sm:$0xff] %vm493_vm2, %v4850_v17 }
 0x2bc   : > { %5451 = vst.msk [vmem:[%s8865_s7 + $0x230] sm:$0xff] %vm493_vm2, %v3796_v29  ;;  %5619 = vst.msk [vmem:[%s8865_s7 + $0x330] sm:$0xff] %vm493_vm2, %v4849_v21  ;;  %v6742_v10 = vpop.f32.mrb[40].mxu0  ;;  %v6942_v59 = vpop.f32.mrb[40].mxu1 }
 0x2bd   : > { %v3799_v32 = vadd.f32 %v6742_v10, %v8856_v40  ;;  %v4852_v0 = vadd.f32 %v6942_v59, %v8856_v40  ;;  %v3639_v13 = vpop.f32.mrb[41].mxu0  ;;  %v4692_v37 = vpop.f32.mrb[41].mxu1 }
 0x2be   : > { %v3798_v63 = vadd.f32 %v8856_v40, %v3639_v13  ;;  %v4851_v44 = vadd.f32 %v8856_v40, %v4692_v37 }
 0x2bf   : > { %5454 = vst.msk [vmem:[%s8865_s7 + $0x248] sm:$0xff] %vm493_vm2, %v3799_v32  ;;  %5622 = vst.msk [vmem:[%s8865_s7 + $0x348] sm:$0xff] %vm493_vm2, %v4852_v0 }
 0x2c0   : > { %5453 = vst.msk [vmem:[%s8865_s7 + $0x240] sm:$0xff] %vm493_vm2, %v3798_v63  ;;  %5621 = vst.msk [vmem:[%s8865_s7 + $0x340] sm:$0xff] %vm493_vm2, %v4851_v44  ;;  %v6745_v60 = vpop.f32.mrb[42].mxu0  ;;  %v6945_v43 = vpop.f32.mrb[42].mxu1 }
 0x2c1   : > { %v3801_v49 = vadd.f32 %v6745_v60, %v8856_v40  ;;  %v4854_v27 = vadd.f32 %v6945_v43, %v8856_v40  ;;  %v3649_v14 = vpop.f32.mrb[43].mxu0  ;;  %v4702_v22 = vpop.f32.mrb[43].mxu1 }
 0x2c2   : > { %v3800_v45 = vadd.f32 %v8856_v40, %v3649_v14  ;;  %v4853_v9 = vadd.f32 %v8856_v40, %v4702_v22 }
 0x2c3   : > { %5456 = vst.msk [vmem:[%s8865_s7 + $0x258] sm:$0xff] %vm493_vm2, %v3801_v49  ;;  %5624 = vst.msk [vmem:[%s8865_s7 + $0x358] sm:$0xff] %vm493_vm2, %v4854_v27 }
 0x2c4   : > { %5455 = vst.msk [vmem:[%s8865_s7 + $0x250] sm:$0xff] %vm493_vm2, %v3800_v45  ;;  %5623 = vst.msk [vmem:[%s8865_s7 + $0x350] sm:$0xff] %vm493_vm2, %v4853_v9  ;;  %v6748_v19 = vpop.f32.mrb[44].mxu0  ;;  %v6948_v50 = vpop.f32.mrb[44].mxu1 }
 0x2c5   : > { %v3803_v52 = vadd.f32 %v6748_v19, %v8856_v40  ;;  %v4856_v51 = vadd.f32 %v6948_v50, %v8856_v40  ;;  %v3659_v28 = vpop.f32.mrb[45].mxu0  ;;  %v4712_v56 = vpop.f32.mrb[45].mxu1 }
 0x2c6   : > { %v3802_v4 = vadd.f32 %v8856_v40, %v3659_v28  ;;  %v4855_v18 = vadd.f32 %v8856_v40, %v4712_v56 }
 0x2c7   : > { %5458 = vst.msk [vmem:[%s8865_s7 + $0x268] sm:$0xff] %vm493_vm2, %v3803_v52  ;;  %5626 = vst.msk [vmem:[%s8865_s7 + $0x368] sm:$0xff] %vm493_vm2, %v4856_v51 }
 0x2c8   : > { %5457 = vst.msk [vmem:[%s8865_s7 + $0x260] sm:$0xff] %vm493_vm2, %v3802_v4  ;;  %5625 = vst.msk [vmem:[%s8865_s7 + $0x360] sm:$0xff] %vm493_vm2, %v4855_v18  ;;  %v6751_v30 = vpop.f32.mrb[46].mxu0  ;;  %v6951_v36 = vpop.f32.mrb[46].mxu1 }
 0x2c9   : > { %v3805_v31 = vadd.f32 %v6751_v30, %v8856_v40  ;;  %v4858_v57 = vadd.f32 %v6951_v36, %v8856_v40  ;;  %v3669_v53 = vpop.f32.mrb[47].mxu0  ;;  %v4722_v2 = vpop.f32.mrb[47].mxu1 }
 0x2ca   : > { %v3804_v42 = vadd.f32 %v8856_v40, %v3669_v53  ;;  %v4857_v7 = vadd.f32 %v8856_v40, %v4722_v2 }
 0x2cb   : > { %5460 = vst.msk [vmem:[%s8865_s7 + $0x278] sm:$0xff] %vm493_vm2, %v3805_v31  ;;  %5628 = vst.msk [vmem:[%s8865_s7 + $0x378] sm:$0xff] %vm493_vm2, %v4858_v57 }
 0x2cc   : > { %5459 = vst.msk [vmem:[%s8865_s7 + $0x270] sm:$0xff] %vm493_vm2, %v3804_v42  ;;  %5627 = vst.msk [vmem:[%s8865_s7 + $0x370] sm:$0xff] %vm493_vm2, %v4857_v7  ;;  %v6754_v33 = vpop.f32.mrb[48].mxu0  ;;  %v6954_v26 = vpop.f32.mrb[48].mxu1 }
 0x2cd   : > { %v3807_v24 = vadd.f32 %v6754_v33, %v8856_v40  ;;  %v4860_v20 = vadd.f32 %v6954_v26, %v8856_v40  ;;  %v3679_v34 = vpop.f32.mrb[49].mxu0  ;;  %v4732_v46 = vpop.f32.mrb[49].mxu1 }
 0x2ce   : > { %v3806_v5 = vadd.f32 %v8856_v40, %v3679_v34  ;;  %v4859_v47 = vadd.f32 %v8856_v40, %v4732_v46 }
 0x2cf   : > { %5462 = vst.msk [vmem:[%s8865_s7 + $0x288] sm:$0xff] %vm493_vm2, %v3807_v24  ;;  %5630 = vst.msk [vmem:[%s8865_s7 + $0x388] sm:$0xff] %vm493_vm2, %v4860_v20 }
 0x2d0   : > { %5461 = vst.msk [vmem:[%s8865_s7 + $0x280] sm:$0xff] %vm493_vm2, %v3806_v5  ;;  %5629 = vst.msk [vmem:[%s8865_s7 + $0x380] sm:$0xff] %vm493_vm2, %v4859_v47  ;;  %v6757_v15 = vpop.f32.mrb[50].mxu0  ;;  %v6957_v48 = vpop.f32.mrb[50].mxu1 }
 0x2d1   : > { %v3809_v39 = vadd.f32 %v6757_v15, %v8856_v40  ;;  %v4862_v41 = vadd.f32 %v6957_v48, %v8856_v40  ;;  %v3689_v12 = vpop.f32.mrb[51].mxu0  ;;  %v4742_v8 = vpop.f32.mrb[51].mxu1 }
 0x2d2   : > { %v3808_v54 = vadd.f32 %v8856_v40, %v3689_v12  ;;  %v4861_v23 = vadd.f32 %v8856_v40, %v4742_v8 }
 0x2d3   : > { %5464 = vst.msk [vmem:[%s8865_s7 + $0x298] sm:$0xff] %vm493_vm2, %v3809_v39  ;;  %5632 = vst.msk [vmem:[%s8865_s7 + $0x398] sm:$0xff] %vm493_vm2, %v4862_v41 }
 0x2d4   : > { %5463 = vst.msk [vmem:[%s8865_s7 + $0x290] sm:$0xff] %vm493_vm2, %v3808_v54  ;;  %5631 = vst.msk [vmem:[%s8865_s7 + $0x390] sm:$0xff] %vm493_vm2, %v4861_v23  ;;  %v6760_v16 = vpop.f32.mrb[52].mxu0  ;;  %v6960_v58 = vpop.f32.mrb[52].mxu1 }
 0x2d5   : > { %v3811_v25 = vadd.f32 %v6760_v16, %v8856_v40  ;;  %v4864_v55 = vadd.f32 %v6960_v58, %v8856_v40  ;;  %v3699_v62 = vpop.f32.mrb[53].mxu0  ;;  %v4752_v6 = vpop.f32.mrb[53].mxu1 }
 0x2d6   : > { %v3810_v1 = vadd.f32 %v8856_v40, %v3699_v62  ;;  %v4863_v61 = vadd.f32 %v8856_v40, %v4752_v6 }
 0x2d7   : > { %5466 = vst.msk [vmem:[%s8865_s7 + $0x2a8] sm:$0xff] %vm493_vm2, %v3811_v25  ;;  %5634 = vst.msk [vmem:[%s8865_s7 + $0x3a8] sm:$0xff] %vm493_vm2, %v4864_v55 }
 0x2d8   : > { %5465 = vst.msk [vmem:[%s8865_s7 + $0x2a0] sm:$0xff] %vm493_vm2, %v3810_v1  ;;  %5633 = vst.msk [vmem:[%s8865_s7 + $0x3a0] sm:$0xff] %vm493_vm2, %v4863_v61  ;;  %v6763_v38 = vpop.f32.mrb[54].mxu0  ;;  %v6963_v3 = vpop.f32.mrb[54].mxu1 }
 0x2d9   : > { %v3813_v17 = vadd.f32 %v6763_v38, %v8856_v40  ;;  %v4866_v35 = vadd.f32 %v6963_v3, %v8856_v40  ;;  %v3709_v11 = vpop.f32.mrb[55].mxu0  ;;  %v4762_v29 = vpop.f32.mrb[55].mxu1 }
 0x2da   : > { %v3812_v21 = vadd.f32 %v8856_v40, %v3709_v11  ;;  %v4865_v10 = vadd.f32 %v8856_v40, %v4762_v29 }
 0x2db   : > { %5468 = vst.msk [vmem:[%s8865_s7 + $0x2b8] sm:$0xff] %vm493_vm2, %v3813_v17  ;;  %5636 = vst.msk [vmem:[%s8865_s7 + $0x3b8] sm:$0xff] %vm493_vm2, %v4866_v35 }
 0x2dc   : > { %5467 = vst.msk [vmem:[%s8865_s7 + $0x2b0] sm:$0xff] %vm493_vm2, %v3812_v21  ;;  %5635 = vst.msk [vmem:[%s8865_s7 + $0x3b0] sm:$0xff] %vm493_vm2, %v4865_v10  ;;  %v6766_v59 = vpop.f32.mrb[56].mxu0  ;;  %v6966_v32 = vpop.f32.mrb[56].mxu1 }
 0x2dd   : > { %v3815_v0 = vadd.f32 %v6766_v59, %v8856_v40  ;;  %v4868_v13 = vadd.f32 %v6966_v32, %v8856_v40  ;;  %v3719_v37 = vpop.f32.mrb[57].mxu0  ;;  %v4772_v63 = vpop.f32.mrb[57].mxu1 }
 0x2de   : > { %v3814_v44 = vadd.f32 %v8856_v40, %v3719_v37  ;;  %v4867_v60 = vadd.f32 %v8856_v40, %v4772_v63 }
 0x2df   : > { %5470 = vst.msk [vmem:[%s8865_s7 + $0x2c8] sm:$0xff] %vm493_vm2, %v3815_v0  ;;  %5638 = vst.msk [vmem:[%s8865_s7 + $0x3c8] sm:$0xff] %vm493_vm2, %v4868_v13 }
 0x2e0   : > { %5469 = vst.msk [vmem:[%s8865_s7 + $0x2c0] sm:$0xff] %vm493_vm2, %v3814_v44  ;;  %5637 = vst.msk [vmem:[%s8865_s7 + $0x3c0] sm:$0xff] %vm493_vm2, %v4867_v60  ;;  %v6769_v43 = vpop.f32.mrb[58].mxu0  ;;  %v6969_v49 = vpop.f32.mrb[58].mxu1 }
 0x2e1   : > { %v3817_v27 = vadd.f32 %v6769_v43, %v8856_v40  ;;  %v4870_v14 = vadd.f32 %v6969_v49, %v8856_v40  ;;  %v3729_v22 = vpop.f32.mrb[59].mxu0  ;;  %v4782_v45 = vpop.f32.mrb[59].mxu1 }
 0x2e2   : > { %v3816_v9 = vadd.f32 %v8856_v40, %v3729_v22  ;;  %v4869_v19 = vadd.f32 %v8856_v40, %v4782_v45 }
 0x2e3   : > { %5472 = vst.msk [vmem:[%s8865_s7 + $0x2d8] sm:$0xff] %vm493_vm2, %v3817_v27  ;;  %5640 = vst.msk [vmem:[%s8865_s7 + $0x3d8] sm:$0xff] %vm493_vm2, %v4870_v14 }
 0x2e4   : > { %5471 = vst.msk [vmem:[%s8865_s7 + $0x2d0] sm:$0xff] %vm493_vm2, %v3816_v9  ;;  %5639 = vst.msk [vmem:[%s8865_s7 + $0x3d0] sm:$0xff] %vm493_vm2, %v4869_v19  ;;  %v6772_v50 = vpop.f32.mrb[60].mxu0  ;;  %v6972_v52 = vpop.f32.mrb[60].mxu1 }
 0x2e5   : > { %v3819_v51 = vadd.f32 %v6772_v50, %v8856_v40  ;;  %v4872_v28 = vadd.f32 %v6972_v52, %v8856_v40  ;;  %v3739_v56 = vpop.f32.mrb[61].mxu0  ;;  %v4792_v4 = vpop.f32.mrb[61].mxu1 }
 0x2e6   : > { %v3818_v18 = vadd.f32 %v8856_v40, %v3739_v56  ;;  %v4871_v30 = vadd.f32 %v8856_v40, %v4792_v4 }
 0x2e7   : > { %5474 = vst.msk [vmem:[%s8865_s7 + $0x2e8] sm:$0xff] %vm493_vm2, %v3819_v51  ;;  %5642 = vst.msk [vmem:[%s8865_s7 + $0x3e8] sm:$0xff] %vm493_vm2, %v4872_v28 }
 0x2e8   : > { %5473 = vst.msk [vmem:[%s8865_s7 + $0x2e0] sm:$0xff] %vm493_vm2, %v3818_v18  ;;  %5641 = vst.msk [vmem:[%s8865_s7 + $0x3e0] sm:$0xff] %vm493_vm2, %v4871_v30  ;;  %v6775_v36 = vpop.f32.mrb[62].mxu0  ;;  %v6975_v31 = vpop.f32.mrb[62].mxu1 }
 0x2e9   : > { %v3821_v57 = vadd.f32 %v6775_v36, %v8856_v40  ;;  %v4874_v53 = vadd.f32 %v6975_v31, %v8856_v40  ;;  %v3749_v2 = vpop.f32.mrb[63].mxu0  ;;  %v4802_v42 = vpop.f32.mrb[63].mxu1 }
 0x2ea   : > { %v3820_v7 = vadd.f32 %v8856_v40, %v3749_v2  ;;  %v4873_v33 = vadd.f32 %v8856_v40, %v4802_v42 }
 0x2eb   : > { %5476 = vst.msk [vmem:[%s8865_s7 + $0x2f8] sm:$0xff] %vm493_vm2, %v3821_v57  ;;  %5644 = vst.msk [vmem:[%s8865_s7 + $0x3f8] sm:$0xff] %vm493_vm2, %v4874_v53 }
 0x2ec   : > { %5475 = vst.msk [vmem:[%s8865_s7 + $0x2f0] sm:$0xff] %vm493_vm2, %v3820_v7  ;;  %5643 = vst.msk [vmem:[%s8865_s7 + $0x3f0] sm:$0xff] %vm493_vm2, %v4873_v33 }
 0x2ed PF: > { %s13_s14 = sadd.s32 1, %s7437_s14   ;;  %s9768_s12 = smov %s7433_s13 }
 0x2ee   : > { %p10_p5 = scmp.ge.s32.totalorder %s13_s14, 4   ;;  %s9769_s13 = smov %s9771_s15 }
 0x2f0   :  { %12 = sbr.rel (!%p10_p5) target bundleno = 2 (0x2), region = 81 }

</bundles_post_ra>
